<compile_context>
chip_gen: v7x
topology: tpu7x:2x2x1
jax: 0.10.0
libtpu: 0.0.40
codegen_flags: <defaults>
</compile_context>

<pallas_src>
import functools
import math

import jax
import jax.numpy as jnp
from jax.experimental import pallas as pl
from jax.experimental.pallas import tpu as pltpu


# ---------------------------------------------------------------------------
# In-kernel helpers (operate on VMEM values)
# ---------------------------------------------------------------------------

def _layernorm(x, eps):
    """Reference LayerNorm: a=ones, b=zeros (plain tensors in the reference),
    unbiased std (divide by n-1), eps added to the *std*."""
    d = x.shape[-1]
    mean = jnp.mean(x, axis=-1, keepdims=True)
    diff = x - mean
    var = jnp.sum(diff * diff, axis=-1, keepdims=True) * (1.0 / (d - 1))
    return diff / (jnp.sqrt(var) + eps)


def _mha(q, k, v, mask, h, dk):
    """Multi-head attention core.

    q: (Tq, D) f32, k/v: (Tk, D) f32, mask: (Tq or 1, Tk) with 0 = masked.
    The 1/sqrt(dk) score scale is already folded into the Q projection.
    """
    outs = []
    for hh in range(h):
        sl = slice(hh * dk, (hh + 1) * dk)
        qh = q[:, sl].astype(jnp.bfloat16)
        kh = k[:, sl].astype(jnp.bfloat16)
        vh = v[:, sl].astype(jnp.bfloat16)
        # scores = qh @ kh.T (contraction over dk), f32 accumulate on the MXU
        s = jax.lax.dot_general(qh, kh, (((1,), (1,)), ((), ())),
                                preferred_element_type=jnp.float32)   # (Tq, Tk)
        s = jnp.where(mask != 0, s, jnp.float32(-1e9))                # masked_fill(mask==0,-1e9)
        s = s - jnp.max(s, axis=-1, keepdims=True)                    # stable softmax
        p = jnp.exp(s)
        p = p * pl.reciprocal(jnp.sum(p, axis=-1, keepdims=True), approx=True)
        outs.append(jnp.dot(p.astype(jnp.bfloat16), vh,
                            preferred_element_type=jnp.float32))      # (Tq, dk)
    return jnp.concatenate(outs, axis=-1)                             # (Tq, D)


# ---------------------------------------------------------------------------
# Fused decoder-stack kernel: grid = (batch, layer)
# ---------------------------------------------------------------------------

def _decoder_stack_kernel(x_ref, mem_ref, tmask_ref, smask_ref,
                          wqkv_s_ref, bqkv_s_ref, wo_s_ref, bo_s_ref,
                          wq_x_ref, bq_x_ref, wkv_x_ref, bkv_x_ref,
                          wo_x_ref, bo_x_ref,
                          w1_ref, b1_ref, w2_ref, b2_ref,
                          o_ref, *, h, dk, eps):
    """One decoder layer for one batch element.  The activation is carried in
    the output block (same block index across the layer axis => VMEM-resident
    accumulator); the final LayerNorm is applied on the last layer step."""
    D = h * dk
    l = pl.program_id(1)
    n_layers = pl.num_programs(1)

    @pl.when(l == 0)
    def _():
        o_ref[0] = x_ref[0]          # seed the carried activation

    x = o_ref[0]                     # (T, D)  f32, carried across layers
    mem = mem_ref[0]                 # (S, D)  f32
    tmask = tmask_ref[0]             # (T, T)
    smask = smask_ref[0]             # (1, S)

    # -------- sublayer 1: masked self-attention (pre-norm, residual fused) --
    xn = _layernorm(x, eps)
    qkv = jnp.dot(xn.astype(jnp.bfloat16), wqkv_s_ref[0],
                  preferred_element_type=jnp.float32) + bqkv_s_ref[0]
    q, k, v = qkv[:, :D], qkv[:, D:2 * D], qkv[:, 2 * D:]
    attn = _mha(q, k, v, tmask, h, dk)
    x = x + (jnp.dot(attn.astype(jnp.bfloat16), wo_s_ref[0],
                     preferred_element_type=jnp.float32) + bo_s_ref[0])

    # -------- sublayer 2: cross-attention over encoder memory ---------------
    xn = _layernorm(x, eps)
    q = jnp.dot(xn.astype(jnp.bfloat16), wq_x_ref[0],
                preferred_element_type=jnp.float32) + bq_x_ref[0]
    kv = jnp.dot(mem.astype(jnp.bfloat16), wkv_x_ref[0],
                 preferred_element_type=jnp.float32) + bkv_x_ref[0]
    k, v = kv[:, :D], kv[:, D:]
    attn = _mha(q, k, v, smask, h, dk)
    x = x + (jnp.dot(attn.astype(jnp.bfloat16), wo_x_ref[0],
                     preferred_element_type=jnp.float32) + bo_x_ref[0])

    # -------- sublayer 3: position-wise feed-forward -------------------------
    xn = _layernorm(x, eps)
    hdn = jnp.dot(xn.astype(jnp.bfloat16), w1_ref[0],
                  preferred_element_type=jnp.float32) + b1_ref[0]
    hdn = jnp.maximum(hdn, 0.0)                                      # ReLU
    x = x + (jnp.dot(hdn.astype(jnp.bfloat16), w2_ref[0],
                     preferred_element_type=jnp.float32) + b2_ref[0])

    @pl.when(l < n_layers - 1)
    def _():
        o_ref[0] = x                 # carry to next layer (stays in VMEM)

    @pl.when(l == n_layers - 1)
    def _():
        o_ref[0] = _layernorm(x, eps)   # fused final Decoder.norm


# ---------------------------------------------------------------------------
# Wrapper
# ---------------------------------------------------------------------------

def decoder_forward(params, x, memory, source_mask, target_mask, h, eps=1e-6):
    """= torch Decoder.forward(x, memory, source_mask, target_mask)."""
    B, T, D = x.shape
    S = memory.shape[1]
    dk = D // h
    L = params["wqkv_s"].shape[0]
    dff = params["w1"].shape[2]

    def wspec(shape):                      # per-layer weight block
        return pl.BlockSpec((1,) + shape, lambda b, l: (l, 0, 0))

    def bspec(shape):                      # per-batch activation / mask block
        return pl.BlockSpec((1,) + shape, lambda b, l: (b, 0, 0))

    return pl.pallas_call(
        functools.partial(_decoder_stack_kernel, h=h, dk=dk, eps=eps),
        out_shape=jax.ShapeDtypeStruct((B, T, D), jnp.float32),
        grid=(B, L),
        in_specs=[
            bspec((T, D)),                 # x
            bspec((S, D)),                 # memory
            bspec((T, T)),                 # target_mask
            bspec((1, S)),                 # source_mask
            wspec((D, 3 * D)), wspec((1, 3 * D)),   # fused QKV (self)
            wspec((D, D)),     wspec((1, D)),       # self out proj
            wspec((D, D)),     wspec((1, D)),       # cross Q proj
            wspec((D, 2 * D)), wspec((1, 2 * D)),   # fused KV (cross)
            wspec((D, D)),     wspec((1, D)),       # cross out proj
            wspec((D, dff)),   wspec((1, dff)),     # FFN W1
            wspec((dff, D)),   wspec((1, D)),       # FFN W2
        ],
        out_specs=pl.BlockSpec((1, T, D), lambda b, l: (b, 0, 0)),
        compiler_params=pltpu.CompilerParams(
            dimension_semantics=("parallel", "arbitrary"),
            vmem_limit_bytes=64 * 1024 * 1024),
    )(x, memory, target_mask, source_mask,
      params["wqkv_s"], params["bqkv_s"], params["wo_s"], params["bo_s"],
      params["wq_x"], params["bq_x"], params["wkv_x"], params["bkv_x"],
      params["wo_x"], params["bo_x"],
      params["w1"], params["b1"], params["w2"], params["b2"])


# ---------------------------------------------------------------------------
# Deterministic parameter construction (weights pre-transposed to (in, out),
# fused QKV/KV, score scale folded into Q projection, bf16 weight storage,
# stacked along a leading layer dim for the single-kernel decoder stack).
# ---------------------------------------------------------------------------

def init_params(key, d_model, d_ff, n_layers, h):
    dk = d_model // h
    scale = 1.0 / math.sqrt(dk)

    def lin(k, din, dout):
        w = jax.random.normal(k, (din, dout), jnp.float32) * 0.02
        b = jnp.zeros((1, dout), jnp.float32)
        return w, b

    names = ("wqkv_s", "bqkv_s", "wo_s", "bo_s", "wq_x", "bq_x",
             "wkv_x", "bkv_x", "wo_x", "bo_x", "w1", "b1", "w2", "b2")
    acc = {n: [] for n in names}

    for lk in jax.random.split(key, n_layers):
        ks = jax.random.split(lk, 10)
        wq_s, bq_s = lin(ks[0], d_model, d_model)
        wk_s, bk_s = lin(ks[1], d_model, d_model)
        wv_s, bv_s = lin(ks[2], d_model, d_model)
        wo_s, bo_s = lin(ks[3], d_model, d_model)
        wq_x, bq_x = lin(ks[4], d_model, d_model)
        wk_x, bk_x = lin(ks[5], d_model, d_model)
        wv_x, bv_x = lin(ks[6], d_model, d_model)
        wo_x, bo_x = lin(ks[7], d_model, d_model)
        w1, b1 = lin(ks[8], d_model, d_ff)
        w2, b2 = lin(ks[9], d_ff, d_model)
        # fused QKV; 1/sqrt(dk) folded into the Q columns (weights + bias)
        acc["wqkv_s"].append(jnp.concatenate([wq_s * scale, wk_s, wv_s],
                                             axis=1).astype(jnp.bfloat16))
        acc["bqkv_s"].append(jnp.concatenate([bq_s * scale, bk_s, bv_s], axis=1))
        acc["wo_s"].append(wo_s.astype(jnp.bfloat16)); acc["bo_s"].append(bo_s)
        acc["wq_x"].append((wq_x * scale).astype(jnp.bfloat16))
        acc["bq_x"].append(bq_x * scale)
        acc["wkv_x"].append(jnp.concatenate([wk_x, wv_x], axis=1
                                            ).astype(jnp.bfloat16))
        acc["bkv_x"].append(jnp.concatenate([bk_x, bv_x], axis=1))
        acc["wo_x"].append(wo_x.astype(jnp.bfloat16)); acc["bo_x"].append(bo_x)
        acc["w1"].append(w1.astype(jnp.bfloat16)); acc["b1"].append(b1)
        acc["w2"].append(w2.astype(jnp.bfloat16)); acc["b2"].append(b2)

    return {k: jnp.stack(v, axis=0) for k, v in acc.items()}


if __name__ == "__main__":
    B, T, S, D, H, DFF, NLAYERS = 2, 8, 8, 32, 4, 64, 2

    key = jax.random.PRNGKey(0)
    kx, km, kp = jax.random.split(key, 3)
    x = jax.random.normal(kx, (B, T, D), jnp.float32)
    memory = jax.random.normal(km, (B, S, D), jnp.float32)
    target_mask = jnp.broadcast_to(
        jnp.tril(jnp.ones((T, T), jnp.float32))[None], (B, T, T))
    source_mask = jnp.ones((B, 1, S), jnp.float32)

    params = init_params(kp, D, DFF, NLAYERS, H)

    fwd = jax.jit(decoder_forward, static_argnums=(5,))
    out = fwd(params, x, memory, source_mask, target_mask, H)
    jax.block_until_ready(out)
    assert out.shape == (B, T, D)
    assert bool(jnp.all(jnp.isfinite(out)))
    print("KERNEL_OK")
</pallas_src>

<mosaic_0001>
module attributes {stable_mosaic.version = 11 : i64} {
  func.func @_decoder_stack_kernel(%arg0: i32, %arg1: i32, %arg2: memref<1x8x32xf32, #tpu.memory_space<vmem>>, %arg3: memref<1x8x32xf32, #tpu.memory_space<vmem>>, %arg4: memref<1x8x8xf32, #tpu.memory_space<vmem>>, %arg5: memref<1x1x8xf32, #tpu.memory_space<vmem>>, %arg6: memref<1x32x96xbf16, #tpu.memory_space<vmem>>, %arg7: memref<1x1x96xf32, #tpu.memory_space<vmem>>, %arg8: memref<1x32x32xbf16, #tpu.memory_space<vmem>>, %arg9: memref<1x1x32xf32, #tpu.memory_space<vmem>>, %arg10: memref<1x32x32xbf16, #tpu.memory_space<vmem>>, %arg11: memref<1x1x32xf32, #tpu.memory_space<vmem>>, %arg12: memref<1x32x64xbf16, #tpu.memory_space<vmem>>, %arg13: memref<1x1x64xf32, #tpu.memory_space<vmem>>, %arg14: memref<1x32x32xbf16, #tpu.memory_space<vmem>>, %arg15: memref<1x1x32xf32, #tpu.memory_space<vmem>>, %arg16: memref<1x32x64xbf16, #tpu.memory_space<vmem>>, %arg17: memref<1x1x64xf32, #tpu.memory_space<vmem>>, %arg18: memref<1x64x32xbf16, #tpu.memory_space<vmem>>, %arg19: memref<1x1x32xf32, #tpu.memory_space<vmem>>, %arg20: memref<1x8x32xf32, #tpu.memory_space<vmem>>) attributes {dimension_semantics = [#tpu.dimension_semantics<parallel>, #tpu.dimension_semantics<arbitrary>], iteration_bounds = array<i64: 2, 2>, scalar_prefetch = 0 : i64, scratch_operands = 0 : i64, tpu.core_type = #tpu.core_type<tc>, window_params = [{transform_indices = @transform_0, window_bounds = array<i64: 1, 8, 32>}, {transform_indices = @transform_1, window_bounds = array<i64: 1, 8, 32>}, {transform_indices = @transform_2, window_bounds = array<i64: 1, 8, 8>}, {transform_indices = @transform_3, window_bounds = array<i64: 1, 1, 8>}, {transform_indices = @transform_4, window_bounds = array<i64: 1, 32, 96>}, {transform_indices = @transform_5, window_bounds = array<i64: 1, 1, 96>}, {transform_indices = @transform_6, window_bounds = array<i64: 1, 32, 32>}, {transform_indices = @transform_7, window_bounds = array<i64: 1, 1, 32>}, {transform_indices = @transform_8, window_bounds = array<i64: 1, 32, 32>}, {transform_indices = @transform_9, window_bounds = array<i64: 1, 1, 32>}, {transform_indices = @transform_10, window_bounds = array<i64: 1, 32, 64>}, {transform_indices = @transform_11, window_bounds = array<i64: 1, 1, 64>}, {transform_indices = @transform_12, window_bounds = array<i64: 1, 32, 32>}, {transform_indices = @transform_13, window_bounds = array<i64: 1, 1, 32>}, {transform_indices = @transform_14, window_bounds = array<i64: 1, 32, 64>}, {transform_indices = @transform_15, window_bounds = array<i64: 1, 1, 64>}, {transform_indices = @transform_16, window_bounds = array<i64: 1, 64, 32>}, {transform_indices = @transform_17, window_bounds = array<i64: 1, 1, 32>}, {transform_indices = @transform_18, window_bounds = array<i64: 1, 8, 32>}]} {
    %c0_i32 = arith.constant 0 : i32
    %0 = arith.cmpi eq, %arg1, %c0_i32 : i32
    %1 = arith.extui %0 : i1 to i32
    %c0_i32_0 = arith.constant 0 : i32
    %2 = arith.cmpi ne, %1, %c0_i32_0 : i32
    scf.if %2 {
      %c0_127 = arith.constant 0 : index
      %c0_128 = arith.constant 0 : index
      %c0_129 = arith.constant 0 : index
      %325 = vector.load %arg2[%c0_127, %c0_128, %c0_129] : memref<1x8x32xf32, #tpu.memory_space<vmem>>, vector<1x8x32xf32>
      %326 = vector.shape_cast %325 : vector<1x8x32xf32> to vector<8x32xf32>
      %c0_130 = arith.constant 0 : index
      %c0_131 = arith.constant 0 : index
      %c0_132 = arith.constant 0 : index
      %327 = vector.load %arg20[%c0_130, %c0_131, %c0_132] : memref<1x8x32xf32, #tpu.memory_space<vmem>>, vector<1x8x32xf32>
      %328 = vector.shape_cast %327 : vector<1x8x32xf32> to vector<8x32xf32>
      %329 = vector.shape_cast %326 : vector<8x32xf32> to vector<1x8x32xf32>
      tpu.vector_store %arg20[%c0_130, %c0_131, %c0_132], %329 {strides = array<i32>} : memref<1x8x32xf32, #tpu.memory_space<vmem>>, vector<1x8x32xf32>,
    } else {
    }
    %c0 = arith.constant 0 : index
    %c0_1 = arith.constant 0 : index
    %c0_2 = arith.constant 0 : index
    %3 = vector.load %arg20[%c0, %c0_1, %c0_2] : memref<1x8x32xf32, #tpu.memory_space<vmem>>, vector<1x8x32xf32>
    %4 = vector.shape_cast %3 : vector<1x8x32xf32> to vector<8x32xf32>
    %c0_3 = arith.constant 0 : index
    %c0_4 = arith.constant 0 : index
    %c0_5 = arith.constant 0 : index
    %5 = vector.load %arg3[%c0_3, %c0_4, %c0_5] : memref<1x8x32xf32, #tpu.memory_space<vmem>>, vector<1x8x32xf32>
    %6 = vector.shape_cast %5 : vector<1x8x32xf32> to vector<8x32xf32>
    %c0_6 = arith.constant 0 : index
    %c0_7 = arith.constant 0 : index
    %c0_8 = arith.constant 0 : index
    %7 = vector.load %arg4[%c0_6, %c0_7, %c0_8] : memref<1x8x8xf32, #tpu.memory_space<vmem>>, vector<1x8x8xf32>
    %8 = vector.shape_cast %7 : vector<1x8x8xf32> to vector<8x8xf32>
    %c0_9 = arith.constant 0 : index
    %c0_10 = arith.constant 0 : index
    %c0_11 = arith.constant 0 : index
    %9 = vector.load %arg5[%c0_9, %c0_10, %c0_11] : memref<1x1x8xf32, #tpu.memory_space<vmem>>, vector<1x1x8xf32>
    %10 = vector.shape_cast %9 : vector<1x1x8xf32> to vector<1x8xf32>
    %cst = arith.constant dense<0.000000e+00> : vector<8xf32>
    %11 = vector.multi_reduction <add>, %4, %cst [1] : vector<8x32xf32> to vector<8xf32>
    %12 = vector.shape_cast %11 : vector<8xf32> to vector<8x1xf32>
    %cst_12 = arith.constant 3.200000e+01 : f32
    %13 = vector.broadcast %cst_12 : f32 to vector<8x1xf32>
    %14 = arith.divf %12, %13 : vector<8x1xf32>
    %15 = vector.broadcast %14 : vector<8x1xf32> to vector<8x32xf32>
    %16 = arith.subf %4, %15 : vector<8x32xf32>
    %17 = arith.mulf %16, %16 : vector<8x32xf32>
    %cst_13 = arith.constant dense<0.000000e+00> : vector<8xf32>
    %18 = vector.multi_reduction <add>, %17, %cst_13 [1] : vector<8x32xf32> to vector<8xf32>
    %19 = vector.shape_cast %18 : vector<8xf32> to vector<8x1xf32>
    %cst_14 = arith.constant 0.0322580636 : f32
    %20 = vector.broadcast %cst_14 : f32 to vector<8x1xf32>
    %21 = arith.mulf %19, %20 : vector<8x1xf32>
    %22 = math.sqrt %21 : vector<8x1xf32>
    %cst_15 = arith.constant 9.99999997E-7 : f32
    %23 = vector.broadcast %cst_15 : f32 to vector<8x1xf32>
    %24 = arith.addf %22, %23 : vector<8x1xf32>
    %25 = vector.broadcast %24 : vector<8x1xf32> to vector<8x32xf32>
    %26 = arith.divf %16, %25 : vector<8x32xf32>
    %27 = arith.truncf %26 : vector<8x32xf32> to vector<8x32xbf16>
    %c0_16 = arith.constant 0 : index
    %c0_17 = arith.constant 0 : index
    %c0_18 = arith.constant 0 : index
    %28 = vector.load %arg6[%c0_16, %c0_17, %c0_18] : memref<1x32x96xbf16, #tpu.memory_space<vmem>>, vector<1x32x96xbf16>
    %29 = vector.shape_cast %28 : vector<1x32x96xbf16> to vector<32x96xbf16>
    %cst_19 = arith.constant dense<0.000000e+00> : vector<8x96xf32>
    %30 = tpu.matmul %27, %29, %cst_19 {dimension_numbers = #tpu.dot_dimension_numbers<[1], [0], [0], [1], [0, 0, 1, 1], [], []>} : vector<8x32xbf16>, vector<32x96xbf16>, vector<8x96xf32> -> vector<8x96xf32>
    %c0_20 = arith.constant 0 : index
    %c0_21 = arith.constant 0 : index
    %c0_22 = arith.constant 0 : index
    %31 = vector.load %arg7[%c0_20, %c0_21, %c0_22] : memref<1x1x96xf32, #tpu.memory_space<vmem>>, vector<1x1x96xf32>
    %32 = vector.shape_cast %31 : vector<1x1x96xf32> to vector<1x96xf32>
    %33 = vector.broadcast %32 : vector<1x96xf32> to vector<8x96xf32>
    %34 = arith.addf %30, %33 : vector<8x96xf32>
    %35 = vector.extract_strided_slice %34 {offsets = [0, 0], sizes = [8, 32], strides = [1, 1]} : vector<8x96xf32> to vector<8x32xf32>
    %36 = vector.extract_strided_slice %34 {offsets = [0, 32], sizes = [8, 32], strides = [1, 1]} : vector<8x96xf32> to vector<8x32xf32>
    %37 = vector.extract_strided_slice %34 {offsets = [0, 64], sizes = [8, 32], strides = [1, 1]} : vector<8x96xf32> to vector<8x32xf32>
    %38 = vector.extract_strided_slice %35 {offsets = [0, 0], sizes = [8, 8], strides = [1, 1]} : vector<8x32xf32> to vector<8x8xf32>
    %39 = arith.truncf %38 : vector<8x8xf32> to vector<8x8xbf16>
    %40 = vector.extract_strided_slice %36 {offsets = [0, 0], sizes = [8, 8], strides = [1, 1]} : vector<8x32xf32> to vector<8x8xf32>
    %41 = arith.truncf %40 : vector<8x8xf32> to vector<8x8xbf16>
    %42 = vector.extract_strided_slice %37 {offsets = [0, 0], sizes = [8, 8], strides = [1, 1]} : vector<8x32xf32> to vector<8x8xf32>
    %43 = arith.truncf %42 : vector<8x8xf32> to vector<8x8xbf16>
    %cst_23 = arith.constant dense<0.000000e+00> : vector<8x8xf32>
    %44 = tpu.matmul %39, %41, %cst_23 {dimension_numbers = #tpu.dot_dimension_numbers<[1], [1], [0], [0], [0, 0, 1, 0], [], []>} : vector<8x8xbf16>, vector<8x8xbf16>, vector<8x8xf32> -> vector<8x8xf32>
    %cst_24 = arith.constant 0.000000e+00 : f32
    %45 = vector.broadcast %cst_24 : f32 to vector<8x8xf32>
    %46 = arith.cmpf one, %8, %45 : vector<8x8xf32>
    %cst_25 = arith.constant -1.000000e+09 : f32
    %47 = vector.broadcast %cst_25 : f32 to vector<8x8xf32>
    %48 = arith.select %46, %44, %47 : vector<8x8xi1>, vector<8x8xf32>
    %cst_26 = arith.constant dense<0xFF800000> : vector<8xf32>
    %49 = vector.multi_reduction <maximumf>, %48, %cst_26 [1] : vector<8x8xf32> to vector<8xf32>
    %50 = vector.shape_cast %49 : vector<8xf32> to vector<8x1xf32>
    %51 = vector.broadcast %50 : vector<8x1xf32> to vector<8x8xf32>
    %52 = arith.subf %48, %51 : vector<8x8xf32>
    %53 = math.exp %52 : vector<8x8xf32>
    %cst_27 = arith.constant dense<0.000000e+00> : vector<8xf32>
    %54 = vector.multi_reduction <add>, %53, %cst_27 [1] : vector<8x8xf32> to vector<8xf32>
    %55 = vector.shape_cast %54 : vector<8xf32> to vector<8x1xf32>
    %56 = tpu.reciprocal %55 {approx = true} : vector<8x1xf32> -> vector<8x1xf32>
    %57 = vector.broadcast %56 : vector<8x1xf32> to vector<8x8xf32>
    %58 = arith.mulf %53, %57 : vector<8x8xf32>
    %59 = arith.truncf %58 : vector<8x8xf32> to vector<8x8xbf16>
    %cst_28 = arith.constant dense<0.000000e+00> : vector<8x8xf32>
    %60 = tpu.matmul %59, %43, %cst_28 {dimension_numbers = #tpu.dot_dimension_numbers<[1], [0], [0], [1], [0, 0, 1, 1], [], []>} : vector<8x8xbf16>, vector<8x8xbf16>, vector<8x8xf32> -> vector<8x8xf32>
    %61 = vector.extract_strided_slice %35 {offsets = [0, 8], sizes = [8, 8], strides = [1, 1]} : vector<8x32xf32> to vector<8x8xf32>
    %62 = arith.truncf %61 : vector<8x8xf32> to vector<8x8xbf16>
    %63 = vector.extract_strided_slice %36 {offsets = [0, 8], sizes = [8, 8], strides = [1, 1]} : vector<8x32xf32> to vector<8x8xf32>
    %64 = arith.truncf %63 : vector<8x8xf32> to vector<8x8xbf16>
    %65 = vector.extract_strided_slice %37 {offsets = [0, 8], sizes = [8, 8], strides = [1, 1]} : vector<8x32xf32> to vector<8x8xf32>
    %66 = arith.truncf %65 : vector<8x8xf32> to vector<8x8xbf16>
    %cst_29 = arith.constant dense<0.000000e+00> : vector<8x8xf32>
    %67 = tpu.matmul %62, %64, %cst_29 {dimension_numbers = #tpu.dot_dimension_numbers<[1], [1], [0], [0], [0, 0, 1, 0], [], []>} : vector<8x8xbf16>, vector<8x8xbf16>, vector<8x8xf32> -> vector<8x8xf32>
    %cst_30 = arith.constant 0.000000e+00 : f32
    %68 = vector.broadcast %cst_30 : f32 to vector<8x8xf32>
    %69 = arith.cmpf one, %8, %68 : vector<8x8xf32>
    %cst_31 = arith.constant -1.000000e+09 : f32
    %70 = vector.broadcast %cst_31 : f32 to vector<8x8xf32>
    %71 = arith.select %69, %67, %70 : vector<8x8xi1>, vector<8x8xf32>
    %cst_32 = arith.constant dense<0xFF800000> : vector<8xf32>
    %72 = vector.multi_reduction <maximumf>, %71, %cst_32 [1] : vector<8x8xf32> to vector<8xf32>
    %73 = vector.shape_cast %72 : vector<8xf32> to vector<8x1xf32>
    %74 = vector.broadcast %73 : vector<8x1xf32> to vector<8x8xf32>
    %75 = arith.subf %71, %74 : vector<8x8xf32>
    %76 = math.exp %75 : vector<8x8xf32>
    %cst_33 = arith.constant dense<0.000000e+00> : vector<8xf32>
    %77 = vector.multi_reduction <add>, %76, %cst_33 [1] : vector<8x8xf32> to vector<8xf32>
    %78 = vector.shape_cast %77 : vector<8xf32> to vector<8x1xf32>
    %79 = tpu.reciprocal %78 {approx = true} : vector<8x1xf32> -> vector<8x1xf32>
    %80 = vector.broadcast %79 : vector<8x1xf32> to vector<8x8xf32>
    %81 = arith.mulf %76, %80 : vector<8x8xf32>
    %82 = arith.truncf %81 : vector<8x8xf32> to vector<8x8xbf16>
    %cst_34 = arith.constant dense<0.000000e+00> : vector<8x8xf32>
    %83 = tpu.matmul %82, %66, %cst_34 {dimension_numbers = #tpu.dot_dimension_numbers<[1], [0], [0], [1], [0, 0, 1, 1], [], []>} : vector<8x8xbf16>, vector<8x8xbf16>, vector<8x8xf32> -> vector<8x8xf32>
    %84 = vector.extract_strided_slice %35 {offsets = [0, 16], sizes = [8, 8], strides = [1, 1]} : vector<8x32xf32> to vector<8x8xf32>
    %85 = arith.truncf %84 : vector<8x8xf32> to vector<8x8xbf16>
    %86 = vector.extract_strided_slice %36 {offsets = [0, 16], sizes = [8, 8], strides = [1, 1]} : vector<8x32xf32> to vector<8x8xf32>
    %87 = arith.truncf %86 : vector<8x8xf32> to vector<8x8xbf16>
    %88 = vector.extract_strided_slice %37 {offsets = [0, 16], sizes = [8, 8], strides = [1, 1]} : vector<8x32xf32> to vector<8x8xf32>
    %89 = arith.truncf %88 : vector<8x8xf32> to vector<8x8xbf16>
    %cst_35 = arith.constant dense<0.000000e+00> : vector<8x8xf32>
    %90 = tpu.matmul %85, %87, %cst_35 {dimension_numbers = #tpu.dot_dimension_numbers<[1], [1], [0], [0], [0, 0, 1, 0], [], []>} : vector<8x8xbf16>, vector<8x8xbf16>, vector<8x8xf32> -> vector<8x8xf32>
    %cst_36 = arith.constant 0.000000e+00 : f32
    %91 = vector.broadcast %cst_36 : f32 to vector<8x8xf32>
    %92 = arith.cmpf one, %8, %91 : vector<8x8xf32>
    %cst_37 = arith.constant -1.000000e+09 : f32
    %93 = vector.broadcast %cst_37 : f32 to vector<8x8xf32>
    %94 = arith.select %92, %90, %93 : vector<8x8xi1>, vector<8x8xf32>
    %cst_38 = arith.constant dense<0xFF800000> : vector<8xf32>
    %95 = vector.multi_reduction <maximumf>, %94, %cst_38 [1] : vector<8x8xf32> to vector<8xf32>
    %96 = vector.shape_cast %95 : vector<8xf32> to vector<8x1xf32>
    %97 = vector.broadcast %96 : vector<8x1xf32> to vector<8x8xf32>
    %98 = arith.subf %94, %97 : vector<8x8xf32>
    %99 = math.exp %98 : vector<8x8xf32>
    %cst_39 = arith.constant dense<0.000000e+00> : vector<8xf32>
    %100 = vector.multi_reduction <add>, %99, %cst_39 [1] : vector<8x8xf32> to vector<8xf32>
    %101 = vector.shape_cast %100 : vector<8xf32> to vector<8x1xf32>
    %102 = tpu.reciprocal %101 {approx = true} : vector<8x1xf32> -> vector<8x1xf32>
    %103 = vector.broadcast %102 : vector<8x1xf32> to vector<8x8xf32>
    %104 = arith.mulf %99, %103 : vector<8x8xf32>
    %105 = arith.truncf %104 : vector<8x8xf32> to vector<8x8xbf16>
    %cst_40 = arith.constant dense<0.000000e+00> : vector<8x8xf32>
    %106 = tpu.matmul %105, %89, %cst_40 {dimension_numbers = #tpu.dot_dimension_numbers<[1], [0], [0], [1], [0, 0, 1, 1], [], []>} : vector<8x8xbf16>, vector<8x8xbf16>, vector<8x8xf32> -> vector<8x8xf32>
    %107 = vector.extract_strided_slice %35 {offsets = [0, 24], sizes = [8, 8], strides = [1, 1]} : vector<8x32xf32> to vector<8x8xf32>
    %108 = arith.truncf %107 : vector<8x8xf32> to vector<8x8xbf16>
    %109 = vector.extract_strided_slice %36 {offsets = [0, 24], sizes = [8, 8], strides = [1, 1]} : vector<8x32xf32> to vector<8x8xf32>
    %110 = arith.truncf %109 : vector<8x8xf32> to vector<8x8xbf16>
    %111 = vector.extract_strided_slice %37 {offsets = [0, 24], sizes = [8, 8], strides = [1, 1]} : vector<8x32xf32> to vector<8x8xf32>
    %112 = arith.truncf %111 : vector<8x8xf32> to vector<8x8xbf16>
    %cst_41 = arith.constant dense<0.000000e+00> : vector<8x8xf32>
    %113 = tpu.matmul %108, %110, %cst_41 {dimension_numbers = #tpu.dot_dimension_numbers<[1], [1], [0], [0], [0, 0, 1, 0], [], []>} : vector<8x8xbf16>, vector<8x8xbf16>, vector<8x8xf32> -> vector<8x8xf32>
    %cst_42 = arith.constant 0.000000e+00 : f32
    %114 = vector.broadcast %cst_42 : f32 to vector<8x8xf32>
    %115 = arith.cmpf one, %8, %114 : vector<8x8xf32>
    %cst_43 = arith.constant -1.000000e+09 : f32
    %116 = vector.broadcast %cst_43 : f32 to vector<8x8xf32>
    %117 = arith.select %115, %113, %116 : vector<8x8xi1>, vector<8x8xf32>
    %cst_44 = arith.constant dense<0xFF800000> : vector<8xf32>
    %118 = vector.multi_reduction <maximumf>, %117, %cst_44 [1] : vector<8x8xf32> to vector<8xf32>
    %119 = vector.shape_cast %118 : vector<8xf32> to vector<8x1xf32>
    %120 = vector.broadcast %119 : vector<8x1xf32> to vector<8x8xf32>
    %121 = arith.subf %117, %120 : vector<8x8xf32>
    %122 = math.exp %121 : vector<8x8xf32>
    %cst_45 = arith.constant dense<0.000000e+00> : vector<8xf32>
    %123 = vector.multi_reduction <add>, %122, %cst_45 [1] : vector<8x8xf32> to vector<8xf32>
    %124 = vector.shape_cast %123 : vector<8xf32> to vector<8x1xf32>
    %125 = tpu.reciprocal %124 {approx = true} : vector<8x1xf32> -> vector<8x1xf32>
    %126 = vector.broadcast %125 : vector<8x1xf32> to vector<8x8xf32>
    %127 = arith.mulf %122, %126 : vector<8x8xf32>
    %128 = arith.truncf %127 : vector<8x8xf32> to vector<8x8xbf16>
    %cst_46 = arith.constant dense<0.000000e+00> : vector<8x8xf32>
    %129 = tpu.matmul %128, %112, %cst_46 {dimension_numbers = #tpu.dot_dimension_numbers<[1], [0], [0], [1], [0, 0, 1, 1], [], []>} : vector<8x8xbf16>, vector<8x8xbf16>, vector<8x8xf32> -> vector<8x8xf32>
    %130 = tpu.concatenate %60, %83, %106, %129 in 1 : vector<8x8xf32>, vector<8x8xf32>, vector<8x8xf32>, vector<8x8xf32> -> vector<8x32xf32>
    %131 = arith.truncf %130 : vector<8x32xf32> to vector<8x32xbf16>
    %c0_47 = arith.constant 0 : index
    %c0_48 = arith.constant 0 : index
    %c0_49 = arith.constant 0 : index
    %132 = vector.load %arg8[%c0_47, %c0_48, %c0_49] : memref<1x32x32xbf16, #tpu.memory_space<vmem>>, vector<1x32x32xbf16>
    %133 = vector.shape_cast %132 : vector<1x32x32xbf16> to vector<32x32xbf16>
    %cst_50 = arith.constant dense<0.000000e+00> : vector<8x32xf32>
    %134 = tpu.matmul %131, %133, %cst_50 {dimension_numbers = #tpu.dot_dimension_numbers<[1], [0], [0], [1], [0, 0, 1, 1], [], []>} : vector<8x32xbf16>, vector<32x32xbf16>, vector<8x32xf32> -> vector<8x32xf32>
    %c0_51 = arith.constant 0 : index
    %c0_52 = arith.constant 0 : index
    %c0_53 = arith.constant 0 : index
    %135 = vector.load %arg9[%c0_51, %c0_52, %c0_53] : memref<1x1x32xf32, #tpu.memory_space<vmem>>, vector<1x1x32xf32>
    %136 = vector.shape_cast %135 : vector<1x1x32xf32> to vector<1x32xf32>
    %137 = vector.broadcast %136 : vector<1x32xf32> to vector<8x32xf32>
    %138 = arith.addf %134, %137 : vector<8x32xf32>
    %139 = arith.addf %4, %138 : vector<8x32xf32>
    %cst_54 = arith.constant dense<0.000000e+00> : vector<8xf32>
    %140 = vector.multi_reduction <add>, %139, %cst_54 [1] : vector<8x32xf32> to vector<8xf32>
    %141 = vector.shape_cast %140 : vector<8xf32> to vector<8x1xf32>
    %cst_55 = arith.constant 3.200000e+01 : f32
    %142 = vector.broadcast %cst_55 : f32 to vector<8x1xf32>
    %143 = arith.divf %141, %142 : vector<8x1xf32>
    %144 = vector.broadcast %143 : vector<8x1xf32> to vector<8x32xf32>
    %145 = arith.subf %139, %144 : vector<8x32xf32>
    %146 = arith.mulf %145, %145 : vector<8x32xf32>
    %cst_56 = arith.constant dense<0.000000e+00> : vector<8xf32>
    %147 = vector.multi_reduction <add>, %146, %cst_56 [1] : vector<8x32xf32> to vector<8xf32>
    %148 = vector.shape_cast %147 : vector<8xf32> to vector<8x1xf32>
    %cst_57 = arith.constant 0.0322580636 : f32
    %149 = vector.broadcast %cst_57 : f32 to vector<8x1xf32>
    %150 = arith.mulf %148, %149 : vector<8x1xf32>
    %151 = math.sqrt %150 : vector<8x1xf32>
    %cst_58 = arith.constant 9.99999997E-7 : f32
    %152 = vector.broadcast %cst_58 : f32 to vector<8x1xf32>
    %153 = arith.addf %151, %152 : vector<8x1xf32>
    %154 = vector.broadcast %153 : vector<8x1xf32> to vector<8x32xf32>
    %155 = arith.divf %145, %154 : vector<8x32xf32>
    %156 = arith.truncf %155 : vector<8x32xf32> to vector<8x32xbf16>
    %c0_59 = arith.constant 0 : index
    %c0_60 = arith.constant 0 : index
    %c0_61 = arith.constant 0 : index
    %157 = vector.load %arg10[%c0_59, %c0_60, %c0_61] : memref<1x32x32xbf16, #tpu.memory_space<vmem>>, vector<1x32x32xbf16>
    %158 = vector.shape_cast %157 : vector<1x32x32xbf16> to vector<32x32xbf16>
    %cst_62 = arith.constant dense<0.000000e+00> : vector<8x32xf32>
    %159 = tpu.matmul %156, %158, %cst_62 {dimension_numbers = #tpu.dot_dimension_numbers<[1], [0], [0], [1], [0, 0, 1, 1], [], []>} : vector<8x32xbf16>, vector<32x32xbf16>, vector<8x32xf32> -> vector<8x32xf32>
    %c0_63 = arith.constant 0 : index
    %c0_64 = arith.constant 0 : index
    %c0_65 = arith.constant 0 : index
    %160 = vector.load %arg11[%c0_63, %c0_64, %c0_65] : memref<1x1x32xf32, #tpu.memory_space<vmem>>, vector<1x1x32xf32>
    %161 = vector.shape_cast %160 : vector<1x1x32xf32> to vector<1x32xf32>
    %162 = vector.broadcast %161 : vector<1x32xf32> to vector<8x32xf32>
    %163 = arith.addf %159, %162 : vector<8x32xf32>
    %164 = arith.truncf %6 : vector<8x32xf32> to vector<8x32xbf16>
    %c0_66 = arith.constant 0 : index
    %c0_67 = arith.constant 0 : index
    %c0_68 = arith.constant 0 : index
    %165 = vector.load %arg12[%c0_66, %c0_67, %c0_68] : memref<1x32x64xbf16, #tpu.memory_space<vmem>>, vector<1x32x64xbf16>
    %166 = vector.shape_cast %165 : vector<1x32x64xbf16> to vector<32x64xbf16>
    %cst_69 = arith.constant dense<0.000000e+00> : vector<8x64xf32>
    %167 = tpu.matmul %164, %166, %cst_69 {dimension_numbers = #tpu.dot_dimension_numbers<[1], [0], [0], [1], [0, 0, 1, 1], [], []>} : vector<8x32xbf16>, vector<32x64xbf16>, vector<8x64xf32> -> vector<8x64xf32>
    %c0_70 = arith.constant 0 : index
    %c0_71 = arith.constant 0 : index
    %c0_72 = arith.constant 0 : index
    %168 = vector.load %arg13[%c0_70, %c0_71, %c0_72] : memref<1x1x64xf32, #tpu.memory_space<vmem>>, vector<1x1x64xf32>
    %169 = vector.shape_cast %168 : vector<1x1x64xf32> to vector<1x64xf32>
    %170 = vector.broadcast %169 : vector<1x64xf32> to vector<8x64xf32>
    %171 = arith.addf %167, %170 : vector<8x64xf32>
    %172 = vector.extract_strided_slice %171 {offsets = [0, 0], sizes = [8, 32], strides = [1, 1]} : vector<8x64xf32> to vector<8x32xf32>
    %173 = vector.extract_strided_slice %171 {offsets = [0, 32], sizes = [8, 32], strides = [1, 1]} : vector<8x64xf32> to vector<8x32xf32>
    %174 = vector.extract_strided_slice %163 {offsets = [0, 0], sizes = [8, 8], strides = [1, 1]} : vector<8x32xf32> to vector<8x8xf32>
    %175 = arith.truncf %174 : vector<8x8xf32> to vector<8x8xbf16>
    %176 = vector.extract_strided_slice %172 {offsets = [0, 0], sizes = [8, 8], strides = [1, 1]} : vector<8x32xf32> to vector<8x8xf32>
    %177 = arith.truncf %176 : vector<8x8xf32> to vector<8x8xbf16>
    %178 = vector.extract_strided_slice %173 {offsets = [0, 0], sizes = [8, 8], strides = [1, 1]} : vector<8x32xf32> to vector<8x8xf32>
    %179 = arith.truncf %178 : vector<8x8xf32> to vector<8x8xbf16>
    %cst_73 = arith.constant dense<0.000000e+00> : vector<8x8xf32>
    %180 = tpu.matmul %175, %177, %cst_73 {dimension_numbers = #tpu.dot_dimension_numbers<[1], [1], [0], [0], [0, 0, 1, 0], [], []>} : vector<8x8xbf16>, vector<8x8xbf16>, vector<8x8xf32> -> vector<8x8xf32>
    %cst_74 = arith.constant 0.000000e+00 : f32
    %181 = vector.broadcast %cst_74 : f32 to vector<1x8xf32>
    %182 = arith.cmpf one, %10, %181 : vector<1x8xf32>
    %cst_75 = arith.constant -1.000000e+09 : f32
    %183 = vector.shape_cast %182 : vector<1x8xi1> to vector<1x8xi1>
    %184 = vector.broadcast %183 : vector<1x8xi1> to vector<8x8xi1>
    %185 = vector.broadcast %cst_75 : f32 to vector<8x8xf32>
    %186 = arith.select %184, %180, %185 : vector<8x8xi1>, vector<8x8xf32>
    %cst_76 = arith.constant dense<0xFF800000> : vector<8xf32>
    %187 = vector.multi_reduction <maximumf>, %186, %cst_76 [1] : vector<8x8xf32> to vector<8xf32>
    %188 = vector.shape_cast %187 : vector<8xf32> to vector<8x1xf32>
    %189 = vector.broadcast %188 : vector<8x1xf32> to vector<8x8xf32>
    %190 = arith.subf %186, %189 : vector<8x8xf32>
    %191 = math.exp %190 : vector<8x8xf32>
    %cst_77 = arith.constant dense<0.000000e+00> : vector<8xf32>
    %192 = vector.multi_reduction <add>, %191, %cst_77 [1] : vector<8x8xf32> to vector<8xf32>
    %193 = vector.shape_cast %192 : vector<8xf32> to vector<8x1xf32>
    %194 = tpu.reciprocal %193 {approx = true} : vector<8x1xf32> -> vector<8x1xf32>
    %195 = vector.broadcast %194 : vector<8x1xf32> to vector<8x8xf32>
    %196 = arith.mulf %191, %195 : vector<8x8xf32>
    %197 = arith.truncf %196 : vector<8x8xf32> to vector<8x8xbf16>
    %cst_78 = arith.constant dense<0.000000e+00> : vector<8x8xf32>
    %198 = tpu.matmul %197, %179, %cst_78 {dimension_numbers = #tpu.dot_dimension_numbers<[1], [0], [0], [1], [0, 0, 1, 1], [], []>} : vector<8x8xbf16>, vector<8x8xbf16>, vector<8x8xf32> -> vector<8x8xf32>
    %199 = vector.extract_strided_slice %163 {offsets = [0, 8], sizes = [8, 8], strides = [1, 1]} : vector<8x32xf32> to vector<8x8xf32>
    %200 = arith.truncf %199 : vector<8x8xf32> to vector<8x8xbf16>
    %201 = vector.extract_strided_slice %172 {offsets = [0, 8], sizes = [8, 8], strides = [1, 1]} : vector<8x32xf32> to vector<8x8xf32>
    %202 = arith.truncf %201 : vector<8x8xf32> to vector<8x8xbf16>
    %203 = vector.extract_strided_slice %173 {offsets = [0, 8], sizes = [8, 8], strides = [1, 1]} : vector<8x32xf32> to vector<8x8xf32>
    %204 = arith.truncf %203 : vector<8x8xf32> to vector<8x8xbf16>
    %cst_79 = arith.constant dense<0.000000e+00> : vector<8x8xf32>
    %205 = tpu.matmul %200, %202, %cst_79 {dimension_numbers = #tpu.dot_dimension_numbers<[1], [1], [0], [0], [0, 0, 1, 0], [], []>} : vector<8x8xbf16>, vector<8x8xbf16>, vector<8x8xf32> -> vector<8x8xf32>
    %cst_80 = arith.constant 0.000000e+00 : f32
    %206 = vector.broadcast %cst_80 : f32 to vector<1x8xf32>
    %207 = arith.cmpf one, %10, %206 : vector<1x8xf32>
    %cst_81 = arith.constant -1.000000e+09 : f32
    %208 = vector.shape_cast %207 : vector<1x8xi1> to vector<1x8xi1>
    %209 = vector.broadcast %208 : vector<1x8xi1> to vector<8x8xi1>
    %210 = vector.broadcast %cst_81 : f32 to vector<8x8xf32>
    %211 = arith.select %209, %205, %210 : vector<8x8xi1>, vector<8x8xf32>
    %cst_82 = arith.constant dense<0xFF800000> : vector<8xf32>
    %212 = vector.multi_reduction <maximumf>, %211, %cst_82 [1] : vector<8x8xf32> to vector<8xf32>
    %213 = vector.shape_cast %212 : vector<8xf32> to vector<8x1xf32>
    %214 = vector.broadcast %213 : vector<8x1xf32> to vector<8x8xf32>
    %215 = arith.subf %211, %214 : vector<8x8xf32>
    %216 = math.exp %215 : vector<8x8xf32>
    %cst_83 = arith.constant dense<0.000000e+00> : vector<8xf32>
    %217 = vector.multi_reduction <add>, %216, %cst_83 [1] : vector<8x8xf32> to vector<8xf32>
    %218 = vector.shape_cast %217 : vector<8xf32> to vector<8x1xf32>
    %219 = tpu.reciprocal %218 {approx = true} : vector<8x1xf32> -> vector<8x1xf32>
    %220 = vector.broadcast %219 : vector<8x1xf32> to vector<8x8xf32>
    %221 = arith.mulf %216, %220 : vector<8x8xf32>
    %222 = arith.truncf %221 : vector<8x8xf32> to vector<8x8xbf16>
    %cst_84 = arith.constant dense<0.000000e+00> : vector<8x8xf32>
    %223 = tpu.matmul %222, %204, %cst_84 {dimension_numbers = #tpu.dot_dimension_numbers<[1], [0], [0], [1], [0, 0, 1, 1], [], []>} : vector<8x8xbf16>, vector<8x8xbf16>, vector<8x8xf32> -> vector<8x8xf32>
    %224 = vector.extract_strided_slice %163 {offsets = [0, 16], sizes = [8, 8], strides = [1, 1]} : vector<8x32xf32> to vector<8x8xf32>
    %225 = arith.truncf %224 : vector<8x8xf32> to vector<8x8xbf16>
    %226 = vector.extract_strided_slice %172 {offsets = [0, 16], sizes = [8, 8], strides = [1, 1]} : vector<8x32xf32> to vector<8x8xf32>
    %227 = arith.truncf %226 : vector<8x8xf32> to vector<8x8xbf16>
    %228 = vector.extract_strided_slice %173 {offsets = [0, 16], sizes = [8, 8], strides = [1, 1]} : vector<8x32xf32> to vector<8x8xf32>
    %229 = arith.truncf %228 : vector<8x8xf32> to vector<8x8xbf16>
    %cst_85 = arith.constant dense<0.000000e+00> : vector<8x8xf32>
    %230 = tpu.matmul %225, %227, %cst_85 {dimension_numbers = #tpu.dot_dimension_numbers<[1], [1], [0], [0], [0, 0, 1, 0], [], []>} : vector<8x8xbf16>, vector<8x8xbf16>, vector<8x8xf32> -> vector<8x8xf32>
    %cst_86 = arith.constant 0.000000e+00 : f32
    %231 = vector.broadcast %cst_86 : f32 to vector<1x8xf32>
    %232 = arith.cmpf one, %10, %231 : vector<1x8xf32>
    %cst_87 = arith.constant -1.000000e+09 : f32
    %233 = vector.shape_cast %232 : vector<1x8xi1> to vector<1x8xi1>
    %234 = vector.broadcast %233 : vector<1x8xi1> to vector<8x8xi1>
    %235 = vector.broadcast %cst_87 : f32 to vector<8x8xf32>
    %236 = arith.select %234, %230, %235 : vector<8x8xi1>, vector<8x8xf32>
    %cst_88 = arith.constant dense<0xFF800000> : vector<8xf32>
    %237 = vector.multi_reduction <maximumf>, %236, %cst_88 [1] : vector<8x8xf32> to vector<8xf32>
    %238 = vector.shape_cast %237 : vector<8xf32> to vector<8x1xf32>
    %239 = vector.broadcast %238 : vector<8x1xf32> to vector<8x8xf32>
    %240 = arith.subf %236, %239 : vector<8x8xf32>
    %241 = math.exp %240 : vector<8x8xf32>
    %cst_89 = arith.constant dense<0.000000e+00> : vector<8xf32>
    %242 = vector.multi_reduction <add>, %241, %cst_89 [1] : vector<8x8xf32> to vector<8xf32>
    %243 = vector.shape_cast %242 : vector<8xf32> to vector<8x1xf32>
    %244 = tpu.reciprocal %243 {approx = true} : vector<8x1xf32> -> vector<8x1xf32>
    %245 = vector.broadcast %244 : vector<8x1xf32> to vector<8x8xf32>
    %246 = arith.mulf %241, %245 : vector<8x8xf32>
    %247 = arith.truncf %246 : vector<8x8xf32> to vector<8x8xbf16>
    %cst_90 = arith.constant dense<0.000000e+00> : vector<8x8xf32>
    %248 = tpu.matmul %247, %229, %cst_90 {dimension_numbers = #tpu.dot_dimension_numbers<[1], [0], [0], [1], [0, 0, 1, 1], [], []>} : vector<8x8xbf16>, vector<8x8xbf16>, vector<8x8xf32> -> vector<8x8xf32>
    %249 = vector.extract_strided_slice %163 {offsets = [0, 24], sizes = [8, 8], strides = [1, 1]} : vector<8x32xf32> to vector<8x8xf32>
    %250 = arith.truncf %249 : vector<8x8xf32> to vector<8x8xbf16>
    %251 = vector.extract_strided_slice %172 {offsets = [0, 24], sizes = [8, 8], strides = [1, 1]} : vector<8x32xf32> to vector<8x8xf32>
    %252 = arith.truncf %251 : vector<8x8xf32> to vector<8x8xbf16>
    %253 = vector.extract_strided_slice %173 {offsets = [0, 24], sizes = [8, 8], strides = [1, 1]} : vector<8x32xf32> to vector<8x8xf32>
    %254 = arith.truncf %253 : vector<8x8xf32> to vector<8x8xbf16>
    %cst_91 = arith.constant dense<0.000000e+00> : vector<8x8xf32>
    %255 = tpu.matmul %250, %252, %cst_91 {dimension_numbers = #tpu.dot_dimension_numbers<[1], [1], [0], [0], [0, 0, 1, 0], [], []>} : vector<8x8xbf16>, vector<8x8xbf16>, vector<8x8xf32> -> vector<8x8xf32>
    %cst_92 = arith.constant 0.000000e+00 : f32
    %256 = vector.broadcast %cst_92 : f32 to vector<1x8xf32>
    %257 = arith.cmpf one, %10, %256 : vector<1x8xf32>
    %cst_93 = arith.constant -1.000000e+09 : f32
    %258 = vector.shape_cast %257 : vector<1x8xi1> to vector<1x8xi1>
    %259 = vector.broadcast %258 : vector<1x8xi1> to vector<8x8xi1>
    %260 = vector.broadcast %cst_93 : f32 to vector<8x8xf32>
    %261 = arith.select %259, %255, %260 : vector<8x8xi1>, vector<8x8xf32>
    %cst_94 = arith.constant dense<0xFF800000> : vector<8xf32>
    %262 = vector.multi_reduction <maximumf>, %261, %cst_94 [1] : vector<8x8xf32> to vector<8xf32>
    %263 = vector.shape_cast %262 : vector<8xf32> to vector<8x1xf32>
    %264 = vector.broadcast %263 : vector<8x1xf32> to vector<8x8xf32>
    %265 = arith.subf %261, %264 : vector<8x8xf32>
    %266 = math.exp %265 : vector<8x8xf32>
    %cst_95 = arith.constant dense<0.000000e+00> : vector<8xf32>
    %267 = vector.multi_reduction <add>, %266, %cst_95 [1] : vector<8x8xf32> to vector<8xf32>
    %268 = vector.shape_cast %267 : vector<8xf32> to vector<8x1xf32>
    %269 = tpu.reciprocal %268 {approx = true} : vector<8x1xf32> -> vector<8x1xf32>
    %270 = vector.broadcast %269 : vector<8x1xf32> to vector<8x8xf32>
    %271 = arith.mulf %266, %270 : vector<8x8xf32>
    %272 = arith.truncf %271 : vector<8x8xf32> to vector<8x8xbf16>
    %cst_96 = arith.constant dense<0.000000e+00> : vector<8x8xf32>
    %273 = tpu.matmul %272, %254, %cst_96 {dimension_numbers = #tpu.dot_dimension_numbers<[1], [0], [0], [1], [0, 0, 1, 1], [], []>} : vector<8x8xbf16>, vector<8x8xbf16>, vector<8x8xf32> -> vector<8x8xf32>
    %274 = tpu.concatenate %198, %223, %248, %273 in 1 : vector<8x8xf32>, vector<8x8xf32>, vector<8x8xf32>, vector<8x8xf32> -> vector<8x32xf32>
    %275 = arith.truncf %274 : vector<8x32xf32> to vector<8x32xbf16>
    %c0_97 = arith.constant 0 : index
    %c0_98 = arith.constant 0 : index
    %c0_99 = arith.constant 0 : index
    %276 = vector.load %arg14[%c0_97, %c0_98, %c0_99] : memref<1x32x32xbf16, #tpu.memory_space<vmem>>, vector<1x32x32xbf16>
    %277 = vector.shape_cast %276 : vector<1x32x32xbf16> to vector<32x32xbf16>
    %cst_100 = arith.constant dense<0.000000e+00> : vector<8x32xf32>
    %278 = tpu.matmul %275, %277, %cst_100 {dimension_numbers = #tpu.dot_dimension_numbers<[1], [0], [0], [1], [0, 0, 1, 1], [], []>} : vector<8x32xbf16>, vector<32x32xbf16>, vector<8x32xf32> -> vector<8x32xf32>
    %c0_101 = arith.constant 0 : index
    %c0_102 = arith.constant 0 : index
    %c0_103 = arith.constant 0 : index
    %279 = vector.load %arg15[%c0_101, %c0_102, %c0_103] : memref<1x1x32xf32, #tpu.memory_space<vmem>>, vector<1x1x32xf32>
    %280 = vector.shape_cast %279 : vector<1x1x32xf32> to vector<1x32xf32>
    %281 = vector.broadcast %280 : vector<1x32xf32> to vector<8x32xf32>
    %282 = arith.addf %278, %281 : vector<8x32xf32>
    %283 = arith.addf %139, %282 : vector<8x32xf32>
    %cst_104 = arith.constant dense<0.000000e+00> : vector<8xf32>
    %284 = vector.multi_reduction <add>, %283, %cst_104 [1] : vector<8x32xf32> to vector<8xf32>
    %285 = vector.shape_cast %284 : vector<8xf32> to vector<8x1xf32>
    %cst_105 = arith.constant 3.200000e+01 : f32
    %286 = vector.broadcast %cst_105 : f32 to vector<8x1xf32>
    %287 = arith.divf %285, %286 : vector<8x1xf32>
    %288 = vector.broadcast %287 : vector<8x1xf32> to vector<8x32xf32>
    %289 = arith.subf %283, %288 : vector<8x32xf32>
    %290 = arith.mulf %289, %289 : vector<8x32xf32>
    %cst_106 = arith.constant dense<0.000000e+00> : vector<8xf32>
    %291 = vector.multi_reduction <add>, %290, %cst_106 [1] : vector<8x32xf32> to vector<8xf32>
    %292 = vector.shape_cast %291 : vector<8xf32> to vector<8x1xf32>
    %cst_107 = arith.constant 0.0322580636 : f32
    %293 = vector.broadcast %cst_107 : f32 to vector<8x1xf32>
    %294 = arith.mulf %292, %293 : vector<8x1xf32>
    %295 = math.sqrt %294 : vector<8x1xf32>
    %cst_108 = arith.constant 9.99999997E-7 : f32
    %296 = vector.broadcast %cst_108 : f32 to vector<8x1xf32>
    %297 = arith.addf %295, %296 : vector<8x1xf32>
    %298 = vector.broadcast %297 : vector<8x1xf32> to vector<8x32xf32>
    %299 = arith.divf %289, %298 : vector<8x32xf32>
    %300 = arith.truncf %299 : vector<8x32xf32> to vector<8x32xbf16>
    %c0_109 = arith.constant 0 : index
    %c0_110 = arith.constant 0 : index
    %c0_111 = arith.constant 0 : index
    %301 = vector.load %arg16[%c0_109, %c0_110, %c0_111] : memref<1x32x64xbf16, #tpu.memory_space<vmem>>, vector<1x32x64xbf16>
    %302 = vector.shape_cast %301 : vector<1x32x64xbf16> to vector<32x64xbf16>
    %cst_112 = arith.constant dense<0.000000e+00> : vector<8x64xf32>
    %303 = tpu.matmul %300, %302, %cst_112 {dimension_numbers = #tpu.dot_dimension_numbers<[1], [0], [0], [1], [0, 0, 1, 1], [], []>} : vector<8x32xbf16>, vector<32x64xbf16>, vector<8x64xf32> -> vector<8x64xf32>
    %c0_113 = arith.constant 0 : index
    %c0_114 = arith.constant 0 : index
    %c0_115 = arith.constant 0 : index
    %304 = vector.load %arg17[%c0_113, %c0_114, %c0_115] : memref<1x1x64xf32, #tpu.memory_space<vmem>>, vector<1x1x64xf32>
    %305 = vector.shape_cast %304 : vector<1x1x64xf32> to vector<1x64xf32>
    %306 = vector.broadcast %305 : vector<1x64xf32> to vector<8x64xf32>
    %307 = arith.addf %303, %306 : vector<8x64xf32>
    %cst_116 = arith.constant 0.000000e+00 : f32
    %308 = vector.broadcast %cst_116 : f32 to vector<8x64xf32>
    %309 = arith.maximumf %307, %308 : vector<8x64xf32>
    %310 = arith.truncf %309 : vector<8x64xf32> to vector<8x64xbf16>
    %c0_117 = arith.constant 0 : index
    %c0_118 = arith.constant 0 : index
    %c0_119 = arith.constant 0 : index
    %311 = vector.load %arg18[%c0_117, %c0_118, %c0_119] : memref<1x64x32xbf16, #tpu.memory_space<vmem>>, vector<1x64x32xbf16>
    %312 = vector.shape_cast %311 : vector<1x64x32xbf16> to vector<64x32xbf16>
    %cst_120 = arith.constant dense<0.000000e+00> : vector<8x32xf32>
    %313 = tpu.matmul %310, %312, %cst_120 {dimension_numbers = #tpu.dot_dimension_numbers<[1], [0], [0], [1], [0, 0, 1, 1], [], []>} : vector<8x64xbf16>, vector<64x32xbf16>, vector<8x32xf32> -> vector<8x32xf32>
    %c0_121 = arith.constant 0 : index
    %c0_122 = arith.constant 0 : index
    %c0_123 = arith.constant 0 : index
    %314 = vector.load %arg19[%c0_121, %c0_122, %c0_123] : memref<1x1x32xf32, #tpu.memory_space<vmem>>, vector<1x1x32xf32>
    %315 = vector.shape_cast %314 : vector<1x1x32xf32> to vector<1x32xf32>
    %316 = vector.broadcast %315 : vector<1x32xf32> to vector<8x32xf32>
    %317 = arith.addf %313, %316 : vector<8x32xf32>
    %318 = arith.addf %283, %317 : vector<8x32xf32>
    %c1_i32 = arith.constant 1 : i32
    %319 = arith.cmpi slt, %arg1, %c1_i32 : i32
    %320 = arith.extui %319 : i1 to i32
    %c0_i32_124 = arith.constant 0 : i32
    %321 = arith.cmpi ne, %320, %c0_i32_124 : i32
    scf.if %321 {
      %c0_127 = arith.constant 0 : index
      %c0_128 = arith.constant 0 : index
      %c0_129 = arith.constant 0 : index
      %325 = vector.load %arg20[%c0_127, %c0_128, %c0_129] : memref<1x8x32xf32, #tpu.memory_space<vmem>>, vector<1x8x32xf32>
      %326 = vector.shape_cast %325 : vector<1x8x32xf32> to vector<8x32xf32>
      %327 = vector.shape_cast %318 : vector<8x32xf32> to vector<1x8x32xf32>
      tpu.vector_store %arg20[%c0_127, %c0_128, %c0_129], %327 {strides = array<i32>} : memref<1x8x32xf32, #tpu.memory_space<vmem>>, vector<1x8x32xf32>,
    } else {
    }
    %c1_i32_125 = arith.constant 1 : i32
    %322 = arith.cmpi eq, %arg1, %c1_i32_125 : i32
    %323 = arith.extui %322 : i1 to i32
    %c0_i32_126 = arith.constant 0 : i32
    %324 = arith.cmpi ne, %323, %c0_i32_126 : i32
    scf.if %324 {
      %cst_127 = arith.constant dense<0.000000e+00> : vector<8xf32>
      %325 = vector.multi_reduction <add>, %318, %cst_127 [1] : vector<8x32xf32> to vector<8xf32>
      %326 = vector.shape_cast %325 : vector<8xf32> to vector<8x1xf32>
      %cst_128 = arith.constant 3.200000e+01 : f32
      %327 = vector.broadcast %cst_128 : f32 to vector<8x1xf32>
      %328 = arith.divf %326, %327 : vector<8x1xf32>
      %329 = vector.broadcast %328 : vector<8x1xf32> to vector<8x32xf32>
      %330 = arith.subf %318, %329 : vector<8x32xf32>
      %331 = arith.mulf %330, %330 : vector<8x32xf32>
      %cst_129 = arith.constant dense<0.000000e+00> : vector<8xf32>
      %332 = vector.multi_reduction <add>, %331, %cst_129 [1] : vector<8x32xf32> to vector<8xf32>
      %333 = vector.shape_cast %332 : vector<8xf32> to vector<8x1xf32>
      %cst_130 = arith.constant 0.0322580636 : f32
      %334 = vector.broadcast %cst_130 : f32 to vector<8x1xf32>
      %335 = arith.mulf %333, %334 : vector<8x1xf32>
      %336 = math.sqrt %335 : vector<8x1xf32>
      %cst_131 = arith.constant 9.99999997E-7 : f32
      %337 = vector.broadcast %cst_131 : f32 to vector<8x1xf32>
      %338 = arith.addf %336, %337 : vector<8x1xf32>
      %339 = vector.broadcast %338 : vector<8x1xf32> to vector<8x32xf32>
      %340 = arith.divf %330, %339 : vector<8x32xf32>
      %c0_132 = arith.constant 0 : index
      %c0_133 = arith.constant 0 : index
      %c0_134 = arith.constant 0 : index
      %341 = vector.load %arg20[%c0_132, %c0_133, %c0_134] : memref<1x8x32xf32, #tpu.memory_space<vmem>>, vector<1x8x32xf32>
      %342 = vector.shape_cast %341 : vector<1x8x32xf32> to vector<8x32xf32>
      %343 = vector.shape_cast %340 : vector<8x32xf32> to vector<1x8x32xf32>
      tpu.vector_store %arg20[%c0_132, %c0_133, %c0_134], %343 {strides = array<i32>} : memref<1x8x32xf32, #tpu.memory_space<vmem>>, vector<1x8x32xf32>,
    } else {
    }
    return
  }
  func.func @transform_0(%arg0: i32, %arg1: i32) -> (i32, i32, i32) {
    %c0_i32 = arith.constant 0 : i32
    %c0_i32_0 = arith.constant 0 : i32
    %c0_i32_1 = arith.constant 0 : i32
    return %arg0, %c0_i32, %c0_i32_0 : i32, i32, i32
  }
  func.func @transform_1(%arg0: i32, %arg1: i32) -> (i32, i32, i32) {
    %c0_i32 = arith.constant 0 : i32
    %c0_i32_0 = arith.constant 0 : i32
    %c0_i32_1 = arith.constant 0 : i32
    return %arg0, %c0_i32, %c0_i32_0 : i32, i32, i32
  }
  func.func @transform_2(%arg0: i32, %arg1: i32) -> (i32, i32, i32) {
    %c0_i32 = arith.constant 0 : i32
    %c0_i32_0 = arith.constant 0 : i32
    %c0_i32_1 = arith.constant 0 : i32
    return %arg0, %c0_i32, %c0_i32_0 : i32, i32, i32
  }
  func.func @transform_3(%arg0: i32, %arg1: i32) -> (i32, i32, i32) {
    %c0_i32 = arith.constant 0 : i32
    %c0_i32_0 = arith.constant 0 : i32
    %c0_i32_1 = arith.constant 0 : i32
    return %arg0, %c0_i32, %c0_i32_0 : i32, i32, i32
  }
  func.func @transform_4(%arg0: i32, %arg1: i32) -> (i32, i32, i32) {
    %c0_i32 = arith.constant 0 : i32
    %c0_i32_0 = arith.constant 0 : i32
    %c0_i32_1 = arith.constant 0 : i32
    return %arg1, %c0_i32, %c0_i32_0 : i32, i32, i32
  }
  func.func @transform_5(%arg0: i32, %arg1: i32) -> (i32, i32, i32) {
    %c0_i32 = arith.constant 0 : i32
    %c0_i32_0 = arith.constant 0 : i32
    %c0_i32_1 = arith.constant 0 : i32
    return %arg1, %c0_i32, %c0_i32_0 : i32, i32, i32
  }
  func.func @transform_6(%arg0: i32, %arg1: i32) -> (i32, i32, i32) {
    %c0_i32 = arith.constant 0 : i32
    %c0_i32_0 = arith.constant 0 : i32
    %c0_i32_1 = arith.constant 0 : i32
    return %arg1, %c0_i32, %c0_i32_0 : i32, i32, i32
  }
  func.func @transform_7(%arg0: i32, %arg1: i32) -> (i32, i32, i32) {
    %c0_i32 = arith.constant 0 : i32
    %c0_i32_0 = arith.constant 0 : i32
    %c0_i32_1 = arith.constant 0 : i32
    return %arg1, %c0_i32, %c0_i32_0 : i32, i32, i32
  }
  func.func @transform_8(%arg0: i32, %arg1: i32) -> (i32, i32, i32) {
    %c0_i32 = arith.constant 0 : i32
    %c0_i32_0 = arith.constant 0 : i32
    %c0_i32_1 = arith.constant 0 : i32
    return %arg1, %c0_i32, %c0_i32_0 : i32, i32, i32
  }
  func.func @transform_9(%arg0: i32, %arg1: i32) -> (i32, i32, i32) {
    %c0_i32 = arith.constant 0 : i32
    %c0_i32_0 = arith.constant 0 : i32
    %c0_i32_1 = arith.constant 0 : i32
    return %arg1, %c0_i32, %c0_i32_0 : i32, i32, i32
  }
  func.func @transform_10(%arg0: i32, %arg1: i32) -> (i32, i32, i32) {
    %c0_i32 = arith.constant 0 : i32
    %c0_i32_0 = arith.constant 0 : i32
    %c0_i32_1 = arith.constant 0 : i32
    return %arg1, %c0_i32, %c0_i32_0 : i32, i32, i32
  }
  func.func @transform_11(%arg0: i32, %arg1: i32) -> (i32, i32, i32) {
    %c0_i32 = arith.constant 0 : i32
    %c0_i32_0 = arith.constant 0 : i32
    %c0_i32_1 = arith.constant 0 : i32
    return %arg1, %c0_i32, %c0_i32_0 : i32, i32, i32
  }
  func.func @transform_12(%arg0: i32, %arg1: i32) -> (i32, i32, i32) {
    %c0_i32 = arith.constant 0 : i32
    %c0_i32_0 = arith.constant 0 : i32
    %c0_i32_1 = arith.constant 0 : i32
    return %arg1, %c0_i32, %c0_i32_0 : i32, i32, i32
  }
  func.func @transform_13(%arg0: i32, %arg1: i32) -> (i32, i32, i32) {
    %c0_i32 = arith.constant 0 : i32
    %c0_i32_0 = arith.constant 0 : i32
    %c0_i32_1 = arith.constant 0 : i32
    return %arg1, %c0_i32, %c0_i32_0 : i32, i32, i32
  }
  func.func @transform_14(%arg0: i32, %arg1: i32) -> (i32, i32, i32) {
    %c0_i32 = arith.constant 0 : i32
    %c0_i32_0 = arith.constant 0 : i32
    %c0_i32_1 = arith.constant 0 : i32
    return %arg1, %c0_i32, %c0_i32_0 : i32, i32, i32
  }
  func.func @transform_15(%arg0: i32, %arg1: i32) -> (i32, i32, i32) {
    %c0_i32 = arith.constant 0 : i32
    %c0_i32_0 = arith.constant 0 : i32
    %c0_i32_1 = arith.constant 0 : i32
    return %arg1, %c0_i32, %c0_i32_0 : i32, i32, i32
  }
  func.func @transform_16(%arg0: i32, %arg1: i32) -> (i32, i32, i32) {
    %c0_i32 = arith.constant 0 : i32
    %c0_i32_0 = arith.constant 0 : i32
    %c0_i32_1 = arith.constant 0 : i32
    return %arg1, %c0_i32, %c0_i32_0 : i32, i32, i32
  }
  func.func @transform_17(%arg0: i32, %arg1: i32) -> (i32, i32, i32) {
    %c0_i32 = arith.constant 0 : i32
    %c0_i32_0 = arith.constant 0 : i32
    %c0_i32_1 = arith.constant 0 : i32
    return %arg1, %c0_i32, %c0_i32_0 : i32, i32, i32
  }
  func.func @transform_18(%arg0: i32, %arg1: i32) -> (i32, i32, i32) {
    %c0_i32 = arith.constant 0 : i32
    %c0_i32_0 = arith.constant 0 : i32
    %c0_i32_1 = arith.constant 0 : i32
    return %arg0, %c0_i32, %c0_i32_0 : i32, i32, i32
  }
}

</mosaic_0001>

<bundles_post_ra>
// kernel: decoder_forward.1
= control target key start
LH: loop header
LB: loop body
LE: loop exit
PB: predicated region body
PF: predicated region fallthrough
CT: control target
= control target key end

     0   :  { %s5639_s0 = inlined_call_operand.hbm [shape: f32[2,8,32], index: 0, kind: input, shape index: {}]   ;;  %s5640_s1 = inlined_call_operand.hbm [shape: f32[2,8,32], index: 1, kind: input, shape index: {}]   ;;  %s5641_s2 = inlined_call_operand.hbm [shape: f32[2,8,8], index: 2, kind: input, shape index: {}]   ;;  %s5642_s3 = inlined_call_operand.hbm [shape: f32[2,1,8], index: 3, kind: input, shape index: {}]   ;;  %s5643_s4 = inlined_call_operand.hbm [shape: bf16[2,32,96], index: 4, kind: input, shape index: {}]   ;;  %s5644_s5 = inlined_call_operand.hbm [shape: f32[2,1,96], index: 5, kind: input, shape index: {}]   ;;  %s5645_s6 = inlined_call_operand.hbm [shape: bf16[2,32,32], index: 6, kind: input, shape index: {}]   ;;  %s5646_s7 = inlined_call_operand.hbm [shape: f32[2,1,32], index: 7, kind: input, shape index: {}]   ;;  %s5647_s8 = inlined_call_operand.hbm [shape: bf16[2,32,32], index: 8, kind: input, shape index: {}]   ;;  %s5648_s9 = inlined_call_operand.hbm [shape: f32[2,1,32], index: 9, kind: input, shape index: {}]   ;;  %s5649_s10 = inlined_call_operand.hbm [shape: bf16[2,32,64], index: 10, kind: input, shape index: {}]   ;;  %s5650_s11 = inlined_call_operand.hbm [shape: f32[2,1,64], index: 11, kind: input, shape index: {}]   ;;  %s5651_s12 = inlined_call_operand.hbm [shape: bf16[2,32,32], index: 12, kind: input, shape index: {}]   ;;  %s5652_s13 = inlined_call_operand.hbm [shape: f32[2,1,32], index: 13, kind: input, shape index: {}]   ;;  %s5653_s14 = inlined_call_operand.hbm [shape: bf16[2,32,64], index: 14, kind: input, shape index: {}]   ;;  %s5654_s15 = inlined_call_operand.hbm [shape: f32[2,1,64], index: 15, kind: input, shape index: {}]   ;;  %s5655_s16 = inlined_call_operand.hbm [shape: bf16[2,64,32], index: 16, kind: input, shape index: {}]   ;;  %s5656_s17 = inlined_call_operand.hbm [shape: f32[2,1,32], index: 17, kind: input, shape index: {}]   ;;  %s5657_s18 = inlined_call_operand.hbm [shape: f32[2,8,32], index: 18, kind: output, shape index: {}]  }
   0x1   :  { %5694 = sst [smem:[#allocation59_spill]] %s5639_s0 }
   0x2   :  { %5695 = sst [smem:[#allocation60_spill]] %s5640_s1 }
   0x3   :  { %5696 = sst [smem:[#allocation61_spill]] %s5641_s2 }
   0x4   :  { %5697 = sst [smem:[#allocation62_spill]] %s5642_s3 }
   0x5   :  { %5698 = sst [smem:[#allocation63_spill]] %s5643_s4 }
   0x6   :  { %5699 = sst [smem:[#allocation64_spill]] %s5644_s5 }
   0x7   :  { %5700 = sst [smem:[#allocation65_spill]] %s5645_s6 }
   0x8   :  { %5701 = sst [smem:[#allocation66_spill]] %s5646_s7 }
   0x9   :  { %5702 = sst [smem:[#allocation67_spill]] %s5647_s8 }
   0xa   :  { %5703 = sst [smem:[#allocation68_spill]] %s5648_s9 }
   0xb   :  { %5704 = sst [smem:[#allocation69_spill]] %s5649_s10 }
   0xc   :  { %5705 = sst [smem:[#allocation70_spill]] %s5650_s11 }
   0xd   :  { %5706 = sst [smem:[#allocation71_spill]] %s5651_s12 }
   0xe   :  { %5707 = sst [smem:[#allocation72_spill]] %s5652_s13 }
   0xf   :  { %5708 = sst [smem:[#allocation73_spill]] %s5653_s14 }
  0x10   :  { %5709 = sst [smem:[#allocation74_spill]] %s5655_s16 }
  0x11   :  { %5710 = sst [smem:[#allocation75_spill]] %s5656_s17 }
  0x12   :  { %5711 = sst [smem:[#allocation76_spill]] %s5657_s18 }
  0x13   :  { %23 = vsyncpa [#allocation3], 0 }
  0x14   :  { %25 = vsyncpa [#allocation3 + $0x1], 0 }
  0x15   :  { %26 = vsyncpa [#allocation6], 0 }
  0x16   :  { %28 = vsyncpa [#allocation6 + $0x1], 0 }
  0x17   :  { %29 = vsyncpa [#allocation9], 0 }
  0x18   :  { %31 = vsyncpa [#allocation9 + $0x1], 0 }
  0x19   :  { %32 = vsyncpa [#allocation12], 0 }
  0x1a   :  { %34 = vsyncpa [#allocation12 + $0x1], 0 }
  0x1b   :  { %35 = vsyncpa [#allocation15], 0 }
  0x1c   :  { %37 = vsyncpa [#allocation15 + $0x1], 0 }
  0x1d   :  { %38 = vsyncpa [#allocation18], 0 }
  0x1e   :  { %40 = vsyncpa [#allocation18 + $0x1], 0 }
  0x1f   :  { %41 = vsyncpa [#allocation21], 0 }
  0x20   :  { %43 = vsyncpa [#allocation21 + $0x1], 0 }
  0x21   :  { %44 = vsyncpa [#allocation24], 0 }
  0x22   :  { %46 = vsyncpa [#allocation24 + $0x1], 0 }
  0x23   :  { %47 = vsyncpa [#allocation27], 0 }
  0x24   :  { %49 = vsyncpa [#allocation27 + $0x1], 0 }
  0x25   :  { %50 = vsyncpa [#allocation30], 0 }
  0x26   :  { %52 = vsyncpa [#allocation30 + $0x1], 0 }
  0x27   :  { %53 = vsyncpa [#allocation4], 0 }
  0x28   :  { %55 = vsyncpa [#allocation4 + $0x1], 0  ;;  %s4504_s27 = smov 0   ;;  %s4506_s28 = smov 0  }
  0x29   :  { %s4508_s29 = smov 0   ;;  %s4510_s30 = smov 0  }
  0x2a   :  { %s4512_s0 = smov 0   ;;  %s4514_s19 = smov 0  }
  0x2b   :  { %s4516_s1 = smov 0   ;;  %s4518_s20 = smov 0  }
  0x2c   :  { %s4520_s21 = smov 0   ;;  %s4522_s22 = smov 0  }
  0x2d   :  { %s4524_s2 = smov 0  }
  0x2e LB: > { %5712 = sst [smem:[#allocation44_spill]] %s4333_s28  ;;  %s4560_s23 = sadd.s32 4294967295, %s4369_s2   ;;  %s4369_s2 = sphi %s4524_s2, %s61_s2   ;;  %s4365_s22 = sphi %s4522_s22, %s5813_s22   ;;  %s4361_s21 = sphi %s4520_s21, %s5812_s21   ;;  %s4357_s20 = sphi %s4518_s20, %s5811_s20   ;;  %s4353_s1 = sphi %s4516_s1, %s5810_s1   ;;  %s4349_s19 = sphi %s4514_s19, %s5805_s19   ;;  %s4345_s0 = sphi %s4512_s0, %s5804_s0   ;;  %s4341_s30 = sphi %s4510_s30, %s5803_s30   ;;  %s4337_s29 = sphi %s4508_s29, %s5809_s29   ;;  %s4333_s28 = sphi %s4506_s28, %s5808_s28   ;;  %s4329_s27 = sphi %s4504_s27, %s5801_s27  }
  0x2f   : > { %5713 = sst [smem:[#allocation45_spill]] %s4341_s30  ;;  %s3168_s24 = sadd.s32 4294967294, %s4369_s2  }
  0x30   : > { %5714 = sst [smem:[#allocation46_spill]] %s4345_s0  ;;  %s70_s25 = sadd.s32 1, %s4361_s21 }
  0x31   : > { %5715 = sst [smem:[#allocation47_spill]] %s4349_s19  ;;  %s73_s26 = sadd.s32 1, %s4365_s22 }
  0x32   : > { %5716 = sst [smem:[#allocation48_spill]] %s4353_s1  ;;  %p71_p0 = scmp.ge.s32.totalorder %s70_s25, 2 }
  0x33   : > { %5717 = sst [smem:[#allocation49_spill]] %s4357_s20  ;;  %s80_s18 = sadd.s32 1, %s4349_s19 }
  0x34   : > { %5718 = sst [smem:[#allocation50_spill]] %s4560_s23  ;;  %p87_p1 = scmp.ne.s32.totalorder %s4349_s19, %s4345_s0 }
  0x35   : > { %p88_p2 = scmp.eq.s32.totalorder %s4369_s2, 0  ;;  %s5815_s25 = smov (%p71_p0, %s70_s25), 0 }
  0x36   : > { %5719 = sst [smem:[#allocation51_spill]] %s5815_s25  ;;  %s5817_s26 = smov (!%p71_p0, %s73_s26), %s4365_s22 }
  0x37   : > { %p4577_p3 = por %p88_p2, %p87_p1  ;;  %p5669_p4 = scmp.ne.s32.totalorder %s4345_s0, %s4341_s30 }
  0x38   : > { %p75_p5 = scmp.ge.s32.totalorder %s5817_s26, 2  ;;  %p94_p6 = scmp.eq.s32.totalorder %s4560_s23, 0 }
  0x39   : > { %s5720_s20 = scalar_select %p4577_p3, 1, 0 }
  0x3a   : > { %s181_s1 = ssub.s32 %s4361_s21, %s5815_s25  ;;  %s184_s17 = sadd.s32 1, %s4337_s29 }
  0x3b   : > { %s5819_s26 = smov (%p75_p5, %s5817_s26), 0  ;;  %p4594_p7 = por %p94_p6, %p5669_p4 }
  0x3c   : > { %5721 = sst [smem:[#allocation52_spill]] %s5819_s26  ;;  %p182_p8 = scmp.eq.s32.totalorder %s181_s1, 0 }
  0x3d   : > { %s5722_s16 = scalar_select %p4594_p7, 1, 0 }
  0x3e   : > { %s77_s14 = ssub.s32 %s4365_s22, %s5819_s26  ;;  %p191_p9 = scmp.ne.s32.totalorder %s4337_s29, %s4333_s28 }
  0x3f   : > { %5723 = sst [smem:[#allocation53_spill]] %s5722_s16  ;;  %p78_p10 = scmp.eq.s32.totalorder %s77_s14, 0 }
  0x40   : > { %p197_p11 = scmp.ne.s32.totalorder %s4333_s28, %s4329_s27  ;;  %p4612_p12 = por %p191_p9, %p88_p2 }
  0x41   : > { %s4605_s12 = scalar_select %p182_p8, %s4337_s29, %s184_s17  }
  0x42   : > { %s4608_s25 = scalar_select %p78_p10, %s4349_s19, %s80_s18  }
  0x43   : > { %5724 = sst [smem:[#allocation54_spill]] %s4605_s12  ;;  %p4618_p13 = por %p197_p11, %p94_p6 }
  0x44   : > { %5725 = sst [smem:[#allocation55_spill]] %s4608_s25  ;;  %p559_p0 = scmp.eq.s32.totalorder %s4560_s23, 3 }
  0x45   : > { %s5726_s10 = scalar_select %p4612_p12, 1, 0 }
  0x46   : > { %s5727_s8 = scalar_select %p4618_p13, 1, 0 }
  0x47   : > { %p565_p5 = scmp.eq.s32.totalorder %s3168_s24, 3  ;;  %p4626_p4 = por %p559_p0, %p87_p1 }
  0x48   : > { %5728 = sst [smem:[#allocation56_spill]] %s5727_s8  ;;  %p5731_p8 = scmp.ne.s32.totalorder %s4345_s0, %s4341_s30 }
  0x49   : > { %s5729_s14 = scalar_select %p4626_p4, 1, 0 }
  0x4a   : > { %p4633_p10 = por %p565_p5, %p5731_p8  ;;  %p3170_p2 = scmp.ge.s32.totalorder %s4369_s2, 4 }
  0x4b   : > { %5730 = sst [smem:[#allocation57_spill]] %s5729_s14  ;;  %s4639_s18 = sand.u32 (!%p3170_p2), 1, %s4349_s19  }
  0x4c   : > { %s5732_s17 = scalar_select %p4633_p10, 1, 0 }
  0x4d   : > { %581 = sbr.rel (%p3170_p2) target bundleno = 559 (0x22f), region = 16  ;;  %s4642_s27 = sshll.u32 (!%p3170_p2), %s4365_s22, 7 }
  0x4e   : > { %5733 = sst [smem:[#allocation58_spill]] %s5732_s17  ;;  %s4645_s1 = sshll.u32 (!%p3170_p2), %s4639_s18, 3 }
  0x4f   : > { %s4648_s24 = sand.u32 (!%p3170_p2), 1, %s4369_s2   ;;  %s5734_s12 = sld [smem:[#allocation60_spill]] (!%p3170_p2) }
  0x50   : > { %s607_s19 = scalar_lea.vmem (!%p3170_p2), [#allocation5], %s4645_s1 }
  0x51   : > { %s614_s30 = sshll.u32 (!%p3170_p2), %s607_s19, 4  ;;  %s615_s30 = int_to_ptr.vmem [resolvable:$true] %s614_s30 }
  0x55   : > { %s4654_s17 = scalar_lea.hbm %s5734_s12, %s4642_s27  ;;  %s3707_s25 = scalar_lea.hbm %s5734_s12, 256 }
  0x56   : > { %s3703_s8 = scalar_lea.hbm %s4654_s17, 128  ;;  %p3708_p11 = scmp.lt.u32.totalorder %s4654_s17, %s5734_s12 }
  0x57   : > { %p3704_p1 = scmp.ne.s32.totalorder %s4654_s17, %s3703_s8  ;;  %p3709_p0 = scmp.lt.u32.totalorder %s3707_s25, %s3703_s8 }
  0x58   : > { %p3711_p8 = scmp.lt.u32.totalorder %s3703_s8, %s4654_s17 }
  0x59   : > { %p3705_p6 = pnand %p3704_p1, %p4577_p3  ;;  %p3710_p5 = por %p3709_p0, %p3708_p11 }
  0x5b   : > { %p3706_p9 = pneg %p3705_p6  ;;  %p3712_p2 = por %p3711_p8, %p3710_p5 }
  0x5d   : > { %p3713_p10 = pnand %p3712_p2, %p3706_p9 }
  0x5f   : > { %3716 = shalt.err (!%p3713_p10)
}
  0x60   : > { %s3717_s19 = scalar_lea.vmem %s615_s30, 128  ;;  %s4371_s14 = smov [#allocation5]  }
  0x61   : > { %p3718_p4 = scmp.ne.s32.totalorder %s615_s30, %s3717_s19  ;;  %s3721_s0 = sshll.u32 %s4371_s14, 4  ;;  %s3722_s0 = int_to_ptr.vmem [resolvable:$false] %s3721_s0 }
  0x62   : > { %s3723_s28 = scalar_lea.vmem %s3722_s0, 256  ;;  %p3724_p13 = scmp.lt.s32.totalorder %s615_s30, %s3722_s0 }
  0x63   : > { %p3719_p1 = pnand %p3718_p4, %p4577_p3  ;;  %p3725_p7 = scmp.lt.s32.totalorder %s3723_s28, %s3717_s19 }
  0x65   : > { %p3720_p6 = pneg %p3719_p1  ;;  %p3726_p12 = por %p3725_p7, %p3724_p13 }
  0x67   : > { %p3727_p0 = pnand %p3726_p12, %p3720_p6 }
  0x69   : > { %3730 = shalt.err (!%p3727_p0)
}
  0x6a   : > { %s5735_s8 = scalar_lea.sflag [#allocation6], %s4648_s24  ;;  %s3177_s16 = sshll.u32 %s4365_s22, 4 }
  0x6b   : > { %3490 = dma.hbm_to_vmem [thread:$0]  (%p4577_p3), %s4654_s17, 128, %s615_s30, %s5735_s8  }
  0x6c   : > { %s5736_s3 = sld [smem:[#allocation62_spill]]  ;;  %s642_s25 = scalar_lea.vmem [#allocation8], %s4639_s18 }
  0x6d   : > { %s649_s26 = sshll.u32 %s642_s25, 4  ;;  %s4687_s19 = sand.u32 1, %s4337_s29   ;;  %s4684_s26 = int_to_ptr.vmem [resolvable:$true] %s649_s26 }
  0x6e   : > { %s5688_s28 = scalar_lea.sflag [#allocation9], %s4648_s24 }
  0x72   : > { %s4681_s0 = scalar_lea.hbm %s5736_s3, %s3177_s16  ;;  %s3735_s8 = scalar_lea.hbm %s5736_s3, 32 }
  0x73   : > { %s3731_s12 = scalar_lea.hbm %s4681_s0, 16  ;;  %p3736_p13 = scmp.lt.u32.totalorder %s4681_s0, %s5736_s3 }
  0x74   : > { %p3732_p4 = scmp.ne.s32.totalorder %s4681_s0, %s3731_s12  ;;  %p3737_p10 = scmp.lt.u32.totalorder %s3735_s8, %s3731_s12 }
  0x75   : > { %p3739_p11 = scmp.lt.u32.totalorder %s3731_s12, %s4681_s0 }
  0x76   : > { %p3733_p7 = pnand %p3732_p4, %p4577_p3  ;;  %p3738_p9 = por %p3737_p10, %p3736_p13 }
  0x78   : > { %p3734_p12 = pneg %p3733_p7  ;;  %p3740_p5 = por %p3739_p11, %p3738_p9 }
  0x7a   : > { %p3741_p8 = pnand %p3740_p5, %p3734_p12 }
  0x7c   : > { %3744 = shalt.err (!%p3741_p8)
}
  0x7d   : > { %s3745_s14 = scalar_lea.vmem %s4684_s26, 16  ;;  %s4372_s25 = smov [#allocation8]  }
  0x7e   : > { %p3746_p2 = scmp.ne.s32.totalorder %s4684_s26, %s3745_s14  ;;  %s3749_s30 = sshll.u32 %s4372_s25, 4  ;;  %s3750_s30 = int_to_ptr.vmem [resolvable:$false] %s3749_s30 }
  0x7f   : > { %s3751_s17 = scalar_lea.vmem %s3750_s30, 32  ;;  %p3752_p0 = scmp.lt.s32.totalorder %s4684_s26, %s3750_s30 }
  0x80   : > { %p3747_p1 = pnand %p3746_p2, %p4577_p3  ;;  %p3753_p4 = scmp.lt.s32.totalorder %s3751_s17, %s3745_s14 }
  0x82   : > { %p3748_p6 = pneg %p3747_p1  ;;  %p3754_p7 = por %p3753_p4, %p3752_p0 }
  0x84   : > { %p3755_p13 = pnand %p3754_p7, %p3748_p6 }
  0x86   : > { %3758 = shalt.err (!%p3755_p13)
}
  0x87   : > { %3492 = dma.hbm_to_vmem [thread:$0]  (%p4577_p3), %s4681_s0, 16, %s4684_s26, %s5688_s28  }
  0x88   : > { %s4714_s12 = sshll.u32 %s4361_s21, 4  ;;  %s680_s8 = scalar_lea.vmem [#allocation11], %s4687_s19 }
  0x89   : > { %s687_s16 = sshll.u32 %s680_s8, 4  ;;  %s5737_s5 = sld [smem:[#allocation64_spill]]  ;;  %s688_s16 = int_to_ptr.vmem [resolvable:$true] %s687_s16 }
  0x8a   : > { %p5738_p10 = scmp.ne.s32.totalorder %s5726_s10, 0 }
  0x8f   : > { %s4721_s25 = scalar_lea.hbm %s5737_s5, %s4714_s12  ;;  %s3763_s8 = scalar_lea.hbm %s5737_s5, 32 }
  0x90   : > { %s3759_s17 = scalar_lea.hbm %s4721_s25, 16  ;;  %p3764_p5 = scmp.lt.u32.totalorder %s4721_s25, %s5737_s5 }
  0x91   : > { %p3760_p12 = scmp.ne.s32.totalorder %s4721_s25, %s3759_s17  ;;  %p3765_p8 = scmp.lt.u32.totalorder %s3763_s8, %s3759_s17 }
  0x92   : > { %p3767_p1 = scmp.lt.u32.totalorder %s3759_s17, %s4721_s25 }
  0x93   : > { %p3761_p9 = pnand %p3760_p12, %p5738_p10  ;;  %p3766_p2 = por %p3765_p8, %p3764_p5 }
  0x95   : > { %p3762_p11 = pneg %p3761_p9  ;;  %p3768_p6 = por %p3767_p1, %p3766_p2 }
  0x97   : > { %p3769_p0 = pnand %p3768_p6, %p3762_p11 }
  0x99   : > { %3772 = shalt.err (!%p3769_p0)
}
  0x9a   : > { %s3773_s23 = scalar_lea.vmem %s688_s16, 16  ;;  %s4373_s14 = smov [#allocation11]  }
  0x9b   : > { %p3774_p4 = scmp.ne.s32.totalorder %s688_s16, %s3773_s23  ;;  %s3777_s30 = sshll.u32 %s4373_s14, 4  ;;  %s3778_s30 = int_to_ptr.vmem [resolvable:$false] %s3777_s30 }
  0x9c   : > { %s3779_s0 = scalar_lea.vmem %s3778_s30, 32  ;;  %p3780_p12 = scmp.lt.s32.totalorder %s688_s16, %s3778_s30 }
  0x9d   : > { %p3775_p7 = pnand %p3774_p4, %p5738_p10  ;;  %p3781_p9 = scmp.lt.s32.totalorder %s3779_s0, %s3773_s23 }
  0x9f   : > { %p3776_p13 = pneg %p3775_p7  ;;  %p3782_p3 = por %p3781_p9, %p3780_p12 }
  0xa1   : > { %p3783_p5 = pnand %p3782_p3, %p3776_p13 }
  0xa3   : > { %3786 = shalt.err (!%p3783_p5)
}
  0xa4   : > { %s5739_s3 = scalar_lea.sflag [#allocation12], %s4648_s24  ;;  %s5740_s7 = sld [smem:[#allocation66_spill]] }
  0xa5   : > { %3494 = dma.hbm_to_vmem [thread:$0]  (%p5738_p10), %s4721_s25, 16, %s688_s16, %s5739_s3  }
  0xa6   : > { %s718_s30 = scalar_lea.vmem [#allocation14], %s4687_s19 }
  0xa7   : > { %s725_s8 = sshll.u32 %s718_s30, 4  ;;  %s726_s8 = int_to_ptr.vmem [resolvable:$true] %s725_s8 }
  0xaa   : > { %s4747_s26 = scalar_lea.hbm %s5740_s7, %s4714_s12  ;;  %s3791_s25 = scalar_lea.hbm %s5740_s7, 32 }
  0xab   : > { %s3787_s14 = scalar_lea.hbm %s4747_s26, 16  ;;  %p3792_p2 = scmp.lt.u32.totalorder %s4747_s26, %s5740_s7 }
  0xac   : > { %p3788_p3 = scmp.ne.s32.totalorder %s4747_s26, %s3787_s14  ;;  %p3793_p1 = scmp.lt.u32.totalorder %s3791_s25, %s3787_s14 }
  0xad   : > { %p3795_p0 = scmp.lt.u32.totalorder %s3787_s14, %s4747_s26 }
  0xae   : > { %p3789_p11 = pnand %p3788_p3, %p5738_p10  ;;  %p3794_p6 = por %p3793_p1, %p3792_p2 }
  0xb0   : > { %p3790_p8 = pneg %p3789_p11  ;;  %p3796_p4 = por %p3795_p0, %p3794_p6 }
  0xb2   : > { %p3797_p7 = pnand %p3796_p4, %p3790_p8 }
  0xb4   : > { %3800 = shalt.err (!%p3797_p7)
}
  0xb5   : > { %s3801_s17 = scalar_lea.vmem %s726_s8, 16  ;;  %s4374_s30 = smov [#allocation14]  }
  0xb6   : > { %p3802_p13 = scmp.ne.s32.totalorder %s726_s8, %s3801_s17  ;;  %s3805_s23 = sshll.u32 %s4374_s30, 4  ;;  %s3806_s23 = int_to_ptr.vmem [resolvable:$false] %s3805_s23 }
  0xb7   : > { %s3807_s0 = scalar_lea.vmem %s3806_s23, 32  ;;  %p3808_p5 = scmp.lt.s32.totalorder %s726_s8, %s3806_s23 }
  0xb8   : > { %p3803_p12 = pnand %p3802_p13, %p5738_p10  ;;  %p3809_p3 = scmp.lt.s32.totalorder %s3807_s0, %s3801_s17 }
  0xba   : > { %p3804_p9 = pneg %p3803_p12  ;;  %p3810_p11 = por %p3809_p3, %p3808_p5 }
  0xbc   : > { %p3811_p1 = pnand %p3810_p11, %p3804_p9 }
  0xbe   : > { %3814 = shalt.err (!%p3811_p1)
}
  0xbf   : > { %s5741_s14 = scalar_lea.sflag [#allocation15], %s4648_s24  ;;  %s5742_s9 = sld [smem:[#allocation68_spill]] }
  0xc0   : > { %3496 = dma.hbm_to_vmem [thread:$0]  (%p5738_p10), %s4747_s26, 16, %s726_s8, %s5741_s14  }
  0xc1   : > { %s756_s23 = scalar_lea.vmem [#allocation17], %s4687_s19 }
  0xc2   : > { %s763_s28 = sshll.u32 %s756_s23, 4  ;;  %s764_s28 = int_to_ptr.vmem [resolvable:$true] %s763_s28 }
  0xc5   : > { %s4774_s3 = scalar_lea.hbm %s5742_s9, %s4714_s12  ;;  %s3819_s8 = scalar_lea.hbm %s5742_s9, 32 }
  0xc6   : > { %s3815_s30 = scalar_lea.hbm %s4774_s3, 16  ;;  %p3820_p0 = scmp.lt.u32.totalorder %s4774_s3, %s5742_s9 }
  0xc7   : > { %p3816_p8 = scmp.ne.s32.totalorder %s4774_s3, %s3815_s30  ;;  %p3821_p4 = scmp.lt.u32.totalorder %s3819_s8, %s3815_s30 }
  0xc8   : > { %p3823_p13 = scmp.lt.u32.totalorder %s3815_s30, %s4774_s3 }
  0xc9   : > { %p3817_p2 = pnand %p3816_p8, %p5738_p10  ;;  %p3822_p7 = por %p3821_p4, %p3820_p0 }
  0xcb   : > { %p3818_p6 = pneg %p3817_p2  ;;  %p3824_p12 = por %p3823_p13, %p3822_p7 }
  0xcd   : > { %p3825_p9 = pnand %p3824_p12, %p3818_p6 }
  0xcf   : > { %3828 = shalt.err (!%p3825_p9)
}
  0xd0   : > { %s3829_s25 = scalar_lea.vmem %s764_s28, 16  ;;  %s4375_s23 = smov [#allocation17]  }
  0xd1   : > { %p3830_p5 = scmp.ne.s32.totalorder %s764_s28, %s3829_s25  ;;  %s3833_s17 = sshll.u32 %s4375_s23, 4  ;;  %s3834_s17 = int_to_ptr.vmem [resolvable:$false] %s3833_s17 }
  0xd2   : > { %s3835_s0 = scalar_lea.vmem %s3834_s17, 32  ;;  %p3836_p1 = scmp.lt.s32.totalorder %s764_s28, %s3834_s17 }
  0xd3   : > { %p3831_p3 = pnand %p3830_p5, %p5738_p10  ;;  %p3837_p8 = scmp.lt.s32.totalorder %s3835_s0, %s3829_s25 }
  0xd5   : > { %p3832_p11 = pneg %p3831_p3  ;;  %p3838_p2 = por %p3837_p8, %p3836_p1 }
  0xd7   : > { %p3839_p0 = pnand %p3838_p2, %p3832_p11 }
  0xd9   : > { %3842 = shalt.err (!%p3839_p0)
}
  0xda   : > { %s5743_s30 = scalar_lea.sflag [#allocation18], %s4648_s24  ;;  %s5744_s11 = sld [smem:[#allocation70_spill]] }
  0xdb   : > { %3498 = dma.hbm_to_vmem [thread:$0]  (%p5738_p10), %s4774_s3, 16, %s764_s28, %s5743_s30  }
  0xdc   : > { %s794_s17 = scalar_lea.vmem [#allocation20], %s4687_s19 }
  0xdd   : > { %s801_s16 = sshll.u32 %s794_s17, 4  ;;  %s802_s16 = int_to_ptr.vmem [resolvable:$true] %s801_s16 }
  0xe0   : > { %s4801_s14 = scalar_lea.hbm %s5744_s11, %s4714_s12  ;;  %s3847_s28 = scalar_lea.hbm %s5744_s11, 32 }
  0xe1   : > { %s3843_s23 = scalar_lea.hbm %s4801_s14, 16  ;;  %p3848_p13 = scmp.lt.u32.totalorder %s4801_s14, %s5744_s11 }
  0xe2   : > { %p3844_p6 = scmp.ne.s32.totalorder %s4801_s14, %s3843_s23  ;;  %p3849_p12 = scmp.lt.u32.totalorder %s3847_s28, %s3843_s23 }
  0xe3   : > { %p3851_p5 = scmp.lt.u32.totalorder %s3843_s23, %s4801_s14 }
  0xe4   : > { %p3845_p4 = pnand %p3844_p6, %p5738_p10  ;;  %p3850_p9 = por %p3849_p12, %p3848_p13 }
  0xe6   : > { %p3846_p7 = pneg %p3845_p4  ;;  %p3852_p3 = por %p3851_p5, %p3850_p9 }
  0xe8   : > { %p3853_p11 = pnand %p3852_p3, %p3846_p7 }
  0xea   : > { %3856 = shalt.err (!%p3853_p11)
}
  0xeb   : > { %s3857_s8 = scalar_lea.vmem %s802_s16, 16  ;;  %s4376_s17 = smov [#allocation20]  }
  0xec   : > { %p3858_p1 = scmp.ne.s32.totalorder %s802_s16, %s3857_s8  ;;  %s3861_s25 = sshll.u32 %s4376_s17, 4  ;;  %s3862_s25 = int_to_ptr.vmem [resolvable:$false] %s3861_s25 }
  0xed   : > { %s3863_s0 = scalar_lea.vmem %s3862_s25, 32  ;;  %p3864_p0 = scmp.lt.s32.totalorder %s802_s16, %s3862_s25 }
  0xee   : > { %p3859_p8 = pnand %p3858_p1, %p5738_p10  ;;  %p3865_p6 = scmp.lt.s32.totalorder %s3863_s0, %s3857_s8 }
  0xf0   : > { %p3860_p2 = pneg %p3859_p8  ;;  %p3866_p4 = por %p3865_p6, %p3864_p0 }
  0xf2   : > { %p3867_p12 = pnand %p3866_p4, %p3860_p2 }
  0xf4   : > { %3870 = shalt.err (!%p3867_p12)
}
  0xf5   : > { %s5745_s23 = scalar_lea.sflag [#allocation21], %s4648_s24  ;;  %s5746_s13 = sld [smem:[#allocation72_spill]] }
  0xf6   : > { %3500 = dma.hbm_to_vmem [thread:$0]  (%p5738_p10), %s4801_s14, 16, %s802_s16, %s5745_s23  }
  0xf7   : > { %s832_s25 = scalar_lea.vmem [#allocation23], %s4687_s19 }
  0xf8   : > { %s839_s26 = sshll.u32 %s832_s25, 4  ;;  %s840_s26 = int_to_ptr.vmem [resolvable:$true] %s839_s26 }
  0xfb   : > { %s4828_s30 = scalar_lea.hbm %s5746_s13, %s4714_s12  ;;  %s3875_s16 = scalar_lea.hbm %s5746_s13, 32 }
  0xfc   : > { %s3871_s17 = scalar_lea.hbm %s4828_s30, 16  ;;  %p3876_p5 = scmp.lt.u32.totalorder %s4828_s30, %s5746_s13 }
  0xfd   : > { %p3872_p7 = scmp.ne.s32.totalorder %s4828_s30, %s3871_s17  ;;  %p3877_p3 = scmp.lt.u32.totalorder %s3875_s16, %s3871_s17 }
  0xfe   : > { %p3879_p1 = scmp.lt.u32.totalorder %s3871_s17, %s4828_s30 }
  0xff   : > { %p3873_p13 = pnand %p3872_p7, %p5738_p10  ;;  %p3878_p11 = por %p3877_p3, %p3876_p5 }
 0x101   : > { %p3874_p9 = pneg %p3873_p13  ;;  %p3880_p8 = por %p3879_p1, %p3878_p11 }
 0x103   : > { %p3881_p2 = pnand %p3880_p8, %p3874_p9 }
 0x105   : > { %3884 = shalt.err (!%p3881_p2)
}
 0x106   : > { %s3885_s28 = scalar_lea.vmem %s840_s26, 16  ;;  %s4377_s25 = smov [#allocation23]  }
 0x107   : > { %p3886_p0 = scmp.ne.s32.totalorder %s840_s26, %s3885_s28  ;;  %s3889_s8 = sshll.u32 %s4377_s25, 4  ;;  %s3890_s8 = int_to_ptr.vmem [resolvable:$false] %s3889_s8 }
 0x108   : > { %s3891_s0 = scalar_lea.vmem %s3890_s8, 32  ;;  %p3892_p12 = scmp.lt.s32.totalorder %s840_s26, %s3890_s8 }
 0x109   : > { %p3887_p6 = pnand %p3886_p0, %p5738_p10  ;;  %p3893_p7 = scmp.lt.s32.totalorder %s3891_s0, %s3885_s28 }
 0x10b   : > { %p3888_p4 = pneg %p3887_p6  ;;  %p3894_p13 = por %p3893_p7, %p3892_p12 }
 0x10d   : > { %p3895_p3 = pnand %p3894_p13, %p3888_p4 }
 0x10f   : > { %3898 = shalt.err (!%p3895_p3)
}
 0x110   : > { %s5747_s17 = scalar_lea.sflag [#allocation24], %s4648_s24  ;;  %s4855_s23 = scalar_lea.hbm %s5654_s15, %s4714_s12 }
 0x111   : > { %3502 = dma.hbm_to_vmem [thread:$0]  (%p5738_p10), %s4828_s30, 16, %s840_s26, %s5747_s17  }
 0x112   : > { %s870_s8 = scalar_lea.vmem [#allocation26], %s4687_s19  ;;  %s3899_s25 = scalar_lea.hbm %s4855_s23, 16 }
 0x113   : > { %s877_s3 = sshll.u32 %s870_s8, 4  ;;  %p3900_p9 = scmp.ne.s32.totalorder %s4855_s23, %s3899_s25  ;;  %s878_s3 = int_to_ptr.vmem [resolvable:$true] %s877_s3 }
 0x114   : > { %s3903_s26 = scalar_lea.hbm %s5654_s15, 32  ;;  %p3904_p1 = scmp.lt.u32.totalorder %s4855_s23, %s5654_s15 }
 0x115   : > { %p3901_p5 = pnand %p3900_p9, %p5738_p10  ;;  %p3905_p8 = scmp.lt.u32.totalorder %s3903_s26, %s3899_s25 }
 0x116   : > { %p3907_p0 = scmp.lt.u32.totalorder %s3899_s25, %s4855_s23 }
 0x117   : > { %p3902_p11 = pneg %p3901_p5  ;;  %p3906_p2 = por %p3905_p8, %p3904_p1 }
 0x119   : > { %p3908_p6 = por %p3907_p0, %p3906_p2 }
 0x11b   : > { %p3909_p4 = pnand %p3908_p6, %p3902_p11 }
 0x11d   : > { %3912 = shalt.err (!%p3909_p4)
}
 0x11e   : > { %s3913_s16 = scalar_lea.vmem %s878_s3, 16  ;;  %s4378_s8 = smov [#allocation26]  }
 0x11f   : > { %p3914_p12 = scmp.ne.s32.totalorder %s878_s3, %s3913_s16  ;;  %s3917_s28 = sshll.u32 %s4378_s8, 4  ;;  %s3918_s28 = int_to_ptr.vmem [resolvable:$false] %s3917_s28 }
 0x120   : > { %s3919_s0 = scalar_lea.vmem %s3918_s28, 32  ;;  %p3920_p3 = scmp.lt.s32.totalorder %s878_s3, %s3918_s28 }
 0x121   : > { %p3915_p7 = pnand %p3914_p12, %p5738_p10  ;;  %p3921_p9 = scmp.lt.s32.totalorder %s3919_s0, %s3913_s16 }
 0x123   : > { %p3916_p13 = pneg %p3915_p7  ;;  %p3922_p5 = por %p3921_p9, %p3920_p3 }
 0x125   : > { %p3923_p1 = pnand %p3922_p5, %p3916_p13 }
 0x127   : > { %3926 = shalt.err (!%p3923_p1)
}
 0x128   : > { %s5748_s25 = scalar_lea.sflag [#allocation27], %s4648_s24  ;;  %s5749_s17 = sld [smem:[#allocation59_spill]] }
 0x129   : > { %3504 = dma.hbm_to_vmem [thread:$0]  (%p5738_p10), %s4855_s23, 16, %s878_s3, %s5748_s25  }
 0x12a   : > { %s589_s28 = scalar_lea.vmem [#allocation2], %s4645_s1  ;;  %s5750_s5 = sld [smem:[#allocation61_spill]] }
 0x12b   : > { %s596_s16 = sshll.u32 %s589_s28, 4  ;;  %s586_s9 = scalar_lea.sflag [#allocation3], %s4639_s18  ;;  %s4885_s16 = int_to_ptr.vmem [resolvable:$true] %s596_s16 }
 0x12c   : > { %p5751_p8 = scmp.ne.s32.totalorder %s5720_s20, 0 }
 0x12e   : > { %s4882_s14 = scalar_lea.hbm %s5749_s17, %s4642_s27  ;;  %s3931_s30 = scalar_lea.hbm %s5749_s17, 256 }
 0x12f   : > { %s3927_s23 = scalar_lea.hbm %s4882_s14, 128  ;;  %p3932_p6 = scmp.lt.u32.totalorder %s4882_s14, %s5749_s17 }
 0x130   : > { %s4891_s7 = scalar_lea.hbm %s5750_s5, %s4642_s27  ;;  %p3928_p11 = scmp.ne.s32.totalorder %s4882_s14, %s3927_s23 }
 0x131   : > { %p3933_p4 = scmp.lt.u32.totalorder %s3931_s30, %s3927_s23  ;;  %p3935_p7 = scmp.lt.u32.totalorder %s3927_s23, %s4882_s14 }
 0x132   : > { %p3929_p2 = pnand %p3928_p11, %p5751_p8 }
 0x133   : > { %p3934_p12 = por %p3933_p4, %p3932_p6 }
 0x134   : > { %p3930_p0 = pneg %p3929_p2 }
 0x135   : > { %p3936_p13 = por %p3935_p7, %p3934_p12 }
 0x137   : > { %p3937_p3 = pnand %p3936_p13, %p3930_p0 }
 0x139   : > { %3940 = shalt.err (!%p3937_p3)
}
 0x13a   : > { %s3941_s18 = scalar_lea.vmem %s4885_s16, 128  ;;  %s4379_s27 = smov [#allocation2]  }
 0x13b   : > { %p3942_p9 = scmp.ne.s32.totalorder %s4885_s16, %s3941_s18  ;;  %s3945_s28 = sshll.u32 %s4379_s27, 4  ;;  %s3946_s28 = int_to_ptr.vmem [resolvable:$false] %s3945_s28 }
 0x13c   : > { %s3947_s11 = scalar_lea.vmem %s3946_s28, 256  ;;  %p3948_p11 = scmp.lt.s32.totalorder %s4885_s16, %s3946_s28 }
 0x13d   : > { %p3943_p5 = pnand %p3942_p9, %p5751_p8  ;;  %p3949_p2 = scmp.lt.s32.totalorder %s3947_s11, %s3941_s18 }
 0x13f   : > { %p3944_p1 = pneg %p3943_p5  ;;  %p3950_p6 = por %p3949_p2, %p3948_p11 }
 0x141   : > { %p3951_p4 = pnand %p3950_p6, %p3944_p1 }
 0x143   : > { %3954 = shalt.err (!%p3951_p4)
}
 0x144   : > { %3489 = dma.hbm_to_vmem [thread:$0]  (%p5751_p8), %s4882_s14, 128, %s4885_s16, %s586_s9  }
 0x145   : > { %s625_s8 = scalar_lea.vmem [#allocation7], %s4645_s1  ;;  %s4917_s23 = sshll.u32 %s4687_s19, 4 }
 0x146   : > { %s632_s0 = sshll.u32 %s625_s8, 4  ;;  %s3955_s3 = scalar_lea.hbm %s4891_s7, 128  ;;  %s633_s0 = int_to_ptr.vmem [resolvable:$true] %s632_s0 }
 0x147   : > { %p3956_p0 = scmp.ne.s32.totalorder %s4891_s7, %s3955_s3  ;;  %s3959_s26 = scalar_lea.hbm %s5750_s5, 256 }
 0x148   : > { %p3960_p13 = scmp.lt.u32.totalorder %s4891_s7, %s5750_s5  ;;  %p3961_p3 = scmp.lt.u32.totalorder %s3959_s26, %s3955_s3 }
 0x149   : > { %p3957_p12 = pnand %p3956_p0, %p5751_p8  ;;  %p3963_p5 = scmp.lt.u32.totalorder %s3955_s3, %s4891_s7 }
 0x14a   : > { %p3962_p9 = por %p3961_p3, %p3960_p13 }
 0x14b   : > { %p3958_p7 = pneg %p3957_p12 }
 0x14c   : > { %p3964_p1 = por %p3963_p5, %p3962_p9 }
 0x14e   : > { %p3965_p11 = pnand %p3964_p1, %p3958_p7 }
 0x150   : > { %3968 = shalt.err (!%p3965_p11)
}
 0x151   : > { %s3969_s9 = scalar_lea.vmem %s633_s0, 128  ;;  %s4380_s1 = smov [#allocation7]  }
 0x152   : > { %p3970_p2 = scmp.ne.s32.totalorder %s633_s0, %s3969_s9  ;;  %s3973_s14 = sshll.u32 %s4380_s1, 4  ;;  %s3974_s14 = int_to_ptr.vmem [resolvable:$false] %s3973_s14 }
 0x153   : > { %s3975_s16 = scalar_lea.vmem %s3974_s14, 256  ;;  %p3976_p0 = scmp.lt.s32.totalorder %s633_s0, %s3974_s14 }
 0x154   : > { %p3971_p6 = pnand %p3970_p2, %p5751_p8  ;;  %p3977_p12 = scmp.lt.s32.totalorder %s3975_s16, %s3969_s9 }
 0x156   : > { %p3972_p4 = pneg %p3971_p6  ;;  %p3978_p10 = por %p3977_p12, %p3976_p0 }
 0x158   : > { %p3979_p3 = pnand %p3978_p10, %p3972_p4 }
 0x15a   : > { %3982 = shalt.err (!%p3979_p3)
}
 0x15b   : > { %s5752_s28 = scalar_lea.sflag [#allocation6], %s4648_s24  ;;  %s4939_s11 = sshll.u32 %s4361_s21, 8 }
 0x15c   : > { %3491 = dma.hbm_to_vmem [thread:$0]  (%p5751_p8), %s4891_s7, 128, %s633_s0, %s5752_s28  }
 0x15d   : > { %s660_s8 = scalar_lea.vmem [#allocation10], %s4917_s23  ;;  %s5753_s4 = sld [smem:[#allocation63_spill]] }
 0x15e   : > { %s667_s3 = sshll.u32 %s660_s8, 4  ;;  %p5754_p7 = scmp.ne.s32.totalorder %s5726_s10, 0  ;;  %s4948_s3 = int_to_ptr.vmem [resolvable:$true] %s667_s3 }
 0x163   : > { %s4946_s26 = scalar_lea.hbm %s5753_s4, %s4939_s11  ;;  %s3987_s18 = scalar_lea.hbm %s5753_s4, 512 }
 0x164   : > { %s3983_s20 = scalar_lea.hbm %s4946_s26, 256  ;;  %p3988_p9 = scmp.lt.u32.totalorder %s4946_s26, %s5753_s4 }
 0x165   : > { %p3984_p10 = scmp.ne.s32.totalorder %s4946_s26, %s3983_s20  ;;  %p3989_p5 = scmp.lt.u32.totalorder %s3987_s18, %s3983_s20 }
 0x166   : > { %p3991_p11 = scmp.lt.u32.totalorder %s3983_s20, %s4946_s26 }
 0x167   : > { %p3985_p8 = pnand %p3984_p10, %p5754_p7  ;;  %p3990_p1 = por %p3989_p5, %p3988_p9 }
 0x169   : > { %p3986_p13 = pneg %p3985_p8  ;;  %p3992_p2 = por %p3991_p11, %p3990_p1 }
 0x16b   : > { %p3993_p6 = pnand %p3992_p2, %p3986_p13 }
 0x16d   : > { %3996 = shalt.err (!%p3993_p6)
}
 0x16e   : > { %s3997_s1 = scalar_lea.vmem %s4948_s3, 256  ;;  %s4381_s14 = smov [#allocation10]  }
 0x16f   : > { %p3998_p4 = scmp.ne.s32.totalorder %s4948_s3, %s3997_s1  ;;  %s4001_s16 = sshll.u32 %s4381_s14, 4  ;;  %s4002_s16 = int_to_ptr.vmem [resolvable:$false] %s4001_s16 }
 0x170   : > { %s4003_s28 = scalar_lea.vmem %s4002_s16, 512  ;;  %p4004_p3 = scmp.lt.s32.totalorder %s4948_s3, %s4002_s16 }
 0x171   : > { %p3999_p0 = pnand %p3998_p4, %p5754_p7  ;;  %p4005_p10 = scmp.lt.s32.totalorder %s4003_s28, %s3997_s1 }
 0x173   : > { %p4000_p12 = pneg %p3999_p0  ;;  %p4006_p8 = por %p4005_p10, %p4004_p3 }
 0x175   : > { %p4007_p9 = pnand %p4006_p8, %p4000_p12 }
 0x177   : > { %4010 = shalt.err (!%p4007_p9)
}
 0x178   : > { %s4382_s8 = smov 64   ;;  %s4383_s25 = smov 4  }
 0x179   : > { %s5755_s30 = scalar_lea.sflag [#allocation9], %s4648_s24  ;;  %s5756_s6 = sld [smem:[#allocation65_spill]] }
 0x17a   : > { %3493 = dma.hbm_to_vmem [thread:$0]  (%p5754_p7), %s4946_s26, 256, %s4948_s3, %s5755_s30, %s4382_s8, %s4382_s8, %s4383_s25  }
 0x17b   : > { %s698_s18 = scalar_lea.vmem [#allocation13], %s4917_s23  ;;  %s5757_s14 = sld [smem:[#allocation67_spill]] }
 0x17c   : > { %s705_s27 = sshll.u32 %s698_s18, 4  ;;  %s4983_s27 = int_to_ptr.vmem [resolvable:$true] %s705_s27 }
 0x17f   : > { %s4980_s0 = scalar_lea.hbm %s5756_s6, %s4939_s11  ;;  %s4015_s30 = scalar_lea.hbm %s5756_s6, 512 }
 0x180   : > { %s4011_s28 = scalar_lea.hbm %s4980_s0, 256  ;;  %p4016_p11 = scmp.lt.u32.totalorder %s4980_s0, %s5756_s6 }
 0x181   : > { %s4989_s16 = scalar_lea.hbm %s5757_s14, %s4939_s11  ;;  %p4012_p13 = scmp.ne.s32.totalorder %s4980_s0, %s4011_s28 }
 0x182   : > { %p4017_p2 = scmp.lt.u32.totalorder %s4015_s30, %s4011_s28  ;;  %p4019_p4 = scmp.lt.u32.totalorder %s4011_s28, %s4980_s0 }
 0x183   : > { %p4013_p5 = pnand %p4012_p13, %p5754_p7 }
 0x184   : > { %p4018_p6 = por %p4017_p2, %p4016_p11 }
 0x185   : > { %p4014_p1 = pneg %p4013_p5 }
 0x186   : > { %p4020_p0 = por %p4019_p4, %p4018_p6 }
 0x188   : > { %p4021_p12 = pnand %p4020_p0, %p4014_p1 }
 0x18a   : > { %4024 = shalt.err (!%p4021_p12)
}
 0x18b   : > { %s4025_s18 = scalar_lea.vmem %s4983_s27, 256  ;;  %s4384_s9 = smov [#allocation13]  }
 0x18c   : > { %p4026_p3 = scmp.ne.s32.totalorder %s4983_s27, %s4025_s18  ;;  %s4029_s1 = sshll.u32 %s4384_s9, 4  ;;  %s4030_s1 = int_to_ptr.vmem [resolvable:$false] %s4029_s1 }
 0x18d   : > { %s4031_s3 = scalar_lea.vmem %s4030_s1, 512  ;;  %p4032_p9 = scmp.lt.s32.totalorder %s4983_s27, %s4030_s1 }
 0x18e   : > { %p4027_p10 = pnand %p4026_p3, %p5754_p7  ;;  %p4033_p13 = scmp.lt.s32.totalorder %s4031_s3, %s4025_s18 }
 0x190   : > { %p4028_p8 = pneg %p4027_p10  ;;  %p4034_p5 = por %p4033_p13, %p4032_p9 }
 0x192   : > { %p4035_p11 = pnand %p4034_p5, %p4028_p8 }
 0x194   : > { %4038 = shalt.err (!%p4035_p11)
}
 0x195   : > { %s5758_s28 = scalar_lea.sflag [#allocation12], %s4648_s24  ;;  %s736_s26 = scalar_lea.vmem [#allocation16], %s4917_s23 }
 0x196   : > { %3495 = dma.hbm_to_vmem [thread:$0]  (%p5754_p7), %s4980_s0, 256, %s4983_s27, %s5758_s28, %s4382_s8, %s4382_s8, %s4383_s25  }
 0x197   : > { %s743_s30 = sshll.u32 %s736_s26, 4  ;;  %s5759_s18 = sld [smem:[#allocation69_spill]]  ;;  %s5018_s30 = int_to_ptr.vmem [resolvable:$true] %s743_s30 }
 0x198   : > { %s4039_s1 = scalar_lea.hbm %s4989_s16, 256  ;;  %s4043_s5 = scalar_lea.hbm %s5757_s14, 512 }
 0x199   : > { %p4040_p1 = scmp.ne.s32.totalorder %s4989_s16, %s4039_s1  ;;  %p4044_p4 = scmp.lt.u32.totalorder %s4989_s16, %s5757_s14 }
 0x19a   : > { %p4045_p0 = scmp.lt.u32.totalorder %s4043_s5, %s4039_s1  ;;  %p4047_p3 = scmp.lt.u32.totalorder %s4039_s1, %s4989_s16 }
 0x19b   : > { %p4041_p2 = pnand %p4040_p1, %p5754_p7 }
 0x19c   : > { %p4046_p12 = por %p4045_p0, %p4044_p4 }
 0x19d   : > { %s5024_s9 = scalar_lea.hbm %s5759_s18, %s4939_s11  ;;  %p4042_p6 = pneg %p4041_p2 }
 0x19e   : > { %p4048_p10 = por %p4047_p3, %p4046_p12 }
 0x1a0   : > { %p4049_p8 = pnand %p4048_p10, %p4042_p6 }
 0x1a2   : > { %4052 = shalt.err (!%p4049_p8)
}
 0x1a3   : > { %s4053_s27 = scalar_lea.vmem %s5018_s30, 256  ;;  %s4385_s4 = smov [#allocation16]  }
 0x1a4   : > { %p4054_p9 = scmp.ne.s32.totalorder %s5018_s30, %s4053_s27  ;;  %s4057_s28 = sshll.u32 %s4385_s4, 4  ;;  %s4058_s28 = int_to_ptr.vmem [resolvable:$false] %s4057_s28 }
 0x1a5   : > { %s4059_s6 = scalar_lea.vmem %s4058_s28, 512  ;;  %p4060_p11 = scmp.lt.s32.totalorder %s5018_s30, %s4058_s28 }
 0x1a6   : > { %p4055_p13 = pnand %p4054_p9, %p5754_p7  ;;  %p4061_p1 = scmp.lt.s32.totalorder %s4059_s6, %s4053_s27 }
 0x1a8   : > { %p4056_p5 = pneg %p4055_p13  ;;  %p4062_p2 = por %p4061_p1, %p4060_p11 }
 0x1aa   : > { %p4063_p4 = pnand %p4062_p2, %p4056_p5 }
 0x1ac   : > { %4066 = shalt.err (!%p4063_p4)
}
 0x1ad   : > { %s5760_s5 = scalar_lea.sflag [#allocation15], %s4648_s24  ;;  %s774_s26 = scalar_lea.vmem [#allocation19], %s4917_s23 }
 0x1ae   : > { %3497 = dma.hbm_to_vmem [thread:$0]  (%p5754_p7), %s4989_s16, 256, %s5018_s30, %s5760_s5, %s4382_s8, %s4382_s8, %s4383_s25  }
 0x1af   : > { %s781_s20 = sshll.u32 %s774_s26, 4  ;;  %s5761_s3 = sld [smem:[#allocation71_spill]]  ;;  %s5053_s20 = int_to_ptr.vmem [resolvable:$true] %s781_s20 }
 0x1b0   : > { %s4067_s27 = scalar_lea.hbm %s5024_s9, 256  ;;  %s4071_s6 = scalar_lea.hbm %s5759_s18, 512 }
 0x1b1   : > { %p4068_p6 = scmp.ne.s32.totalorder %s5024_s9, %s4067_s27  ;;  %p4072_p3 = scmp.lt.u32.totalorder %s5024_s9, %s5759_s18 }
 0x1b2   : > { %p4073_p10 = scmp.lt.u32.totalorder %s4071_s6, %s4067_s27  ;;  %p4075_p9 = scmp.lt.u32.totalorder %s4067_s27, %s5024_s9 }
 0x1b3   : > { %p4069_p0 = pnand %p4068_p6, %p5754_p7 }
 0x1b4   : > { %p4074_p8 = por %p4073_p10, %p4072_p3 }
 0x1b5   : > { %s5059_s0 = scalar_lea.hbm %s5761_s3, %s4939_s11  ;;  %p4070_p12 = pneg %p4069_p0 }
 0x1b6   : > { %p4076_p13 = por %p4075_p9, %p4074_p8 }
 0x1b8   : > { %p4077_p5 = pnand %p4076_p13, %p4070_p12 }
 0x1ba   : > { %4080 = shalt.err (!%p4077_p5)
}
 0x1bb   : > { %s4081_s30 = scalar_lea.vmem %s5053_s20, 256  ;;  %s4386_s5 = smov [#allocation19]  }
 0x1bc   : > { %p4082_p11 = scmp.ne.s32.totalorder %s5053_s20, %s4081_s30  ;;  %s4085_s26 = sshll.u32 %s4386_s5, 4  ;;  %s4086_s26 = int_to_ptr.vmem [resolvable:$false] %s4085_s26 }
 0x1bd   : > { %s4087_s13 = scalar_lea.vmem %s4086_s26, 512  ;;  %p4088_p4 = scmp.lt.s32.totalorder %s5053_s20, %s4086_s26 }
 0x1be   : > { %p4083_p1 = pnand %p4082_p11, %p5754_p7  ;;  %p4089_p6 = scmp.lt.s32.totalorder %s4087_s13, %s4081_s30 }
 0x1c0   : > { %p4084_p2 = pneg %p4083_p1  ;;  %p4090_p0 = por %p4089_p6, %p4088_p4 }
 0x1c2   : > { %p4091_p3 = pnand %p4090_p0, %p4084_p2 }
 0x1c4   : > { %4094 = shalt.err (!%p4091_p3)
}
 0x1c5   : > { %s5762_s7 = scalar_lea.sflag [#allocation18], %s4648_s24  ;;  %s812_s1 = scalar_lea.vmem [#allocation22], %s4917_s23 }
 0x1c6   : > { %3499 = dma.hbm_to_vmem [thread:$0]  (%p5754_p7), %s5024_s9, 256, %s5053_s20, %s5762_s7, %s4382_s8, %s4382_s8, %s4383_s25  }
 0x1c7   : > { %s819_s27 = sshll.u32 %s812_s1, 4  ;;  %s5763_s6 = sld [smem:[#allocation73_spill]]  ;;  %s5088_s27 = int_to_ptr.vmem [resolvable:$true] %s819_s27 }
 0x1c8   : > { %s4095_s30 = scalar_lea.hbm %s5059_s0, 256  ;;  %s4099_s13 = scalar_lea.hbm %s5761_s3, 512 }
 0x1c9   : > { %p4096_p12 = scmp.ne.s32.totalorder %s5059_s0, %s4095_s30  ;;  %p4100_p9 = scmp.lt.u32.totalorder %s5059_s0, %s5761_s3 }
 0x1ca   : > { %p4101_p13 = scmp.lt.u32.totalorder %s4099_s13, %s4095_s30  ;;  %p4103_p11 = scmp.lt.u32.totalorder %s4095_s30, %s5059_s0 }
 0x1cb   : > { %p4097_p10 = pnand %p4096_p12, %p5754_p7 }
 0x1cc   : > { %p4102_p5 = por %p4101_p13, %p4100_p9 }
 0x1cd   : > { %s5094_s16 = scalar_lea.hbm %s5763_s6, %s4939_s11  ;;  %p4098_p8 = pneg %p4097_p10 }
 0x1ce   : > { %p4104_p1 = por %p4103_p11, %p4102_p5 }
 0x1d0   : > { %p4105_p2 = pnand %p4104_p1, %p4098_p8 }
 0x1d2   : > { %4108 = shalt.err (!%p4105_p2)
}
 0x1d3   : > { %s4109_s11 = scalar_lea.vmem %s5088_s27, 256  ;;  %s4387_s20 = smov [#allocation22]  }
 0x1d4   : > { %p4110_p4 = scmp.ne.s32.totalorder %s5088_s27, %s4109_s11  ;;  %s4113_s7 = sshll.u32 %s4387_s20, 4  ;;  %s4114_s7 = int_to_ptr.vmem [resolvable:$false] %s4113_s7 }
 0x1d5   : > { %s4115_s14 = scalar_lea.vmem %s4114_s7, 512  ;;  %p4116_p3 = scmp.lt.s32.totalorder %s5088_s27, %s4114_s7 }
 0x1d6   : > { %p4111_p6 = pnand %p4110_p4, %p5754_p7  ;;  %p4117_p12 = scmp.lt.s32.totalorder %s4115_s14, %s4109_s11 }
 0x1d8   : > { %p4112_p0 = pneg %p4111_p6  ;;  %p4118_p10 = por %p4117_p12, %p4116_p3 }
 0x1da   : > { %p4119_p9 = pnand %p4118_p10, %p4112_p0 }
 0x1dc   : > { %4122 = shalt.err (!%p4119_p9)
}
 0x1dd   : > { %s5764_s1 = scalar_lea.sflag [#allocation21], %s4648_s24  ;;  %s850_s4 = scalar_lea.vmem [#allocation25], %s4917_s23 }
 0x1de   : > { %3501 = dma.hbm_to_vmem [thread:$0]  (%p5754_p7), %s5059_s0, 256, %s5088_s27, %s5764_s1, %s4382_s8, %s4382_s8, %s4383_s25  }
 0x1df   : > { %s857_s28 = sshll.u32 %s850_s4, 4  ;;  %s3202_s30 = sshll.u32 %s4687_s19, 5  ;;  %s5124_s28 = int_to_ptr.vmem [resolvable:$true] %s857_s28 }
 0x1e0   : > { %s4123_s5 = scalar_lea.hbm %s5094_s16, 256  ;;  %s4127_s9 = scalar_lea.hbm %s5763_s6, 512 }
 0x1e1   : > { %p4124_p8 = scmp.ne.s32.totalorder %s5094_s16, %s4123_s5  ;;  %p4128_p11 = scmp.lt.u32.totalorder %s5094_s16, %s5763_s6 }
 0x1e2   : > { %p4129_p1 = scmp.lt.u32.totalorder %s4127_s9, %s4123_s5  ;;  %p4131_p4 = scmp.lt.u32.totalorder %s4123_s5, %s5094_s16 }
 0x1e3   : > { %p4125_p13 = pnand %p4124_p8, %p5754_p7 }
 0x1e4   : > { %p4130_p2 = por %p4129_p1, %p4128_p11 }
 0x1e5   : > { %p4126_p5 = pneg %p4125_p13 }
 0x1e6   : > { %p4132_p6 = por %p4131_p4, %p4130_p2 }
 0x1e8   : > { %p4133_p0 = pnand %p4132_p6, %p4126_p5 }
 0x1ea   : > { %4136 = shalt.err (!%p4133_p0)
}
 0x1eb   : > { %s4137_s23 = scalar_lea.vmem %s5124_s28, 256  ;;  %s4388_s0 = smov [#allocation25]  }
 0x1ec   : > { %p4138_p3 = scmp.ne.s32.totalorder %s5124_s28, %s4137_s23  ;;  %s4141_s27 = sshll.u32 %s4388_s0, 4  ;;  %s4142_s27 = int_to_ptr.vmem [resolvable:$false] %s4141_s27 }
 0x1ed   : > { %s4143_s7 = scalar_lea.vmem %s4142_s27, 512  ;;  %p4144_p9 = scmp.lt.s32.totalorder %s5124_s28, %s4142_s27 }
 0x1ee   : > { %p4139_p12 = pnand %p4138_p3, %p5754_p7  ;;  %p4145_p8 = scmp.lt.s32.totalorder %s4143_s7, %s4137_s23 }
 0x1f0   : > { %p4140_p10 = pneg %p4139_p12  ;;  %p4146_p13 = por %p4145_p8, %p4144_p9 }
 0x1f2   : > { %p4147_p11 = pnand %p4146_p13, %p4140_p10 }
 0x1f4   : > { %4150 = shalt.err (!%p4147_p11)
}
 0x1f5   : > { %s5765_s14 = scalar_lea.sflag [#allocation24], %s4648_s24  ;;  %s3277_s1 = sshll.u32 %s4361_s21, 9 }
 0x1f6   : > { %3503 = dma.hbm_to_vmem [thread:$0]  (%p5754_p7), %s5094_s16, 256, %s5124_s28, %s5765_s14, %s4382_s8, %s4382_s8, %s4383_s25  }
 0x1f7   : > { %s888_s4 = scalar_lea.vmem [#allocation28], %s3202_s30  ;;  %s5766_s9 = sld [smem:[#allocation74_spill]] }
 0x1f8   : > { %s895_s5 = sshll.u32 %s888_s4, 4  ;;  %s5160_s5 = int_to_ptr.vmem [resolvable:$true] %s895_s5 }
 0x1fd   : > { %s5158_s11 = scalar_lea.hbm %s5766_s9, %s3277_s1  ;;  %s4155_s30 = scalar_lea.hbm %s5766_s9, 1024 }
 0x1fe   : > { %s4151_s20 = scalar_lea.hbm %s5158_s11, 512  ;;  %p4156_p4 = scmp.lt.u32.totalorder %s5158_s11, %s5766_s9 }
 0x1ff   : > { %p4152_p5 = scmp.ne.s32.totalorder %s5158_s11, %s4151_s20  ;;  %p4157_p6 = scmp.lt.u32.totalorder %s4155_s30, %s4151_s20 }
 0x200   : > { %p4159_p3 = scmp.lt.u32.totalorder %s4151_s20, %s5158_s11 }
 0x201   : > { %p4153_p1 = pnand %p4152_p5, %p5754_p7  ;;  %p4158_p0 = por %p4157_p6, %p4156_p4 }
 0x203   : > { %p4154_p2 = pneg %p4153_p1  ;;  %p4160_p12 = por %p4159_p3, %p4158_p0 }
 0x205   : > { %p4161_p10 = pnand %p4160_p12, %p4154_p2 }
 0x207   : > { %4164 = shalt.err (!%p4161_p10)
}
 0x208   : > { %s4165_s27 = scalar_lea.vmem %s5160_s5, 512  ;;  %s4389_s7 = smov [#allocation28]  }
 0x209   : > { %p4166_p9 = scmp.ne.s32.totalorder %s5160_s5, %s4165_s27  ;;  %s4169_s14 = sshll.u32 %s4389_s7, 4  ;;  %s4170_s14 = int_to_ptr.vmem [resolvable:$false] %s4169_s14 }
 0x20a   : > { %s4171_s1 = scalar_lea.vmem %s4170_s14, 1024  ;;  %p4172_p11 = scmp.lt.s32.totalorder %s5160_s5, %s4170_s14 }
 0x20b   : > { %p4167_p8 = pnand %p4166_p9, %p5754_p7  ;;  %p4173_p5 = scmp.lt.s32.totalorder %s4171_s1, %s4165_s27 }
 0x20d   : > { %p4168_p13 = pneg %p4167_p8  ;;  %p4174_p1 = por %p4173_p5, %p4172_p11 }
 0x20f   : > { %p4175_p4 = pnand %p4174_p1, %p4168_p13 }
 0x211   : > { %4178 = shalt.err (!%p4175_p4)
}
 0x212   : > { %s5767_s4 = scalar_lea.sflag [#allocation27], %s4648_s24  ;;  %s5768_s20 = sld [smem:[#allocation75_spill]] }
 0x213   : > { %3505 = dma.hbm_to_vmem [thread:$0]  (%p5754_p7), %s5158_s11, 512, %s5160_s5, %s5767_s4, %s4382_s8, %s4382_s8, %s4383_s25  }
 0x214   : > { %s908_s30 = scalar_lea.vmem [#allocation29], %s4687_s19  ;;  %s906_s24 = scalar_lea.sflag [#allocation30], %s4687_s19 }
 0x215   : > { %s915_s23 = sshll.u32 %s908_s30, 4  ;;  %s916_s23 = int_to_ptr.vmem [resolvable:$true] %s915_s23 }
 0x218   : > { %s5769_s16 = smov %s5768_s20  ;;  %s5192_s28 = scalar_lea.hbm %s5768_s20, %s4714_s12 }
 0x219   : > { %s4179_s0 = scalar_lea.hbm %s5192_s28, 16  ;;  %s4183_s25 = scalar_lea.hbm %s5769_s16, 32 }
 0x21a   : > { %p4180_p2 = scmp.ne.s32.totalorder %s5192_s28, %s4179_s0  ;;  %p4184_p3 = scmp.lt.u32.totalorder %s5192_s28, %s5769_s16 }
 0x21b   : > { %p4185_p12 = scmp.lt.u32.totalorder %s4183_s25, %s4179_s0  ;;  %p4187_p9 = scmp.lt.u32.totalorder %s4179_s0, %s5192_s28 }
 0x21c   : > { %p4181_p6 = pnand %p4180_p2, %p5754_p7 }
 0x21d   : > { %p4186_p10 = por %p4185_p12, %p4184_p3 }
 0x21e   : > { %p4182_p0 = pneg %p4181_p6 }
 0x21f   : > { %p4188_p8 = por %p4187_p9, %p4186_p10 }
 0x221   : > { %p4189_p13 = pnand %p4188_p8, %p4182_p0 }
 0x223   : > { %4192 = shalt.err (!%p4189_p13)
}
 0x224   : > { %s4193_s19 = scalar_lea.vmem %s916_s23, 16  ;;  %s4390_s11 = smov [#allocation29]  }
 0x225   : > { %p4194_p11 = scmp.ne.s32.totalorder %s916_s23, %s4193_s19  ;;  %s4197_s7 = sshll.u32 %s4390_s11, 4  ;;  %s4198_s7 = int_to_ptr.vmem [resolvable:$false] %s4197_s7 }
 0x226   : > { %s4199_s14 = scalar_lea.vmem %s4198_s7, 32  ;;  %p4200_p4 = scmp.lt.s32.totalorder %s916_s23, %s4198_s7 }
 0x227   : > { %p4195_p5 = pnand %p4194_p11, %p5754_p7  ;;  %p4201_p2 = scmp.lt.s32.totalorder %s4199_s14, %s4193_s19 }
 0x229   : > { %p4196_p1 = pneg %p4195_p5  ;;  %p4202_p6 = por %p4201_p2, %p4200_p4 }
 0x22b   : > { %p4203_p3 = pnand %p4202_p6, %p4196_p1 }
 0x22d   : > { %4206 = shalt.err (!%p4203_p3)
}
 0x22e   : > { %3506 = dma.hbm_to_vmem [thread:$0]  (%p5754_p7), %s5192_s28, 16, %s916_s23, %s906_s24  }
 0x22f PF: > { %p3206_p0 = scmp.ge.s32.totalorder %s4369_s2, 1  ;;  %p920_p12 = scmp.lt.s32.totalorder %s4369_s2, 5 }
 0x231   : > { %p921_p10 = pnand %p3206_p0, %p920_p12 }
 0x232   : > { %s5770_s1 = sld [smem:[#allocation46_spill]] (!%p921_p10)  ;;  %s5771_s4 = sld [smem:[#allocation53_spill]] (!%p921_p10) }
 0x233   : > { %924 = sbr.rel (%p921_p10) target bundleno = 5332 (0x14d4), region = 92 }
 0x238   : > { %s5216_s26 = sand.u32 (!%p921_p10), 1, %s5770_s1   ;;  %p5772_p9 = scmp.ne.s32.totalorder (!%p921_p10), %s5771_s4, 0 }
 0x239   : > { %s5219_s13 = sshll.u32 (!%p921_p10), %s5216_s26, 3  ;;  %s927_s20 = scalar_lea.sflag (!%p921_p10), [#allocation3], %s5216_s26 }
 0x23a   : > { %s930_s10 = scalar_lea.vmem [#allocation2], %s5219_s13 }
 0x23b   : > { %4280 = dma.done.wait (%p5772_p9), %s927_s20, 128  }
 0x23c   : > { %4282 = vsyncadd (%p5772_p9), %s927_s20, 4294967168  ;;  %s5773_s28 = sld [smem:[#allocation50_spill]] }
 0x242   : > { %s5228_s30 = sand.u32 1, %s5773_s28  }
 0x243   : > { %s936_s23 = scalar_lea.sflag [#allocation6], %s5228_s30 }
 0x244   : > { %4284 = dma.done.wait (%p5772_p9), %s936_s23, 256  }
 0x245   : > { %4286 = vsyncadd (%p5772_p9), %s936_s23, 4294967040  ;;  %s948_s0 = scalar_lea.vmem [#allocation7], %s5219_s13  ;;  %s954_s27 = scalar_lea.sflag [#allocation9], %s5228_s30 }
 0x246   : > { %4288 = dma.done.wait (%p5772_p9), %s954_s27, 16  }
 0x247   : > { %4290 = vsyncadd (%p5772_p9), %s954_s27, 4294967280  ;;  %s5774_s25 = sld [smem:[#allocation44_spill]]  ;;  %s5775_s5 = sld [smem:[#allocation56_spill]] }
 0x24d   : > { %s5244_s12 = sand.u32 1, %s5774_s25   ;;  %p5776_p7 = scmp.ne.s32.totalorder %s5775_s5, 0 }
 0x24e   : > { %s5247_s19 = sshll.u32 %s5244_s12, 4 }
 0x24f   : > { %s965_s11 = scalar_lea.vmem [#allocation10], %s5247_s19 }
 0x250   : > { %4292 = dma.done.wait (%p5776_p7), %s954_s27, 256  }
 0x251   : > { %4294 = vsyncadd (%p5776_p7), %s954_s27, 4294967040  ;;  %s971_s7 = scalar_lea.sflag [#allocation12], %s5228_s30  ;;  %s973_s14 = scalar_lea.vmem [#allocation11], %s5244_s12 }
 0x252   : > { %4296 = dma.done.wait (%p5776_p7), %s971_s7, 272  }
 0x253   : > { %4298 = vsyncadd (%p5776_p7), %s971_s7, 4294967024  ;;  %s982_s1 = scalar_lea.vmem [#allocation13], %s5247_s19  ;;  %s988_s4 = scalar_lea.sflag [#allocation15], %s5228_s30 }
 0x254   : > { %s990_s20 = scalar_lea.vmem [#allocation14], %s5244_s12 }
 0x255   : > { %4300 = dma.done.wait (%p5776_p7), %s988_s4, 272  }
 0x256   : > { %4302 = vsyncadd (%p5776_p7), %s988_s4, 4294967024  ;;  %s1005_s23 = scalar_lea.sflag [#allocation18], %s5228_s30 }
 0x257   : > { %4304 = dma.done.wait (%p5776_p7), %s1005_s23, 272  }
 0x258   : > { %4306 = vsyncadd (%p5776_p7), %s1005_s23, 4294967024  ;;  %s1016_s25 = scalar_lea.vmem [#allocation19], %s5247_s19  ;;  %s1022_s7 = scalar_lea.sflag [#allocation21], %s5228_s30 }
 0x259   : > { %4308 = dma.done.wait (%p5776_p7), %s1022_s7, 272  }
 0x25a   : > { %4310 = vsyncadd (%p5776_p7), %s1022_s7, 4294967024  ;;  %s1039_s27 = scalar_lea.sflag [#allocation24], %s5228_s30 }
 0x25b   : > { %4312 = dma.done.wait (%p5776_p7), %s1039_s27, 272  }
 0x25c   : > { %4314 = vsyncadd (%p5776_p7), %s1039_s27, 4294967024  ;;  %s1056_s8 = scalar_lea.sflag [#allocation27], %s5228_s30 }
 0x25d   : > { %4316 = dma.done.wait (%p5776_p7), %s1056_s8, 528  }
 0x25e   : > { %4318 = vsyncadd (%p5776_p7), %s1056_s8, 4294966768  ;;  %s3216_s7 = sshll.u32 %s5244_s12, 5  ;;  %s1073_s27 = scalar_lea.sflag [#allocation30], %s5244_s12 }
 0x25f   : > { %s5296_s28 = scalar_lea.vmem [#allocation28], %s3216_s7 }
 0x260   : > { %4320 = dma.done.wait (%p5776_p7), %s1073_s27, 16  }
 0x261   : > { %4322 = vsyncadd (%p5776_p7), %s1073_s27, 4294967280  ;;  %s5305_s30 = scalar_lea.vmem [#allocation31], %s5219_s13  ;;  %s5777_s24 = sld [smem:[#allocation48_spill]] }
 0x267   : > { %p3218_p8 = scmp.ne.s32.totalorder %s5777_s24, 0 }
 0x268   : > { %v1210_v0 = vld [vmem:[%s930_s10] sm:$0xff] (!%p3218_p8)  ;;  %vm1211_vm0 = vcmask (!%p3218_p8), 261120  }
 0x269   : > { %1209 = sbr.rel (%p3218_p8) target bundleno = 624 (0x270), region = 168  ;;  %1212 = vst.msk [vmem:[%s5305_s30] sm:$0xff] (!%p3218_p8), %vm1211_vm0, %v1210_v0 }
 0x270 PF: > { %v5312_v1 = vld [vmem:[%s5305_s30] sm:$0xff]  ;;  %vm1217_vm1 = vcmask 261120   ;;  %v4391_v9 = vmov 0.0   ;;  %vm4392_vm2 = vmmov 0   ;;  %s4393_s10 = smov 120   ;;  %s4394_s24 = smov 96  }
 0x271   : > { %v1218_v2 = vsel %vm1217_vm1, %v5312_v1, 0.0  ;;  %v3639_v8 = vld [vmem:[%s965_s11] sm:$0xff]   ;;  %3333 = vmatprep.subr.bf16.mxu1 %v4391_v9  ;;  %3337 = vmatprep.mubr.msk.bf16.mxu1 %vm4392_vm2, %v4391_v9  ;;  %v3640_v10 = vld [vmem:[%s965_s11 + $0x8] sm:$0xff]   ;;  %s4395_s8 = smov 88   ;;  %s4396_s5 = smov 80   ;;  %vm1310_vm5 = vcmask 64512  }
 0x272   : > { %1219 = vadd.xlane.f32.xlu0 %v1218_v2  ;;  %3334 = vmatpush3.bf16.msra.mxu1 %v3639_v8  ;;  %v3219_v22 = vld [vmem:[%s973_s14] ss:$0 sm:$0xff]  ;;  %s4397_s11 = smov 112   ;;  %s4398_s14 = smov 72   ;;  %vm1376_vm7 = vcmask 1043456   ;;  %vm1766_vm8 = vcmask 130048  }
 0x273   : > { %3347 = vmatprep.subr.bf16.mxu0 %v4391_v9  ;;  %3335 = vmatprep.subr.bf16.mxu1 %v4391_v9  ;;  %s4399_s7 = smov 104   ;;  %v1215_v40 = vld [vmem:[%s948_s0] sm:$0xff]  ;;  %s4400_s0 = smov 64   ;;  %vm1768_vm9 = vcmask 195584   ;;  %vm2654_vm0 = vcmask 523264  }
 0x274   : > { %3349 = vmatprep.mubr.msk.bf16.mxu0 %vm4392_vm2, %v4391_v9  ;;  %vm1357_vm6 = vcmp.ne.f32.partialorder %v1215_v40, 0.0  ;;  %s4401_s27 = smov 56   ;;  %s4402_s4 = smov 48  }
 0x275   : > { %s4403_s23 = smov 40  }
 0x276   : > { %3336 = vmatpush3.bf16.msra.mxu1 %v3640_v10 }
 0x277   : > { %3341 = vmatprep.subr.bf16.mxu1 %v4391_v9 }
 0x2ff   : > { %v1220_v3 = vpop.xlane.xlu0 %1219 }
 0x300   : > { %v1222_v4 = vmul.f32 0.03125, %v1220_v3 }
 0x302   : > { %v1223_v5 = vsub.f32 %v5312_v1, %v1222_v4 }
 0x304   : > { %v1224_v6 = vmul.f32 %v1223_v5, %v1223_v5 }
 0x306   : > { %v1225_v7 = vsel %vm1217_vm1, %v1224_v6, 0.0 }
 0x307   : > { %1226 = vadd.xlane.f32.xlu0 %v1225_v7 }
 0x394   : > { %v1227_v11 = vpop.xlane.xlu0 %1226 }
 0x395   : > { %v1228_v12 = vmul.f32 0.032258064, %v1227_v11 }
 0x397   : > { %3655 = vrsqrt.f32 %v1228_v12  ;;  %vm1231_vm3 = vcmp.eq.f32.partialorder %v1228_v12, inf  ;;  %v1234_v15 = vand.u32 2147483648, %v1228_v12  ;;  %vm1233_vm4 = vcmp.eq.f32.partialorder %v1228_v12, 0.0 }
 0x3a1   : > { %v3656_v13 = vpop.eup %3655 }
 0x3a2   : > { %v1230_v14 = vmul.f32 %v3656_v13, %v1228_v12 }
 0x3a4   : > { %v1232_v16 = vsel %vm1231_vm3, %v1228_v12, %v1230_v14 }
 0x3a5   : > { %v1235_v17 = vsel %vm1233_vm4, %v1234_v15, %v1232_v16 }
 0x3a6   : > { %v1236_v18 = vadd.f32 1e-06, %v1235_v17 }
 0x3a8   : > { %3657 = vrcp.f32 %v1236_v18 }
 0x3b2   : > { %v3658_v19 = vpop.eup %3657 }
 0x3b3   : > { %v1238_v20 = vmul.f32 %v3658_v19, %v1223_v5 }
 0x3b5   : > { %v1239_v21 = vpack.c.bf16 %v1238_v20, %v1238_v20 }
 0x3b7   : > { %3338 = vmatmul.mubr.msk.bf16.vlgmr.msra.gmra.mrb[0].mxu1 %vm1217_vm1, %v1239_v21 }
 0x3b8   : > { %3343 = vmatprep.mubr.msk.bf16.mxu1 %vm4392_vm2, %v4391_v9 }
 0x48a   : > { %v1300_v23 = vpop.f32.mrb[0].mxu1 }
 0x48b   : > { %v1301_v24 = vadd.f32 %v3219_v22, %v1300_v23  ;;  %v3339_v25 = vpop.f32.mrb[1].mxu1 }
 0x48c   : > { %v1303_v26 = vpop.f32.mrb[2].mxu1 }
 0x48d   : > { %v5335_v27 = vpack.c.bf16 %v1301_v24, %v1301_v24  ;;  %v3340_v28 = vpop.f32.mrb[3].mxu1 }
 0x48f   : > { %1420 = vrot.lane.b32.xlu0 %v5335_v27, %s4393_s10  ;;  %1308 = vrot.lane.b32.xlu1 %v5335_v27, %s4394_s24 }
 0x493   : > { %1422 = vrot.lane.b32.xlu1 %v5335_v27, %s4395_s8 }
 0x497   : > { %1533 = vrot.lane.b32.xlu1 %v5335_v27, %s4396_s5 }
 0x49b   : > { %1531 = vrot.lane.b32.xlu1 %v5335_v27, %s4397_s11 }
 0x49f   : > { %1644 = vrot.lane.b32.xlu1 %v5335_v27, %s4398_s14 }
 0x4a3   : > { %1642 = vrot.lane.b32.xlu1 %v5335_v27, %s4399_s7 }
 0x501   : > { %v1309_v29 = vpop.permute.xlu1 %1308  ;;  %v1421_v34 = vpop.permute.xlu0 %1420 }
 0x502   : > { %v1315_v30 = vsel %vm1310_vm5, %v1309_v29, 0 }
 0x503   : > { %3342 = vmatpush3.bf16.xpose.msra.mxu1 %v1315_v30 }
 0x504   : > { %3353 = vmatprep.subr.bf16.mxu1 %v4391_v9 }
 0x505   : > { %v1423_v31 = vpop.permute.xlu1 %1422 }
 0x506   : > { %v1428_v32 = vsel %vm1310_vm5, %v1423_v31, 0 }
 0x509   : > { %v1534_v33 = vpop.permute.xlu1 %1533 }
 0x50a   : > { %3344 = vmatmul.mubr.msk.bf16.vlgmr.msra.gmra.mrb[4].mxu1 %vm1310_vm5, %v5335_v27  ;;  %v1539_v36 = vsel %vm1310_vm5, %v1534_v33, 0 }
 0x50b   : > { %3354 = vmatpush3.bf16.xpose.msra.mxu1 %v1428_v32  ;;  %3355 = vmatprep.mubr.msk.bf16.mxu1 %vm4392_vm2, %v4391_v9 }
 0x50c   : > { %3365 = vmatprep.subr.bf16.mxu1 %v4391_v9 }
 0x50d   : > { %v1532_v35 = vpop.permute.xlu1 %1531 }
 0x511   : > { %v1645_v37 = vpop.permute.xlu1 %1644 }
 0x512   : > { %3356 = vmatmul.mubr.msk.bf16.vlgmr.msra.gmra.mrb[8].mxu1 %vm1310_vm5, %v1421_v34  ;;  %v1650_v38 = vsel %vm1310_vm5, %v1645_v37, 0 }
 0x513   : > { %3366 = vmatpush3.bf16.xpose.msra.mxu1 %v1539_v36  ;;  %3367 = vmatprep.mubr.msk.bf16.mxu1 %vm4392_vm2, %v4391_v9 }
 0x514   : > { %3377 = vmatprep.subr.bf16.mxu1 %v4391_v9 }
 0x515   : > { %v1643_v39 = vpop.permute.xlu1 %1642 }
 0x51a   : > { %3368 = vmatmul.mubr.msk.bf16.vlgmr.msra.gmra.mrb[12].mxu1 %vm1310_vm5, %v1532_v35 }
 0x51b   : > { %3378 = vmatpush3.bf16.xpose.msra.mxu1 %v1650_v38  ;;  %3379 = vmatprep.mubr.msk.bf16.mxu1 %vm4392_vm2, %v4391_v9 }
 0x51c   : > { %3389 = vmatprep.subr.bf16.mxu1 %v4391_v9 }
 0x522   : > { %3380 = vmatmul.mubr.msk.bf16.vlgmr.msra.gmra.mrb[16].mxu1 %vm1310_vm5, %v1643_v39 }
 0x523   : > { %3393 = vmatprep.mubr.msk.bf16.mxu1 %vm4392_vm2, %v4391_v9 }
 0x5dd   : > { %v1351_v41 = vpop.f32.mrb[4].mxu1 }
 0x5de   : > { %v1358_v42 = vsel %vm1357_vm6, %v1351_v41, -1e+09  ;;  %v3345_v43 = vpop.f32.mrb[5].mxu1 }
 0x5df   : > { %v1354_v44 = vpop.f32.mrb[6].mxu1  ;;  %v1359_v45 = vsel %vm1310_vm5, %v1358_v42, -inf }
 0x5e0   : > { %1360 = vmax.xlane.f32.xlu1 %v1359_v45  ;;  %v3346_v46 = vpop.f32.mrb[7].mxu1 }
 0x5e5   : > { %v1464_v47 = vpop.f32.mrb[8].mxu1 }
 0x5e6   : > { %v1470_v48 = vsel %vm1357_vm6, %v1464_v47, -1e+09  ;;  %v3357_v49 = vpop.f32.mrb[9].mxu1 }
 0x5e7   : > { %v1467_v50 = vpop.f32.mrb[10].mxu1  ;;  %v1471_v51 = vsel %vm1310_vm5, %v1470_v48, -inf }
 0x5e8   : > { %1472 = vmax.xlane.f32.xlu0 %v1471_v51  ;;  %v3358_v52 = vpop.f32.mrb[11].mxu1 }
 0x5ed   : > { %v1575_v53 = vpop.f32.mrb[12].mxu1 }
 0x5ee   : > { %v1581_v54 = vsel %vm1357_vm6, %v1575_v53, -1e+09  ;;  %v3369_v55 = vpop.f32.mrb[13].mxu1 }
 0x5ef   : > { %v1578_v56 = vpop.f32.mrb[14].mxu1  ;;  %v1582_v57 = vsel %vm1310_vm5, %v1581_v54, -inf  ;;  %v3641_v55 = vld [vmem:[%s982_s1] sm:$0xff]  }
 0x5f0   : > { %1583 = vmax.xlane.f32.xlu1 %v1582_v57  ;;  %v3370_v58 = vpop.f32.mrb[15].mxu1  ;;  %3390 = vmatpush3.bf16.msra.mxu1 %v3641_v55  ;;  %v3642_v56 = vld [vmem:[%s982_s1 + $0x8] sm:$0xff]   ;;  %s5778_s1 = scalar_lea.vmem [#allocation5], %s5219_s13  ;;  %s5781_s13 = scalar_lea.vmem [#allocation20], %s5244_s12 }
 0x5f1   : > { %3391 = vmatprep.subr.bf16.mxu1 %v4391_v9 }
 0x5f4   : > { %3392 = vmatpush3.bf16.msra.mxu1 %v3642_v56 }
 0x5f5   : > { %v1686_v59 = vpop.f32.mrb[16].mxu1  ;;  %3405 = vmatprep.subr.bf16.mxu1 %v4391_v9 }
 0x5f6   : > { %v1692_v60 = vsel %vm1357_vm6, %v1686_v59, -1e+09  ;;  %v3381_v61 = vpop.f32.mrb[17].mxu1 }
 0x5f7   : > { %v1689_v62 = vpop.f32.mrb[18].mxu1  ;;  %v1693_v63 = vsel %vm1310_vm5, %v1692_v60, -inf }
 0x5f8   : > { %1694 = vmax.xlane.f32.xlu0 %v1693_v63  ;;  %v3382_v0 = vpop.f32.mrb[19].mxu1 }
 0x66d   : > { %v1361_v2 = vpop.xlane.xlu1 %1360 }
 0x66e   : > { %v1362_v3 = vsub.f32 %v1358_v42, %v1361_v2 }
 0x670   : > { %v1363_v4 = vmul.f32 1.442695, %v1362_v3 }
 0x672   : > { %3659 = vpow2.f32 %v1363_v4 }
 0x675   : > { %v1473_v5 = vpop.xlane.xlu0 %1472 }
 0x676   : > { %v1474_v6 = vsub.f32 %v1470_v48, %v1473_v5 }
 0x678   : > { %v1475_v7 = vmul.f32 1.442695, %v1474_v6 }
 0x67a   : > { %3661 = vpow2.f32 %v1475_v7 }
 0x67c   : > { %v3660_v8 = vpop.eup %3659 }
 0x67d   : > { %v1365_v10 = vsel %vm1310_vm5, %v3660_v8, 0.0  ;;  %v1584_v18 = vpop.xlane.xlu1 %1583 }
 0x67e   : > { %1366 = vadd.xlane.f32.xlu1 %v1365_v10  ;;  %v1585_v19 = vsub.f32 %v1581_v54, %v1584_v18  ;;  %v3231_v10 = vld [vmem:[%s990_s20] ss:$0 sm:$0xff]  ;;  %s5779_s20 = scalar_lea.vmem [#allocation16], %s5247_s19 }
 0x680   : > { %v1586_v20 = vmul.f32 1.442695, %v1585_v19 }
 0x684   : > { %v3662_v11 = vpop.eup %3661 }
 0x685   : > { %v1695_v12 = vpop.xlane.xlu0 %1694  ;;  %v1477_v13 = vsel %vm1310_vm5, %v3662_v11, 0.0 }
 0x686   : > { %v1696_v14 = vsub.f32 %v1692_v60, %v1695_v12  ;;  %1478 = vadd.xlane.f32.xlu0 %v1477_v13 }
 0x688   : > { %v1697_v15 = vmul.f32 1.442695, %v1696_v14 }
 0x68a   : > { %3663 = vpow2.f32 %v1697_v15 }
 0x68b   : > { %3665 = vpow2.f32 %v1586_v20 }
 0x68f   : > { %1371 = vrot.lane.b32.xlu1 %v5335_v27, %s4400_s0  ;;  %s4406_s0 = smov 24  }
 0x694   : > { %v3664_v16 = vpop.eup %3663 }
 0x695   : > { %v1699_v17 = vsel %vm1310_vm5, %v3664_v16, 0.0  ;;  %v3666_v21 = vpop.eup %3665 }
 0x696   : > { %1700 = vadd.xlane.f32.xlu0 %v1699_v17  ;;  %v1588_v22 = vsel %vm1310_vm5, %v3666_v21, 0.0 }
 0x6ac   : > { %1483 = vrot.lane.b32.xlu0 %v5335_v27, %s4401_s27  ;;  %s5780_s27 = smov %s5779_s20 }
 0x6b3   : > { %1589 = vadd.xlane.f32.xlu1 %v1588_v22 }
 0x6c4   : > { %1594 = vrot.lane.b32.xlu1 %v5335_v27, %s4402_s4  ;;  %s4404_s4 = smov 8  }
 0x6c8   : > { %1705 = vrot.lane.b32.xlu1 %v5335_v27, %s4403_s23  ;;  %s4405_s23 = smov 16  }
 0x70b   : > { %v1367_v23 = vpop.xlane.xlu1 %1366 }
 0x70c   : > { %3667 = vrcp.f32 %v1367_v23  ;;  %v3643_v23 = vld [vmem:[%s1016_s25] sm:$0xff]  }
 0x70f   : > { %v1372_v24 = vpop.permute.xlu1 %1371 }
 0x710   : > { %v1378_v25 = vsel %vm1376_vm7, %v1372_v24, 0  ;;  %v1214_v24 = vld [vmem:[%s5778_s1] sm:$0xff] }
 0x711   : > { %3348 = vmatpush3.bf16.msra.mxu0 %v1378_v25  ;;  %v3645_v25 = vld [vmem:[%s5779_s20] sm:$0xff]  }
 0x712   : > { %3359 = vmatprep.subr.bf16.mxu0 %v4391_v9 }
 0x713   : > { %v1479_v28 = vpop.xlane.xlu0 %1478 }
 0x714   : > { %3669 = vrcp.f32 %v1479_v28  ;;  %v3646_v28 = vld [vmem:[%s5780_s27 + $0x8] sm:$0xff]  }
 0x716   : > { %v3668_v26 = vpop.eup %3667 }
 0x717   : > { %v1369_v29 = vmul.f32 %v3668_v26, %v3660_v8  ;;  %v1925_v26 = vpack.c.bf16 %v1214_v24, %v1214_v24 }
 0x719   : > { %v1370_v30 = vpack.c.bf16 %v1369_v29, %v1369_v29 }
 0x71b   : > { %3350 = vmatmul.mubr.msk.bf16.vlgmr.msra.gmra.mrb[0].mxu0 %vm1310_vm5, %v1370_v30 }
 0x71c   : > { %3361 = vmatprep.mubr.msk.bf16.mxu0 %vm4392_vm2, %v4391_v9 }
 0x71e   : > { %v3670_v27 = vpop.eup %3669 }
 0x71f   : > { %v1481_v32 = vmul.f32 %v3670_v27, %v3662_v11 }
 0x721   : > { %v1482_v35 = vpack.c.bf16 %v1481_v32, %v1481_v32 }
 0x723   : > { %v1701_v31 = vpop.xlane.xlu0 %1700 }
 0x727   : > { %v1484_v33 = vpop.permute.xlu0 %1483 }
 0x728   : > { %v1489_v34 = vsel %vm1376_vm7, %v1484_v33, 0 }
 0x729   : > { %3360 = vmatpush3.bf16.msra.mxu0 %v1489_v34 }
 0x72a   : > { %3371 = vmatprep.subr.bf16.mxu0 %v4391_v9 }
 0x72c   : > { %3362 = vmatmul.mubr.msk.bf16.vlgmr.msra.gmra.mrb[4].mxu0 %vm1310_vm5, %v1482_v35 }
 0x72d   : > { %3373 = vmatprep.mubr.msk.bf16.mxu0 %vm4392_vm2, %v4391_v9 }
 0x740   : > { %v1590_v36 = vpop.xlane.xlu1 %1589 }
 0x741   : > { %3671 = vrcp.f32 %v1590_v36 }
 0x742   : > { %3673 = vrcp.f32 %v1701_v31 }
 0x744   : > { %v1595_v37 = vpop.permute.xlu1 %1594 }
 0x745   : > { %v1600_v38 = vsel %vm1376_vm7, %v1595_v37, 0 }
 0x746   : > { %3372 = vmatpush3.bf16.msra.mxu0 %v1600_v38 }
 0x747   : > { %3383 = vmatprep.subr.bf16.mxu0 %v4391_v9 }
 0x748   : > { %v1706_v41 = vpop.permute.xlu1 %1705 }
 0x749   : > { %v1711_v44 = vsel %vm1376_vm7, %v1706_v41, 0 }
 0x74b   : > { %v3672_v39 = vpop.eup %3671 }
 0x74c   : > { %v1592_v40 = vmul.f32 %v3672_v39, %v3666_v21  ;;  %v3674_v43 = vpop.eup %3673  ;;  %v3239_v39 = vld [vmem:[%s5781_s13] ss:$0 sm:$0xff] }
 0x74d   : > { %v1703_v45 = vmul.f32 %v3674_v43, %v3664_v16 }
 0x74e   : > { %v1593_v42 = vpack.c.bf16 %v1592_v40, %v1592_v40 }
 0x74f   : > { %v1704_v46 = vpack.c.bf16 %v1703_v45, %v1703_v45 }
 0x750   : > { %3374 = vmatmul.mubr.msk.bf16.vlgmr.msra.gmra.mrb[8].mxu0 %vm1310_vm5, %v1593_v42 }
 0x751   : > { %3384 = vmatpush3.bf16.msra.mxu0 %v1711_v44  ;;  %3385 = vmatprep.mubr.msk.bf16.mxu0 %vm4392_vm2, %v4391_v9 }
 0x752   : > { %3397 = vmatprep.subr.bf16.mxu0 %v4391_v9 }
 0x758   : > { %3386 = vmatmul.mubr.msk.bf16.vlgmr.msra.gmra.mrb[12].mxu0 %vm1310_vm5, %v1704_v46 }
 0x759   : > { %3401 = vmatprep.mubr.msk.bf16.mxu0 %vm4392_vm2, %v4391_v9  ;;  %3398 = vmatpush3.bf16.msra.mxu0 %v3645_v25 }
 0x75a   : > { %3399 = vmatprep.subr.bf16.mxu0 %v4391_v9 }
 0x75d   : > { %3400 = vmatpush3.bf16.msra.mxu0 %v3646_v28 }
 0x75e   : > { %3413 = vmatprep.subr.bf16.mxu0 %v4391_v9 }
 0x7ee   : > { %v1414_v47 = vpop.f32.mrb[0].mxu0 }
 0x7ef   : > { %v3351_v48 = vpop.f32.mrb[1].mxu0 }
 0x7f0   : > { %v1417_v49 = vpop.f32.mrb[2].mxu0 }
 0x7f1   : > { %v3352_v50 = vpop.f32.mrb[3].mxu0 }
 0x7ff   : > { %v1525_v51 = vpop.f32.mrb[4].mxu0 }
 0x800   : > { %1754 = vrot.lane.b32.xlu0 %v1525_v51, %s4404_s4  ;;  %v3363_v52 = vpop.f32.mrb[5].mxu0 }
 0x801   : > { %v1528_v53 = vpop.f32.mrb[6].mxu0 }
 0x802   : > { %v3364_v54 = vpop.f32.mrb[7].mxu0 }
 0x823   : > { %v1636_v57 = vpop.f32.mrb[8].mxu0 }
 0x824   : > { %1758 = vrot.lane.b32.xlu1 %v1636_v57, %s4405_s23  ;;  %v3375_v58 = vpop.f32.mrb[9].mxu0 }
 0x825   : > { %v1639_v59 = vpop.f32.mrb[10].mxu0 }
 0x826   : > { %v3376_v60 = vpop.f32.mrb[11].mxu0 }
 0x82b   : > { %v1747_v61 = vpop.f32.mrb[12].mxu0 }
 0x82c   : > { %1762 = vrot.lane.b32.xlu0 %v1747_v61, %s4406_s0  ;;  %v3387_v62 = vpop.f32.mrb[13].mxu0 }
 0x82d   : > { %v1750_v63 = vpop.f32.mrb[14].mxu0 }
 0x82e   : > { %v3388_v0 = vpop.f32.mrb[15].mxu0  ;;  %v2042_v63 = vlaneseq }
 0x872   : > { %v1755_v2 = vpop.permute.xlu0 %1754 }
 0x873   : > { %v1765_v4 = vsel %vm1310_vm5, %v1414_v47, %v1755_v2  ;;  %v2043_v2 = vshrl.u32 %v2042_v63, 7 }
 0x896   : > { %v1759_v3 = vpop.permute.xlu1 %1758 }
 0x897   : > { %v1767_v5 = vsel %vm1766_vm8, %v1765_v4, %v1759_v3  ;;  %v2044_v3 = vsub.s32 0, %v2043_v2  ;;  %v4407_v4 = vmov 0  }
 0x89e   : > { %v1763_v6 = vpop.permute.xlu0 %1762 }
 0x89f   : > { %v1769_v7 = vsel %vm1768_vm9, %v1767_v5, %v1763_v6 }
 0x8a0   : > { %v1770_v8 = vpack.c.bf16 %v1769_v7, %v1769_v7 }
 0x8a2   : > { %3394 = vmatmul.mubr.msk.bf16.vlgmr.msra.gmra.mrb[20].mxu1 %vm1217_vm1, %v1770_v8 }
 0x8a3   : > { %3409 = vmatprep.mubr.msk.bf16.mxu1 %vm4392_vm2, %v4391_v9  ;;  %3406 = vmatpush3.bf16.msra.mxu1 %v3643_v23 }
 0x8a4   : > { %3407 = vmatprep.subr.bf16.mxu1 %v4391_v9 }
 0x975   : > { %v1831_v11 = vpop.f32.mrb[20].mxu1 }
 0x976   : > { %v1832_v12 = vadd.f32 %v3231_v10, %v1831_v11  ;;  %v3395_v13 = vpop.f32.mrb[21].mxu1 }
 0x977   : > { %v1834_v14 = vpop.f32.mrb[22].mxu1 }
 0x978   : > { %v5428_v15 = vadd.f32 %v1832_v12, %v5312_v1  ;;  %v3396_v16 = vpop.f32.mrb[23].mxu1  ;;  %v3644_v1 = vld [vmem:[%s1016_s25 + $0x8] sm:$0xff]   ;;  %s5782_s25 = scalar_lea.vmem [#allocation17], %s5244_s12 }
 0x979   : > { %3408 = vmatpush3.bf16.msra.mxu1 %v3644_v1  ;;  %v3235_v47 = vld [vmem:[%s5782_s25] ss:$0 sm:$0xff] }
 0x97a   : > { %v1838_v17 = vsel %vm1217_vm1, %v5428_v15, 0.0  ;;  %3419 = vmatprep.subr.bf16.mxu1 %v4391_v9 }
 0x97b   : > { %1839 = vadd.xlane.f32.xlu1 %v1838_v17 }
 0x97c   : > { %3410 = vmatmul.mubr.msk.bf16.vlgmr.msra.gmra.mrb[24].mxu1 %vm1217_vm1, %v1925_v26 }
 0x97d   : > { %3421 = vmatprep.mubr.msk.bf16.mxu1 %vm4392_vm2, %v4391_v9 }
 0xa08   : > { %v1840_v18 = vpop.xlane.xlu1 %1839 }
 0xa09   : > { %v1841_v19 = vmul.f32 0.03125, %v1840_v18 }
 0xa0b   : > { %v1842_v20 = vsub.f32 %v5428_v15, %v1841_v19 }
 0xa0d   : > { %v1843_v21 = vmul.f32 %v1842_v20, %v1842_v20 }
 0xa0f   : > { %v1844_v22 = vsel %vm1217_vm1, %v1843_v21, 0.0 }
 0xa10   : > { %1845 = vadd.xlane.f32.xlu0 %v1844_v22 }
 0xa4f   : > { %v1986_v40 = vpop.f32.mrb[24].mxu1 }
 0xa50   : > { %v1987_v41 = vadd.f32 %v3239_v39, %v1986_v40  ;;  %v3411_v42 = vpop.f32.mrb[25].mxu1 }
 0xa51   : > { %v1989_v43 = vpop.f32.mrb[26].mxu1 }
 0xa52   : > { %v5456_v44 = vpack.c.bf16 %v1987_v41, %v1987_v41  ;;  %v3412_v45 = vpop.f32.mrb[27].mxu1 }
 0xa54   : > { %2112 = vrot.lane.b32.xlu0 %v5456_v44, %s4393_s10  ;;  %v1998_v46 = vsel %vm1310_vm5, %v5456_v44, 0 }
 0xa9d   : > { %v1846_v29 = vpop.xlane.xlu0 %1845 }
 0xa9e   : > { %v1847_v30 = vmul.f32 0.032258064, %v1846_v29 }
 0xaa0   : > { %3675 = vrsqrt.f32 %v1847_v30  ;;  %vm1850_vm10 = vcmp.eq.f32.partialorder %v1847_v30, inf  ;;  %v1853_v32 = vand.u32 2147483648, %v1847_v30  ;;  %vm1852_vm11 = vcmp.eq.f32.partialorder %v1847_v30, 0.0 }
 0xaaa   : > { %v3676_v27 = vpop.eup %3675 }
 0xaab   : > { %v1849_v31 = vmul.f32 %v3676_v27, %v1847_v30 }
 0xaad   : > { %v1851_v33 = vsel %vm1850_vm10, %v1847_v30, %v1849_v31 }
 0xaae   : > { %v1854_v34 = vsel %vm1852_vm11, %v1853_v32, %v1851_v33 }
 0xaaf   : > { %v1855_v35 = vadd.f32 1e-06, %v1854_v34 }
 0xab1   : > { %3677 = vrcp.f32 %v1855_v35 }
 0xabb   : > { %v3678_v36 = vpop.eup %3677 }
 0xabc   : > { %v1857_v37 = vmul.f32 %v3678_v36, %v1842_v20 }
 0xabe   : > { %v1858_v38 = vpack.c.bf16 %v1857_v37, %v1857_v37 }
 0xac0   : > { %3402 = vmatmul.mubr.msk.bf16.vlgmr.msra.gmra.mrb[16].mxu0 %vm1217_vm1, %v1858_v38 }
 0xac1   : > { %3415 = vmatprep.mubr.msk.bf16.mxu0 %vm4392_vm2, %v4391_v9  ;;  %3414 = vmatpush3.bf16.xpose.msra.mxu0 %v1998_v46 }
 0xac2   : > { %3425 = vmatprep.subr.bf16.mxu0 %v4391_v9 }
 0xac6   : > { %v2113_v51 = vpop.permute.xlu0 %2112 }
 0xac7   : > { %v2118_v55 = vsel %vm1310_vm5, %v2113_v51, 0 }
 0xb93   : > { %v1919_v48 = vpop.f32.mrb[16].mxu0 }
 0xb94   : > { %v1920_v49 = vadd.f32 %v3235_v47, %v1919_v48  ;;  %v3403_v50 = vpop.f32.mrb[17].mxu0 }
 0xb95   : > { %v1922_v52 = vpop.f32.mrb[18].mxu0 }
 0xb96   : > { %v1992_v53 = vpack.c.bf16 %v1920_v49, %v1920_v49  ;;  %v3404_v54 = vpop.f32.mrb[19].mxu0 }
 0xb98   : > { %2110 = vrot.lane.b32.xlu1 %v1992_v53, %s4393_s10  ;;  %2221 = vrot.lane.b32.xlu0 %v1992_v53, %s4397_s11  ;;  %s5783_s10 = scalar_lea.vmem [#allocation8], %s5216_s26 }
 0xb99   : > { %3416 = vmatmul.mubr.msk.bf16.vlgmr.msra.gmra.mrb[20].mxu0 %vm1310_vm5, %v1992_v53  ;;  %v1216_v0 = vld [vmem:[%s5783_s10] sm:$0x1] }
 0xb9a   : > { %3426 = vmatpush3.bf16.xpose.msra.mxu0 %v2118_v55  ;;  %3427 = vmatprep.mubr.msk.bf16.mxu0 %vm4392_vm2, %v4391_v9  ;;  %vm2040_vm12 = vcmp.ne.f32.partialorder %v1216_v0, 0.0 }
 0xb9b   : > { %3437 = vmatprep.subr.bf16.mxu0 %v4391_v9  ;;  %v2041_v5 = vsel %vm2040_vm12, 1, %v4407_v4 }
 0xb9c   : > { %2223 = vrot.lane.b32.xlu1 %v5456_v44, %s4397_s11  ;;  %2332 = vrot.lane.b32.xlu0 %v1992_v53, %s4399_s7  ;;  %v2045_v6 = vrot.slane %v2041_v5, %v2044_v3  ;;  %s5787_s11 = scalar_lea.vmem [#allocation25], %s5247_s19 }
 0xb9e   : > { %vm2046_vm13 = vcmp.eq.s32.totalorder %v2045_v6, 1 }
 0xba0   : > { %2334 = vrot.lane.b32.xlu1 %v5456_v44, %s4399_s7  ;;  %s5790_s7 = scalar_lea.vmem [#allocation29], %s5244_s12 }
 0xc0a   : > { %v2111_v56 = vpop.permute.xlu1 %2110  ;;  %v2222_v60 = vpop.permute.xlu0 %2221 }
 0xc0b   : > { %3428 = vmatmul.mubr.msk.bf16.vlgmr.msra.gmra.mrb[24].mxu0 %vm1310_vm5, %v2111_v56 }
 0xc0c   : > { %3439 = vmatprep.mubr.msk.bf16.mxu0 %vm4392_vm2, %v4391_v9 }
 0xc0e   : > { %v2224_v57 = vpop.permute.xlu1 %2223  ;;  %v2333_v62 = vpop.permute.xlu0 %2332 }
 0xc0f   : > { %v2229_v58 = vsel %vm1310_vm5, %v2224_v57, 0 }
 0xc10   : > { %3438 = vmatpush3.bf16.xpose.msra.mxu0 %v2229_v58 }
 0xc11   : > { %3449 = vmatprep.subr.bf16.mxu0 %v4391_v9 }
 0xc12   : > { %v2335_v59 = vpop.permute.xlu1 %2334 }
 0xc13   : > { %v2340_v61 = vsel %vm1310_vm5, %v2335_v59, 0 }
 0xc17   : > { %3440 = vmatmul.mubr.msk.bf16.vlgmr.msra.gmra.mrb[28].mxu0 %vm1310_vm5, %v2222_v60 }
 0xc18   : > { %3450 = vmatpush3.bf16.xpose.msra.mxu0 %v2340_v61  ;;  %3451 = vmatprep.mubr.msk.bf16.mxu0 %vm4392_vm2, %v4391_v9 }
 0xc19   : > { %3461 = vmatprep.subr.bf16.mxu0 %v4391_v9 }
 0xc1f   : > { %3452 = vmatmul.mubr.msk.bf16.vlgmr.msra.gmra.mrb[32].mxu0 %vm1310_vm5, %v2333_v62 }
 0xc20   : > { %3465 = vmatprep.mubr.msk.bf16.mxu0 %vm4392_vm2, %v4391_v9 }
 0xc6c   : > { %v2034_v7 = vpop.f32.mrb[20].mxu0 }
 0xc6d   : > { %v2047_v8 = vsel %vm2046_vm13, %v2034_v7, -1e+09  ;;  %v3417_v10 = vpop.f32.mrb[21].mxu0 }
 0xc6e   : > { %v2037_v11 = vpop.f32.mrb[22].mxu0  ;;  %v2048_v12 = vsel %vm1310_vm5, %v2047_v8, -inf }
 0xc6f   : > { %2049 = vmax.xlane.f32.xlu1 %v2048_v12  ;;  %v3418_v13 = vpop.f32.mrb[23].mxu0 }
 0xcde   : > { %v2154_v14 = vpop.f32.mrb[24].mxu0 }
 0xcdf   : > { %v2160_v16 = vsel %vm2046_vm13, %v2154_v14, -1e+09  ;;  %v3429_v17 = vpop.f32.mrb[25].mxu0 }
 0xce0   : > { %v2157_v18 = vpop.f32.mrb[26].mxu0  ;;  %v2161_v19 = vsel %vm1310_vm5, %v2160_v16, -inf }
 0xce1   : > { %2162 = vmax.xlane.f32.xlu0 %v2161_v19  ;;  %v3430_v20 = vpop.f32.mrb[27].mxu0 }
 0xcea   : > { %v2265_v21 = vpop.f32.mrb[28].mxu0 }
 0xceb   : > { %v2271_v22 = vsel %vm2046_vm13, %v2265_v21, -1e+09  ;;  %v3441_v23 = vpop.f32.mrb[29].mxu0 }
 0xcec   : > { %v2268_v1 = vpop.f32.mrb[30].mxu0  ;;  %v2272_v24 = vsel %vm1310_vm5, %v2271_v22, -inf }
 0xced   : > { %2273 = vmax.xlane.f32.xlu0 %v2272_v24  ;;  %v3442_v25 = vpop.f32.mrb[31].mxu0 }
 0xcf2   : > { %v2376_v26 = vpop.f32.mrb[32].mxu0 }
 0xcf3   : > { %v2382_v28 = vsel %vm2046_vm13, %v2376_v26, -1e+09  ;;  %v3453_v29 = vpop.f32.mrb[33].mxu0 }
 0xcf4   : > { %v2379_v30 = vpop.f32.mrb[34].mxu0  ;;  %v2383_v27 = vsel %vm1310_vm5, %v2382_v28, -inf }
 0xcf5   : > { %2384 = vmax.xlane.f32.xlu1 %v2383_v27  ;;  %v3454_v31 = vpop.f32.mrb[35].mxu0 }
 0xcfc   : > { %v2050_v32 = vpop.xlane.xlu1 %2049 }
 0xcfd   : > { %v2051_v33 = vsub.f32 %v2047_v8, %v2050_v32 }
 0xcff   : > { %v2052_v34 = vmul.f32 1.442695, %v2051_v33 }
 0xd01   : > { %3679 = vpow2.f32 %v2052_v34 }
 0xd0b   : > { %v3680_v35 = vpop.eup %3679 }
 0xd0c   : > { %v2054_v36 = vsel %vm1310_vm5, %v3680_v35, 0.0 }
 0xd0d   : > { %2055 = vadd.xlane.f32.xlu0 %v2054_v36 }
 0xd6e   : > { %v2163_v37 = vpop.xlane.xlu0 %2162 }
 0xd6f   : > { %v2164_v38 = vsub.f32 %v2160_v16, %v2163_v37 }
 0xd71   : > { %v2165_v39 = vmul.f32 1.442695, %v2164_v38 }
 0xd73   : > { %3681 = vpow2.f32 %v2165_v39 }
 0xd7a   : > { %v2274_v40 = vpop.xlane.xlu0 %2273 }
 0xd7b   : > { %v2275_v41 = vsub.f32 %v2271_v22, %v2274_v40 }
 0xd7d   : > { %v3682_v42 = vpop.eup %3681  ;;  %v2276_v43 = vmul.f32 1.442695, %v2275_v41 }
 0xd7e   : > { %v2167_v45 = vsel %vm1310_vm5, %v3682_v42, 0.0 }
 0xd7f   : > { %3683 = vpow2.f32 %v2276_v43  ;;  %2168 = vadd.xlane.f32.xlu1 %v2167_v45 }
 0xd82   : > { %v2385_v48 = vpop.xlane.xlu1 %2384 }
 0xd83   : > { %v2386_v49 = vsub.f32 %v2382_v28, %v2385_v48 }
 0xd85   : > { %v2387_v50 = vmul.f32 1.442695, %v2386_v49 }
 0xd87   : > { %3685 = vpow2.f32 %v2387_v50 }
 0xd89   : > { %v3684_v46 = vpop.eup %3683 }
 0xd8a   : > { %v2278_v47 = vsel %vm1310_vm5, %v3684_v46, 0.0 }
 0xd8b   : > { %2279 = vadd.xlane.f32.xlu0 %v2278_v47 }
 0xd90   : > { %2173 = vrot.lane.b32.xlu1 %v5456_v44, %s4395_s8 }
 0xd91   : > { %v3686_v51 = vpop.eup %3685 }
 0xd92   : > { %v2389_v52 = vsel %vm1310_vm5, %v3686_v51, 0.0 }
 0xd9a   : > { %v2056_v53 = vpop.xlane.xlu0 %2055 }
 0xd9b   : > { %3687 = vrcp.f32 %v2056_v53  ;;  %v3649_v53 = vld [vmem:[%s5787_s11] sm:$0xff]  }
 0xda1   : > { %2061 = vrot.lane.b32.xlu0 %v5456_v44, %s4394_s24  ;;  %s5784_s24 = scalar_lea.vmem [#allocation22], %s5247_s19  ;;  %s5789_s19 = scalar_lea.vmem [#allocation26], %s5244_s12 }
 0xda2   : > { %v3647_v23 = vld [vmem:[%s5784_s24] sm:$0xff]   ;;  %s5785_s8 = smov %s5784_s24 }
 0xda3   : > { %3462 = vmatpush3.bf16.msra.mxu0 %v3647_v23  ;;  %v3648_v1 = vld [vmem:[%s5785_s8 + $0x8] sm:$0xff]  }
 0xda4   : > { %3463 = vmatprep.subr.bf16.mxu0 %v4391_v9 }
 0xda5   : > { %2395 = vrot.lane.b32.xlu0 %v5456_v44, %s4398_s14  ;;  %v3688_v55 = vpop.eup %3687  ;;  %s5788_s14 = smov %s5787_s11 }
 0xda6   : > { %v2058_v57 = vmul.f32 %v3688_v55, %v3680_v35  ;;  %v3652_v55 = vld [vmem:[%s5296_s28 + $0x8] sm:$0xff]  }
 0xda7   : > { %3464 = vmatpush3.bf16.msra.mxu0 %v3648_v1 }
 0xda8   : > { %v2059_v61 = vpack.c.bf16 %v2058_v57, %v2058_v57  ;;  %3477 = vmatprep.subr.bf16.mxu0 %v4391_v9 }
 0xdb4   : > { %2390 = vadd.xlane.f32.xlu1 %v2389_v52 }
 0xdc5   : > { %2284 = vrot.lane.b32.xlu1 %v5456_v44, %s4396_s5  ;;  %s5786_s5 = scalar_lea.vmem [#allocation23], %s5244_s12 }
 0xdc6   : > { %v3251_v39 = vld [vmem:[%s5786_s5] ss:$0 sm:$0xff] }
 0xe0c   : > { %v2169_v54 = vpop.xlane.xlu1 %2168 }
 0xe0d   : > { %3689 = vrcp.f32 %v2169_v54  ;;  %v3650_v54 = vld [vmem:[%s5788_s14 + $0x8] sm:$0xff]  }
 0xe10   : > { %v2174_v60 = vpop.permute.xlu1 %2173 }
 0xe11   : > { %v2179_v63 = vsel %vm1376_vm7, %v2174_v60, 0 }
 0xe17   : > { %v3690_v62 = vpop.eup %3689 }
 0xe18   : > { %v2280_v56 = vpop.xlane.xlu0 %2279  ;;  %v2171_v44 = vmul.f32 %v3690_v62, %v3682_v42 }
 0xe19   : > { %3691 = vrcp.f32 %v2280_v56 }
 0xe1a   : > { %v2172_v0 = vpack.c.bf16 %v2171_v44, %v2171_v44 }
 0xe1c   : > { %v2062_v58 = vpop.permute.xlu0 %2061 }
 0xe1d   : > { %v2067_v59 = vsel %vm1376_vm7, %v2062_v58, 0 }
 0xe1e   : > { %3420 = vmatpush3.bf16.msra.mxu1 %v2067_v59 }
 0xe1f   : > { %3431 = vmatprep.subr.bf16.mxu1 %v4391_v9 }
 0xe20   : > { %v2396_v7 = vpop.permute.xlu0 %2395 }
 0xe21   : > { %3422 = vmatmul.mubr.msk.bf16.vlgmr.msra.gmra.mrb[28].mxu1 %vm1310_vm5, %v2059_v61  ;;  %v2401_v10 = vsel %vm1376_vm7, %v2396_v7, 0 }
 0xe22   : > { %3432 = vmatpush3.bf16.msra.mxu1 %v2179_v63  ;;  %3433 = vmatprep.mubr.msk.bf16.mxu1 %vm4392_vm2, %v4391_v9 }
 0xe23   : > { %3443 = vmatprep.subr.bf16.mxu1 %v4391_v9  ;;  %v3692_v2 = vpop.eup %3691 }
 0xe24   : > { %v2282_v4 = vmul.f32 %v3692_v2, %v3684_v46 }
 0xe26   : > { %v2283_v8 = vpack.c.bf16 %v2282_v4, %v2282_v4  ;;  %v3654_v4 = vld [vmem:[%s5296_s28 + $0x18] sm:$0xff]  }
 0xe29   : > { %3434 = vmatmul.mubr.msk.bf16.vlgmr.msra.gmra.mrb[32].mxu1 %vm1310_vm5, %v2172_v0 }
 0xe2a   : > { %3445 = vmatprep.mubr.msk.bf16.mxu1 %vm4392_vm2, %v4391_v9 }
 0xe41   : > { %v2391_v3 = vpop.xlane.xlu1 %2390 }
 0xe42   : > { %3693 = vrcp.f32 %v2391_v3  ;;  %v3653_v3 = vld [vmem:[%s5296_s28 + $0x10] sm:$0xff]  }
 0xe45   : > { %v2285_v5 = vpop.permute.xlu1 %2284 }
 0xe46   : > { %v2290_v6 = vsel %vm1376_vm7, %v2285_v5, 0  ;;  %v3255_v5 = vld [vmem:[%s5789_s19] ss:$0 sm:$0xff] }
 0xe47   : > { %3444 = vmatpush3.bf16.msra.mxu1 %v2290_v6 }
 0xe48   : > { %3455 = vmatprep.subr.bf16.mxu1 %v4391_v9 }
 0xe4a   : > { %3446 = vmatmul.mubr.msk.bf16.vlgmr.msra.gmra.mrb[36].mxu1 %vm1310_vm5, %v2283_v8 }
 0xe4b   : > { %3456 = vmatpush3.bf16.msra.mxu1 %v2401_v10  ;;  %3457 = vmatprep.mubr.msk.bf16.mxu1 %vm4392_vm2, %v4391_v9 }
 0xe4c   : > { %v3694_v11 = vpop.eup %3693  ;;  %3469 = vmatprep.subr.bf16.mxu1 %v4391_v9 }
 0xe4d   : > { %v2393_v12 = vmul.f32 %v3694_v11, %v3686_v51 }
 0xe4f   : > { %v2394_v13 = vpack.c.bf16 %v2393_v12, %v2393_v12 }
 0xe52   : > { %3458 = vmatmul.mubr.msk.bf16.vlgmr.msra.gmra.mrb[40].mxu1 %vm1310_vm5, %v2394_v13 }
 0xe53   : > { %3473 = vmatprep.mubr.msk.bf16.mxu1 %vm4392_vm2, %v4391_v9  ;;  %3470 = vmatpush3.bf16.msra.mxu1 %v3649_v53 }
 0xe54   : > { %3471 = vmatprep.subr.bf16.mxu1 %v4391_v9 }
 0xe57   : > { %3472 = vmatpush3.bf16.msra.mxu1 %v3650_v54 }
 0xef4   : > { %v2103_v14 = vpop.f32.mrb[28].mxu1 }
 0xef5   : > { %v3423_v16 = vpop.f32.mrb[29].mxu1 }
 0xef6   : > { %v2106_v17 = vpop.f32.mrb[30].mxu1 }
 0xef7   : > { %v3424_v18 = vpop.f32.mrb[31].mxu1 }
 0xefc   : > { %v2215_v19 = vpop.f32.mrb[32].mxu1 }
 0xefd   : > { %2444 = vrot.lane.b32.xlu1 %v2215_v19, %s4404_s4  ;;  %v3435_v20 = vpop.f32.mrb[33].mxu1 }
 0xefe   : > { %v2218_v21 = vpop.f32.mrb[34].mxu1 }
 0xeff   : > { %v3436_v22 = vpop.f32.mrb[35].mxu1 }
 0xf1d   : > { %v2326_v24 = vpop.f32.mrb[36].mxu1 }
 0xf1e   : > { %2448 = vrot.lane.b32.xlu0 %v2326_v24, %s4405_s23  ;;  %v3447_v25 = vpop.f32.mrb[37].mxu1 }
 0xf1f   : > { %v2329_v26 = vpop.f32.mrb[38].mxu1 }
 0xf20   : > { %v3448_v28 = vpop.f32.mrb[39].mxu1 }
 0xf25   : > { %v2437_v29 = vpop.f32.mrb[40].mxu1 }
 0xf26   : > { %2452 = vrot.lane.b32.xlu1 %v2437_v29, %s4406_s0  ;;  %v3459_v30 = vpop.f32.mrb[41].mxu1 }
 0xf27   : > { %v2440_v27 = vpop.f32.mrb[42].mxu1 }
 0xf28   : > { %v3460_v31 = vpop.f32.mrb[43].mxu1 }
 0xf6f   : > { %v2445_v32 = vpop.permute.xlu1 %2444 }
 0xf70   : > { %v2455_v34 = vsel %vm1310_vm5, %v2103_v14, %v2445_v32  ;;  %v3259_v14 = vld [vmem:[%s5790_s7] ss:$0 sm:$0xff] }
 0xf90   : > { %v2449_v33 = vpop.permute.xlu0 %2448 }
 0xf91   : > { %v2456_v35 = vsel %vm1766_vm8, %v2455_v34, %v2449_v33 }
 0xf98   : > { %v2453_v36 = vpop.permute.xlu1 %2452 }
 0xf99   : > { %v2457_v37 = vsel %vm1768_vm9, %v2456_v35, %v2453_v36 }
 0xf9a   : > { %v2458_v38 = vpack.c.bf16 %v2457_v37, %v2457_v37 }
 0xf9c   : > { %3466 = vmatmul.mubr.msk.bf16.vlgmr.msra.gmra.mrb[36].mxu0 %vm1217_vm1, %v2458_v38 }
 0xf9d   : > { %3485 = vmatprep.mubr.msk.bf16.mxu0 %vm4392_vm2, %v4391_v9 }
0x106f   : > { %v2519_v40 = vpop.f32.mrb[36].mxu0 }
0x1070   : > { %v2520_v41 = vadd.f32 %v3251_v39, %v2519_v40  ;;  %v3467_v42 = vpop.f32.mrb[37].mxu0 }
0x1071   : > { %v2522_v43 = vpop.f32.mrb[38].mxu0 }
0x1072   : > { %v2525_v45 = vadd.f32 %v2520_v41, %v5428_v15  ;;  %v3468_v46 = vpop.f32.mrb[39].mxu0  ;;  %v3651_v15 = vld [vmem:[%s5296_s28] sm:$0xff]   ;;  %s5791_s28 = sld [smem:[#allocation48_spill]] }
0x1073   : > { %3478 = vmatpush3.bf16.msra.mxu0 %v3651_v15 }
0x1074   : > { %v2526_v47 = vsel %vm1217_vm1, %v2525_v45, 0.0  ;;  %3479 = vmatprep.subr.bf16.mxu0 %v4391_v9 }
0x1075   : > { %2527 = vadd.xlane.f32.xlu0 %v2526_v47 }
0x1077   : > { %3480 = vmatpush3.bf16.msra.mxu0 %v3652_v55 }
0x1078   : > { %3481 = vmatprep.subr.bf16.mxu0 %v4391_v9  ;;  %p3265_p13 = scmp.ge.s32.totalorder %s5791_s28, 1 }
0x107b   : > { %3482 = vmatpush3.bf16.msra.mxu0 %v3653_v3 }
0x107c   : > { %3483 = vmatprep.subr.bf16.mxu0 %v4391_v9 }
0x107f   : > { %3484 = vmatpush3.bf16.msra.mxu0 %v3654_v4 }
0x1102   : > { %v2528_v48 = vpop.xlane.xlu0 %2527 }
0x1103   : > { %v2529_v49 = vmul.f32 0.03125, %v2528_v48 }
0x1105   : > { %v2530_v50 = vsub.f32 %v2525_v45, %v2529_v49 }
0x1107   : > { %v2531_v51 = vmul.f32 %v2530_v50, %v2530_v50 }
0x1109   : > { %v2532_v52 = vsel %vm1217_vm1, %v2531_v51, 0.0 }
0x110a   : > { %2533 = vadd.xlane.f32.xlu1 %v2532_v52 }
0x1197   : > { %v2534_v56 = vpop.xlane.xlu1 %2533 }
0x1198   : > { %v2535_v57 = vmul.f32 0.032258064, %v2534_v56 }
0x119a   : > { %3695 = vrsqrt.f32 %v2535_v57  ;;  %vm2538_vm14 = vcmp.eq.f32.partialorder %v2535_v57, inf  ;;  %v2541_v60 = vand.u32 2147483648, %v2535_v57  ;;  %vm2540_vm15 = vcmp.eq.f32.partialorder %v2535_v57, 0.0 }
0x11a4   : > { %v3696_v58 = vpop.eup %3695 }
0x11a5   : > { %v2537_v59 = vmul.f32 %v3696_v58, %v2535_v57 }
0x11a7   : > { %v2539_v61 = vsel %vm2538_vm14, %v2535_v57, %v2537_v59 }
0x11a8   : > { %v2542_v62 = vsel %vm2540_vm15, %v2541_v60, %v2539_v61 }
0x11a9   : > { %v2543_v63 = vadd.f32 1e-06, %v2542_v62 }
0x11ab   : > { %3697 = vrcp.f32 %v2543_v63 }
0x11b5   : > { %v3698_v44 = vpop.eup %3697 }
0x11b6   : > { %v2545_v0 = vmul.f32 %v3698_v44, %v2530_v50 }
0x11b8   : > { %v2546_v2 = vpack.c.bf16 %v2545_v0, %v2545_v0 }
0x11ba   : > { %3474 = vmatmul.mubr.msk.bf16.vlgmr.msra.gmra.mrb[44].mxu1 %vm1217_vm1, %v2546_v2 }
0x128d   : > { %v2607_v6 = vpop.f32.mrb[44].mxu1 }
0x128e   : > { %v2608_v7 = vadd.f32 %v3255_v5, %v2607_v6  ;;  %v3475_v8 = vpop.f32.mrb[45].mxu1 }
0x128f   : > { %v2610_v10 = vpop.f32.mrb[46].mxu1 }
0x1290   : > { %v2613_v11 = vmax.f32 %v2608_v7, 0.0  ;;  %v3476_v12 = vpop.f32.mrb[47].mxu1 }
0x1292   : > { %v2614_v13 = vpack.c.bf16 %v2613_v11, %v2613_v11 }
0x1294   : > { %3486 = vmatmul.mubr.msk.bf16.vlgmr.msra.gmra.mrb[40].mxu0 %vm2654_vm0, %v2614_v13 }
0x1364   : > { %2702 = sbr.rel (%p3265_p13) target bundleno = 4973 (0x136d), region = 172 }
0x1367   : > { %v2692_v16 = vpop.f32.mrb[40].mxu0 }
0x1368   : > { %v2693_v17 = vadd.f32 %v3259_v14, %v2692_v16  ;;  %v3487_v18 = vpop.f32.mrb[41].mxu0 }
0x1369   : > { %v2695_v19 = vpop.f32.mrb[42].mxu0 }
0x136a   : > { %v2698_v9 = vadd.f32 %v2693_v17, %v2525_v45  ;;  %v3488_v20 = vpop.f32.mrb[43].mxu0 }
0x136c   : > { %2703 = vst.msk [vmem:[%s5305_s30] sm:$0xff] %vm1217_vm1, %v2698_v9 }
0x136d PF: > { %s5792_s4 = sld [smem:[#allocation48_spill]] }
0x1373   : > { %p3266_p11 = scmp.ne.s32.totalorder %s5792_s4, 1 }
0x1374   : > { %v2708_v21 = vsel (!%p3266_p11), %vm1217_vm1, %v2698_v9, 0.0 }
0x1375   : > { %2707 = sbr.rel (%p3266_p11) target bundleno = 5305 (0x14b9), region = 176  ;;  %2709 = vadd.xlane.f32.xlu0 (!%p3266_p11), %v2708_v21 }
0x1402   : > { %v2710_v22 = vpop.xlane.xlu0 %2709 }
0x1403   : > { %v2711_v23 = vmul.f32 0.03125, %v2710_v22 }
0x1405   : > { %v2712_v1 = vsub.f32 %v2698_v9, %v2711_v23 }
0x1407   : > { %v2713_v24 = vmul.f32 %v2712_v1, %v2712_v1 }
0x1409   : > { %v2714_v25 = vsel %vm1217_vm1, %v2713_v24, 0.0 }
0x140a   : > { %2715 = vadd.xlane.f32.xlu0 %v2714_v25 }
0x1497   : > { %v2716_v26 = vpop.xlane.xlu0 %2715 }
0x1498   : > { %v2717_v28 = vmul.f32 0.032258064, %v2716_v26 }
0x149a   : > { %3699 = vrsqrt.f32 %v2717_v28  ;;  %vm2720_vm2 = vcmp.eq.f32.partialorder %v2717_v28, inf  ;;  %v2723_v27 = vand.u32 2147483648, %v2717_v28  ;;  %vm2722_vm3 = vcmp.eq.f32.partialorder %v2717_v28, 0.0 }
0x14a4   : > { %v3700_v29 = vpop.eup %3699 }
0x14a5   : > { %v2719_v30 = vmul.f32 %v3700_v29, %v2717_v28 }
0x14a7   : > { %v2721_v31 = vsel %vm2720_vm2, %v2717_v28, %v2719_v30 }
0x14a8   : > { %v2724_v32 = vsel %vm2722_vm3, %v2723_v27, %v2721_v31 }
0x14a9   : > { %v2725_v33 = vadd.f32 1e-06, %v2724_v32 }
0x14ab   : > { %3701 = vrcp.f32 %v2725_v33 }
0x14b5   : > { %v3702_v34 = vpop.eup %3701 }
0x14b6   : > { %v2727_v35 = vmul.f32 %v3702_v34, %v2712_v1 }
0x14b8   : > { %2728 = vst.msk [vmem:[%s5305_s30] sm:$0xff] %vm1217_vm1, %v2727_v35 }
0x14b9 PF: > { %s5793_s12 = sld [smem:[#allocation49_spill]]  ;;  %s5794_s23 = sld [smem:[#allocation57_spill]] }
0x14ba   : > { %s5795_s27 = sld [smem:[#allocation76_spill]]  ;;  %s2743_s10 = sshll.u32 %s5305_s30, 4  ;;  %s2744_s10 = int_to_ptr.vmem [resolvable:$true] %s2743_s10 }
0x14bb   : > { %s2730_s24 = scalar_lea.sflag [#allocation4], %s5216_s26  ;;  %s4207_s8 = scalar_lea.vmem %s2744_s10, 128 }
0x14bc   : > { %p4208_p5 = scmp.ne.s32.totalorder %s2744_s10, %s4207_s8  ;;  %s4408_s5 = smov [#allocation31]  }
0x14bd   : > { %s4211_s11 = sshll.u32 %s4408_s5, 4  ;;  %s4212_s11 = int_to_ptr.vmem [resolvable:$false] %s4211_s11 }
0x14be   : > { %s4213_s14 = scalar_lea.vmem %s4212_s11, 256  ;;  %p4214_p6 = scmp.lt.s32.totalorder %s2744_s10, %s4212_s11 }
0x14bf   : > { %s3268_s0 = sshll.u32 %s5793_s12, 7  ;;  %p5797_p1 = scmp.ne.s32.totalorder %s5794_s23, 0 }
0x14c0   : > { %s5796_s13 = smov %s5795_s27  ;;  %s5581_s25 = scalar_lea.hbm %s5795_s27, %s3268_s0 }
0x14c1   : > { %p4209_p4 = pnand %p4208_p5, %p5797_p1  ;;  %p4215_p3 = scmp.lt.s32.totalorder %s4213_s14, %s4207_s8 }
0x14c3   : > { %p4210_p2 = pneg %p4209_p4  ;;  %p4216_p0 = por %p4215_p3, %p4214_p6 }
0x14c5   : > { %p4217_p12 = pnand %p4216_p0, %p4210_p2 }
0x14c7   : > { %4220 = shalt.err (!%p4217_p12)
}
0x14c8   : > { %s4221_s26 = scalar_lea.hbm %s5581_s25, 128  ;;  %s4225_s7 = scalar_lea.hbm %s5796_s13, 256 }
0x14c9   : > { %p4222_p10 = scmp.ne.s32.totalorder %s5581_s25, %s4221_s26  ;;  %p4226_p8 = scmp.lt.u32.totalorder %s5581_s25, %s5796_s13 }
0x14ca   : > { %p4227_p13 = scmp.lt.u32.totalorder %s4225_s7, %s4221_s26  ;;  %p4229_p5 = scmp.lt.u32.totalorder %s4221_s26, %s5581_s25 }
0x14cb   : > { %p4223_p9 = pnand %p4222_p10, %p5797_p1 }
0x14cc   : > { %p4228_p11 = por %p4227_p13, %p4226_p8 }
0x14cd   : > { %p4224_p7 = pneg %p4223_p9 }
0x14ce   : > { %p4230_p4 = por %p4229_p5, %p4228_p11 }
0x14d0   : > { %p4231_p2 = pnand %p4230_p4, %p4224_p7 }
0x14d2   : > { %4234 = shalt.err (!%p4231_p2)
}
0x14d3   : > { %3525 = dma.vmem_to_hbm [thread:$0]  (%p5797_p1), %s2744_s10, 128, %s5581_s25, %s2730_s24  }
0x14d4 PF: > { %s5798_s12 = sld [smem:[#allocation45_spill]]  ;;  %s5799_s0 = sld [smem:[#allocation58_spill]] }
0x14d5   : > { %p3531_p6 = scmp.ge.s32.totalorder %s4369_s2, 2 }
0x14da   : > { %s2755_s1 = sand.u32 1, %s5798_s12   ;;  %p5800_p3 = scmp.ne.s32.totalorder %s5799_s0, 0 }
0x14db   : > { %s2756_s20 = scalar_lea.sflag [#allocation4], %s2755_s1 }
0x14dc   : > { %p3528_p0 = pnand %p3531_p6, %p5800_p3 }
0x14de   : > { %4324 = dma.done.wait (!%p3528_p0), %s2756_s20, 128  }
0x14df   : > { %4326 = vsyncadd (!%p3528_p0), %s2756_s20, 4294967168  ;;  %s61_s2 = sadd.s32 1, %s4369_s2   ;;  %s5801_s27 = sld [smem:[#allocation44_spill]] }
0x14e0   : > { %p58_p12 = scmp.ge.s32.totalorder %s61_s2, 6   ;;  %s5802_s8 = sld [smem:[#allocation54_spill]] }
0x14e1   : > { %s5803_s30 = sld [smem:[#allocation46_spill]]  ;;  %s5804_s0 = sld [smem:[#allocation47_spill]] }
0x14e2   : > { %s5805_s19 = sld [smem:[#allocation55_spill]]  ;;  %s5806_s23 = sld [smem:[#allocation51_spill]] }
0x14e3   : > { %s5807_s25 = sld [smem:[#allocation52_spill]]  ;;  %s5808_s28 = smov %s4337_s29 }
0x14e4   : > { %s5810_s1 = smov %s4361_s21  ;;  %s5811_s20 = smov %s4365_s22 }
0x14e5   :  { %60 = sbr.rel (!%p58_p12) target bundleno = 46 (0x2e), region = 354 }
0x14e6   : > { %s5809_s29 = smov %s5802_s8 }
0x14e8   : > { %s5812_s21 = smov %s5806_s23 }
0x14e9   : > { %s5813_s22 = smov %s5807_s25 }
0x14ec   :  { %2761 = vsyncpa [#allocation3], 1 }
0x14ed   :  { %2763 = vsyncpa [#allocation3 + $0x1], 1 }
0x14ee   :  { %2764 = vsyncpa [#allocation6], 1 }
0x14ef   :  { %2766 = vsyncpa [#allocation6 + $0x1], 1 }
0x14f0   :  { %2767 = vsyncpa [#allocation9], 1 }
0x14f1   :  { %2769 = vsyncpa [#allocation9 + $0x1], 1 }
0x14f2   :  { %2770 = vsyncpa [#allocation12], 1 }
0x14f3   :  { %2772 = vsyncpa [#allocation12 + $0x1], 1 }
0x14f4   :  { %2773 = vsyncpa [#allocation15], 1 }
0x14f5   :  { %2775 = vsyncpa [#allocation15 + $0x1], 1 }
0x14f6   :  { %2776 = vsyncpa [#allocation18], 1 }
0x14f7   :  { %2778 = vsyncpa [#allocation18 + $0x1], 1 }
0x14f8   :  { %2779 = vsyncpa [#allocation21], 1 }
0x14f9   :  { %2781 = vsyncpa [#allocation21 + $0x1], 1 }
0x14fa   :  { %2782 = vsyncpa [#allocation24], 1 }
0x14fb   :  { %2784 = vsyncpa [#allocation24 + $0x1], 1 }
0x14fc   :  { %2785 = vsyncpa [#allocation27], 1 }
0x14fd   :  { %2787 = vsyncpa [#allocation27 + $0x1], 1 }
0x14fe   :  { %2788 = vsyncpa [#allocation30], 1 }
0x14ff   :  { %2790 = vsyncpa [#allocation30 + $0x1], 1 }
0x1500   :  { %2791 = vsyncpa [#allocation4], 1 }
0x1501   :  { %2793 = vsyncpa [#allocation4 + $0x1], 1 }

</bundles_post_ra>
